<compile_context>
chip_gen: v6e
topology: v6e:2x2x1
jax: 0.10.0
libtpu: 0.0.40
codegen_flags: <defaults>
</compile_context>

<pallas_src>
import numpy as np
import jax
import jax.numpy as jnp
from jax.experimental import pallas as pl
from jax.experimental.pallas import tpu as pltpu

# ---- synthetic model / loss hyper-parameters (deterministic, in-script) -----
N_POINTS   = 128     # points per sample
C_IN       = 3       # xyz
H1         = 32
H2         = 64
D_OUT      = 16      # descriptor size
MARGIN     = 1.0     # triplet margin
TB_DEFAULT = 64      # samples per grid step (multiple of 8); sized to stay well
                     # under v7x's 64 MiB VMEM in f32 with double buffering.


# ----------------------------- encoder kernel --------------------------------
# One grid step == TB samples. Hot path: 3 VPU FMAs (layer 1), one big MXU matmul
# over all TB*N points (layer 2), per-sample max-pool, head matmul, L2-normalize.
def _make_encoder_kernel(tb):
    def kernel(x_ref, w1_ref, b1_ref, w2_ref, b2_ref, w3_ref, b3_ref, out_ref):
        xf = x_ref[...]                                            # (tb*N, C_IN)
        # Layer 1: K=3 contraction -> 3 VPU FMAs (too small to be worth the MXU).
        h1 = (xf[:, 0:1] * w1_ref[0:1, :]
              + xf[:, 1:2] * w1_ref[1:2, :]
              + xf[:, 2:3] * w1_ref[2:3, :]
              + b1_ref[...])
        h1 = jnp.maximum(h1, 0.0)                                  # (tb*N, H1)
        # Layer 2: single MXU matmul over the whole tile of points.
        h2 = jnp.dot(h1, w2_ref[...],
                     preferred_element_type=jnp.float32) + b2_ref[...]
        h2 = jnp.maximum(h2, 0.0)                                  # (tb*N, H2)
        # Per-sample global max-pool (sublane-split reshape: N_POINTS % 8 == 0).
        pooled = jnp.max(h2.reshape(tb, N_POINTS, H2), axis=1)     # (tb, H2)
        # Head + L2-normalize.
        d = jnp.dot(pooled, w3_ref[...],
                    preferred_element_type=jnp.float32) + b3_ref[...]
        inv = jax.lax.rsqrt(jnp.sum(d * d, axis=-1, keepdims=True) + 1e-12)
        out_ref[...] = (d * inv).astype(out_ref.dtype)             # (tb, D_OUT)
    return kernel


def pallas_encode(x, params, tb=TB_DEFAULT):
    """x: (B, N_POINTS, C_IN) float32 -> descriptors (B, D_OUT) float32."""
    B = x.shape[0]
    w1, b1, w2, b2, w3, b3 = params

    # Batch tile: multiple of 8 samples, no larger than the (padded) batch.
    tb = int(min(tb, ((B + 7) // 8) * 8))
    tb = max(8, (tb // 8) * 8)
    Bp = ((B + tb - 1) // tb) * tb
    if Bp != B:
        pad = jnp.zeros((Bp - B,) + x.shape[1:], x.dtype)
        x = jnp.concatenate([x, pad], axis=0)
    # Flatten so each grid step DMAs one contiguous (tb*N, C_IN) block.
    x_flat = x.reshape(Bp * N_POINTS, C_IN)

    out = pl.pallas_call(
        _make_encoder_kernel(tb),
        out_shape=jax.ShapeDtypeStruct((Bp, D_OUT), jnp.float32),
        grid=(Bp // tb,),
        in_specs=[
            pl.BlockSpec((tb * N_POINTS, C_IN), lambda i: (i, 0)),
            pl.BlockSpec((C_IN, H1),   lambda i: (0, 0)),
            pl.BlockSpec((1, H1),      lambda i: (0, 0)),
            pl.BlockSpec((H1, H2),     lambda i: (0, 0)),
            pl.BlockSpec((1, H2),      lambda i: (0, 0)),
            pl.BlockSpec((H2, D_OUT),  lambda i: (0, 0)),
            pl.BlockSpec((1, D_OUT),   lambda i: (0, 0)),
        ],
        out_specs=pl.BlockSpec((tb, D_OUT), lambda i: (i, 0)),
        compiler_params=pltpu.CompilerParams(
            dimension_semantics=("parallel",),          # v7x: shard across both TCs
            vmem_limit_bytes=48 * 1024 * 1024,          # headroom for big tiles, < v7x 64 MiB
        ),
    )(x_flat, w1, b1, w2, b2, w3, b3)
    return out[:B]


# ------------------------------ triplet loss (jnp) ----------------------------
# K~2, D=16: a dedicated pallas_call is pure launch overhead, so this stays in
# plain jnp where XLA fuses it with the surrounding means.
def triplet_loss(descriptor, poses, margin=MARGIN):
    a, p, n = descriptor['a'], descriptor['p'], descriptor['n']
    dp = jnp.sqrt(jnp.sum((a - p) ** 2, axis=-1) + 1e-12)   # (K,)
    dn = jnp.sqrt(jnp.sum((a - n) ** 2, axis=-1) + 1e-12)   # (K,)
    losses = jnp.maximum(dp - dn + margin, 0.0)
    loss_value = jnp.mean(losses)
    info = {
        'dist_pos': jnp.mean(dp),
        'dist_neg': jnp.mean(dn),
        'num_triplets': a.shape[0],
        'poses_anchor': poses['a'],
    }
    return loss_value, info


# ------------------------------ wrapper (glue) --------------------------------
class SparseModelWrapperPallas:
    def __init__(self, params, loss=None, minibatch_size=3, **args):
        assert minibatch_size >= 3, 'Minibatch size too small'
        self.loss = loss
        self.minibatch_size = minibatch_size
        self.batch_counter = 0
        self.params = params
        self.training = True

    def model(self, x):
        return pallas_encode(x, self.params)

    def forward(self, pcl, **arg):
        if self.training is False:
            pred = self.model(pcl)
            return pred
        batch_loss = 0.0
        sparse_data = pcl[0]
        sparse_index = np.array(pcl[1])
        labels = pcl[2]
        anchor_idx = np.array([i for i, l in enumerate(labels) if l == 'anchor'])
        positive_idx = np.array([i for i, l in enumerate(labels) if l == 'positive'])
        negative_idx = np.array([i for i, l in enumerate(labels) if l == 'negative'])
        pred = self.model(sparse_data)
        descriptor = {'a': pred[anchor_idx], 'p': pred[positive_idx], 'n': pred[negative_idx]}
        poses = {'a': sparse_index[anchor_idx], 'p': sparse_index[positive_idx],
                 'n': sparse_index[negative_idx]}
        loss_value, info = self.loss(descriptor=descriptor, poses=poses)
        # TODO(synk): loss_value.backward() (PyTorch autograd) has no Pallas-forward
        # equivalent; gradients would be obtained via jax.grad over this forward.
        batch_loss += loss_value
        return (batch_loss, info)


def init_params(key):
    k1, k2, k3 = jax.random.split(key, 3)
    w1 = jax.random.normal(k1, (C_IN, H1), jnp.float32) * (1.0 / np.sqrt(C_IN))
    b1 = jnp.zeros((1, H1), jnp.float32)
    w2 = jax.random.normal(k2, (H1, H2), jnp.float32) * (1.0 / np.sqrt(H1))
    b2 = jnp.zeros((1, H2), jnp.float32)
    w3 = jax.random.normal(k3, (H2, D_OUT), jnp.float32) * (1.0 / np.sqrt(H2))
    b3 = jnp.zeros((1, D_OUT), jnp.float32)
    return (w1, b1, w2, b2, w3, b3)


if __name__ == "__main__":
    key = jax.random.PRNGKey(0)
    pkey, xkey = jax.random.split(key)
    params = init_params(pkey)

    B = 6  # 2 anchors, 2 positives, 2 negatives (minibatch_size >= 3 satisfied)
    sparse_data = jax.random.normal(xkey, (B, N_POINTS, C_IN), jnp.float32)
    sparse_index = np.arange(B * 3, dtype=np.float32).reshape(B, 3)  # synthetic poses
    labels = ['anchor', 'positive', 'negative', 'anchor', 'positive', 'negative']

    wrapper = SparseModelWrapperPallas(params, loss=triplet_loss, minibatch_size=3)

    # training path: (batch_loss, info)
    wrapper.training = True
    batch_loss, info = wrapper.forward((sparse_data, sparse_index, labels))
    jax.block_until_ready(batch_loss)
    jax.block_until_ready(info['dist_pos'])
    jax.block_until_ready(info['dist_neg'])

    # eval path: raw descriptors
    wrapper.training = False
    pred = wrapper.forward(sparse_data)
    jax.block_until_ready(pred)

    assert pred.shape == (B, D_OUT)
    norms = np.linalg.norm(np.asarray(pred), axis=-1)
    assert np.allclose(norms, 1.0, atol=1e-3)        # descriptors are unit-norm
    assert np.isfinite(float(batch_loss))
    print("KERNEL_OK")
</pallas_src>

<mosaic_0001>
module attributes {stable_mosaic.version = 11 : i64} {
  func.func @kernel(%arg0: i32, %arg1: memref<1024x3xf32, #tpu.memory_space<vmem>>, %arg2: memref<3x32xf32, #tpu.memory_space<vmem>>, %arg3: memref<1x32xf32, #tpu.memory_space<vmem>>, %arg4: memref<32x64xf32, #tpu.memory_space<vmem>>, %arg5: memref<1x64xf32, #tpu.memory_space<vmem>>, %arg6: memref<64x16xf32, #tpu.memory_space<vmem>>, %arg7: memref<1x16xf32, #tpu.memory_space<vmem>>, %arg8: memref<8x16xf32, #tpu.memory_space<vmem>>) attributes {dimension_semantics = [#tpu.dimension_semantics<parallel>], iteration_bounds = array<i64: 1>, scalar_prefetch = 0 : i64, scratch_operands = 0 : i64, tpu.core_type = #tpu.core_type<tc>, window_params = [{transform_indices = @transform_0, window_bounds = array<i64: 1024, 3>}, {pipeline_mode = #tpu.pipeline_mode<synchronous>, transform_indices = @transform_1, window_bounds = array<i64: 3, 32>}, {pipeline_mode = #tpu.pipeline_mode<synchronous>, transform_indices = @transform_2, window_bounds = array<i64: 1, 32>}, {pipeline_mode = #tpu.pipeline_mode<synchronous>, transform_indices = @transform_3, window_bounds = array<i64: 32, 64>}, {pipeline_mode = #tpu.pipeline_mode<synchronous>, transform_indices = @transform_4, window_bounds = array<i64: 1, 64>}, {pipeline_mode = #tpu.pipeline_mode<synchronous>, transform_indices = @transform_5, window_bounds = array<i64: 64, 16>}, {pipeline_mode = #tpu.pipeline_mode<synchronous>, transform_indices = @transform_6, window_bounds = array<i64: 1, 16>}, {transform_indices = @transform_7, window_bounds = array<i64: 8, 16>}]} {
    %c0 = arith.constant 0 : index
    %c0_0 = arith.constant 0 : index
    %0 = vector.load %arg1[%c0, %c0_0] : memref<1024x3xf32, #tpu.memory_space<vmem>>, vector<1024x3xf32>
    %1 = vector.extract_strided_slice %0 {offsets = [0, 0], sizes = [1024, 1], strides = [1, 1]} : vector<1024x3xf32> to vector<1024x1xf32>
    %c0_1 = arith.constant 0 : index
    %c0_2 = arith.constant 0 : index
    %2 = vector.load %arg2[%c0_1, %c0_2] : memref<3x32xf32, #tpu.memory_space<vmem>>, vector<1x32xf32>
    %3 = vector.broadcast %1 : vector<1024x1xf32> to vector<1024x32xf32>
    %4 = vector.broadcast %2 : vector<1x32xf32> to vector<1024x32xf32>
    %5 = arith.mulf %3, %4 : vector<1024x32xf32>
    %6 = vector.extract_strided_slice %0 {offsets = [0, 1], sizes = [1024, 1], strides = [1, 1]} : vector<1024x3xf32> to vector<1024x1xf32>
    %c1 = arith.constant 1 : index
    %c0_3 = arith.constant 0 : index
    %7 = vector.load %arg2[%c1, %c0_3] : memref<3x32xf32, #tpu.memory_space<vmem>>, vector<1x32xf32>
    %8 = vector.broadcast %6 : vector<1024x1xf32> to vector<1024x32xf32>
    %9 = vector.broadcast %7 : vector<1x32xf32> to vector<1024x32xf32>
    %10 = arith.mulf %8, %9 : vector<1024x32xf32>
    %11 = arith.addf %5, %10 : vector<1024x32xf32>
    %12 = vector.extract_strided_slice %0 {offsets = [0, 2], sizes = [1024, 1], strides = [1, 1]} : vector<1024x3xf32> to vector<1024x1xf32>
    %c2 = arith.constant 2 : index
    %c0_4 = arith.constant 0 : index
    %13 = vector.load %arg2[%c2, %c0_4] : memref<3x32xf32, #tpu.memory_space<vmem>>, vector<1x32xf32>
    %14 = vector.broadcast %12 : vector<1024x1xf32> to vector<1024x32xf32>
    %15 = vector.broadcast %13 : vector<1x32xf32> to vector<1024x32xf32>
    %16 = arith.mulf %14, %15 : vector<1024x32xf32>
    %17 = arith.addf %11, %16 : vector<1024x32xf32>
    %c0_5 = arith.constant 0 : index
    %c0_6 = arith.constant 0 : index
    %18 = vector.load %arg3[%c0_5, %c0_6] : memref<1x32xf32, #tpu.memory_space<vmem>>, vector<1x32xf32>
    %19 = vector.broadcast %18 : vector<1x32xf32> to vector<1024x32xf32>
    %20 = arith.addf %17, %19 : vector<1024x32xf32>
    %cst = arith.constant 0.000000e+00 : f32
    %21 = vector.broadcast %cst : f32 to vector<1024x32xf32>
    %22 = arith.maximumf %20, %21 : vector<1024x32xf32>
    %c0_7 = arith.constant 0 : index
    %c0_8 = arith.constant 0 : index
    %23 = vector.load %arg4[%c0_7, %c0_8] : memref<32x64xf32, #tpu.memory_space<vmem>>, vector<32x64xf32>
    %cst_9 = arith.constant dense<0.000000e+00> : vector<1024x64xf32>
    %24 = tpu.matmul %22, %23, %cst_9 {dimension_numbers = #tpu.dot_dimension_numbers<[1], [0], [0], [1], [0, 0, 1, 1], [], []>} : vector<1024x32xf32>, vector<32x64xf32>, vector<1024x64xf32> -> vector<1024x64xf32>
    %c0_10 = arith.constant 0 : index
    %c0_11 = arith.constant 0 : index
    %25 = vector.load %arg5[%c0_10, %c0_11] : memref<1x64xf32, #tpu.memory_space<vmem>>, vector<1x64xf32>
    %26 = vector.broadcast %25 : vector<1x64xf32> to vector<1024x64xf32>
    %27 = arith.addf %24, %26 : vector<1024x64xf32>
    %cst_12 = arith.constant 0.000000e+00 : f32
    %28 = vector.broadcast %cst_12 : f32 to vector<1024x64xf32>
    %29 = arith.maximumf %27, %28 : vector<1024x64xf32>
    %30 = vector.shape_cast %29 : vector<1024x64xf32> to vector<8x128x64xf32>
    %cst_13 = arith.constant dense<0xFF800000> : vector<8x64xf32>
    %31 = vector.multi_reduction <maximumf>, %30, %cst_13 [1] : vector<8x128x64xf32> to vector<8x64xf32>
    %c0_14 = arith.constant 0 : index
    %c0_15 = arith.constant 0 : index
    %32 = vector.load %arg6[%c0_14, %c0_15] : memref<64x16xf32, #tpu.memory_space<vmem>>, vector<64x16xf32>
    %cst_16 = arith.constant dense<0.000000e+00> : vector<8x16xf32>
    %33 = tpu.matmul %31, %32, %cst_16 {dimension_numbers = #tpu.dot_dimension_numbers<[1], [0], [0], [1], [0, 0, 1, 1], [], []>} : vector<8x64xf32>, vector<64x16xf32>, vector<8x16xf32> -> vector<8x16xf32>
    %c0_17 = arith.constant 0 : index
    %c0_18 = arith.constant 0 : index
    %34 = vector.load %arg7[%c0_17, %c0_18] : memref<1x16xf32, #tpu.memory_space<vmem>>, vector<1x16xf32>
    %35 = vector.broadcast %34 : vector<1x16xf32> to vector<8x16xf32>
    %36 = arith.addf %33, %35 : vector<8x16xf32>
    %37 = arith.mulf %36, %36 : vector<8x16xf32>
    %cst_19 = arith.constant dense<0.000000e+00> : vector<8xf32>
    %38 = vector.multi_reduction <add>, %37, %cst_19 [1] : vector<8x16xf32> to vector<8xf32>
    %39 = vector.shape_cast %38 : vector<8xf32> to vector<8x1xf32>
    %cst_20 = arith.constant 9.99999996E-13 : f32
    %40 = vector.broadcast %cst_20 : f32 to vector<8x1xf32>
    %41 = arith.addf %39, %40 : vector<8x1xf32>
    %42 = math.rsqrt %41 : vector<8x1xf32>
    %43 = vector.broadcast %42 : vector<8x1xf32> to vector<8x16xf32>
    %44 = arith.mulf %36, %43 : vector<8x16xf32>
    %c0_21 = arith.constant 0 : index
    %c0_22 = arith.constant 0 : index
    %45 = vector.load %arg8[%c0_21, %c0_22] : memref<8x16xf32, #tpu.memory_space<vmem>>, vector<8x16xf32>
    tpu.vector_store %arg8[%c0_21, %c0_22], %44 {strides = array<i32>} : memref<8x16xf32, #tpu.memory_space<vmem>>, vector<8x16xf32>,
    return
  }
  func.func @transform_0(%arg0: i32) -> (i32, i32) {
    %c0_i32 = arith.constant 0 : i32
    %c0_i32_0 = arith.constant 0 : i32
    return %arg0, %c0_i32 : i32, i32
  }
  func.func @transform_1(%arg0: i32) -> (i32, i32) {
    %c0_i32 = arith.constant 0 : i32
    %c0_i32_0 = arith.constant 0 : i32
    %c0_i32_1 = arith.constant 0 : i32
    return %c0_i32, %c0_i32_0 : i32, i32
  }
  func.func @transform_2(%arg0: i32) -> (i32, i32) {
    %c0_i32 = arith.constant 0 : i32
    %c0_i32_0 = arith.constant 0 : i32
    %c0_i32_1 = arith.constant 0 : i32
    return %c0_i32, %c0_i32_0 : i32, i32
  }
  func.func @transform_3(%arg0: i32) -> (i32, i32) {
    %c0_i32 = arith.constant 0 : i32
    %c0_i32_0 = arith.constant 0 : i32
    %c0_i32_1 = arith.constant 0 : i32
    return %c0_i32, %c0_i32_0 : i32, i32
  }
  func.func @transform_4(%arg0: i32) -> (i32, i32) {
    %c0_i32 = arith.constant 0 : i32
    %c0_i32_0 = arith.constant 0 : i32
    %c0_i32_1 = arith.constant 0 : i32
    return %c0_i32, %c0_i32_0 : i32, i32
  }
  func.func @transform_5(%arg0: i32) -> (i32, i32) {
    %c0_i32 = arith.constant 0 : i32
    %c0_i32_0 = arith.constant 0 : i32
    %c0_i32_1 = arith.constant 0 : i32
    return %c0_i32, %c0_i32_0 : i32, i32
  }
  func.func @transform_6(%arg0: i32) -> (i32, i32) {
    %c0_i32 = arith.constant 0 : i32
    %c0_i32_0 = arith.constant 0 : i32
    %c0_i32_1 = arith.constant 0 : i32
    return %c0_i32, %c0_i32_0 : i32, i32
  }
  func.func @transform_7(%arg0: i32) -> (i32, i32) {
    %c0_i32 = arith.constant 0 : i32
    %c0_i32_0 = arith.constant 0 : i32
    return %arg0, %c0_i32 : i32, i32
  }
}

</mosaic_0001>

<bundles_post_ra>
// kernel: tpu_custom_call.1
= control target key start
LH: loop header
LB: loop body
LE: loop exit
PB: predicated region body
PF: predicated region fallthrough
CT: control target
= control target key end

     0   :  { %v5103_v2 = vmov 0   ;;  %s8464_s0 = inlined_call_operand.vmem [shape: f32[1024,3], index: 0, kind: input, shape index: {}]   ;;  %s8465_s1 = inlined_call_operand.vmem [shape: f32[3,32], index: 1, kind: input, shape index: {}]   ;;  %s8466_s2 = inlined_call_operand.vmem [shape: f32[1,32], index: 2, kind: input, shape index: {}]   ;;  %s8467_s3 = inlined_call_operand.vmem [shape: f32[32,64], index: 3, kind: input, shape index: {}]   ;;  %s8468_s4 = inlined_call_operand.vmem [shape: f32[1,64], index: 4, kind: input, shape index: {}]   ;;  %s8469_s5 = inlined_call_operand.vmem [shape: f32[64,16], index: 5, kind: input, shape index: {}]   ;;  %s8470_s6 = inlined_call_operand.vmem [shape: f32[1,16], index: 6, kind: input, shape index: {}]   ;;  %s8471_s7 = inlined_call_operand.hbm [shape: f32[8,16], index: 7, kind: output, shape index: {}]  }
   0x1   :  { %v5152_v0 = vld [vmem:[%s8464_s0 + $0x10] sm:$0xff]  ;;  %v5157_v1 = vld [vmem:[%s8464_s0] sm:$0xff]  ;;  %4905 = vset.pattern.permute.xlu1 %v5103_v2  ;;  %4904 = vset.pattern.permute.xlu0 %v5103_v2  ;;  %v5164_v3 = vld [vmem:[%s8464_s0 + $0x18] sm:$0xff] }
   0x2   :  { %168 = vperm.xlu1 %4905, %v5152_v0   ;;  %158 = vperm.xlu0 %4904, %v5157_v1   ;;  %v5169_v4 = vld [vmem:[%s8464_s0 + $0x8] sm:$0xff]  ;;  %v5181_v6 = vld [vmem:[%s8464_s0 + $0x20] sm:$0xff]  ;;  %v5188_v7 = vld [vmem:[%s8464_s0 + $0x38] sm:$0xff] }
   0x3   :  { %v5176_v5 = vld [vmem:[%s8464_s0 + $0x28] sm:$0xff]  ;;  %v5193_v8 = vld [vmem:[%s8464_s0 + $0x30] sm:$0xff]  ;;  %v5205_v10 = vld [vmem:[%s8464_s0 + $0x40] sm:$0xff] }
   0x4   :  { %v5200_v9 = vld [vmem:[%s8464_s0 + $0x48] sm:$0xff]  ;;  %v5212_v11 = vld [vmem:[%s8464_s0 + $0x58] sm:$0xff]  ;;  %v5217_v12 = vld [vmem:[%s8464_s0 + $0x50] sm:$0xff] }
   0x5   :  { %v5224_v13 = vld [vmem:[%s8464_s0 + $0x68] sm:$0xff]  ;;  %v5229_v14 = vld [vmem:[%s8464_s0 + $0x60] sm:$0xff] }
   0x6   :  { %173 = vperm.xlu1 %4905, %v5164_v3   ;;  %163 = vperm.xlu0 %4904, %v5169_v4  }
   0xa   :  { %183 = vperm.xlu1 %4905, %v5176_v5   ;;  %178 = vperm.xlu0 %4904, %v5181_v6  }
   0xe   :  { %193 = vperm.xlu1 %4905, %v5188_v7   ;;  %188 = vperm.xlu0 %4904, %v5193_v8  }
  0x12   :  { %203 = vperm.xlu1 %4905, %v5200_v9   ;;  %198 = vperm.xlu0 %4904, %v5205_v10  }
  0x16   :  { %213 = vperm.xlu1 %4905, %v5212_v11   ;;  %208 = vperm.xlu0 %4904, %v5217_v12  }
  0x1a   :  { %223 = vperm.xlu1 %4905, %v5224_v13   ;;  %218 = vperm.xlu0 %4904, %v5229_v14  }
  0x1b   :  { %12 = vsyncpa [#allocation3], 0  ;;  %v5236_v15 = vld [vmem:[%s8464_s0 + $0x78] sm:$0xff]  ;;  %v5241_v16 = vld [vmem:[%s8464_s0 + $0x70] sm:$0xff]  ;;  %vm2748_vm0 = vcmask 261120   ;;  %vm3966_vm1 = vcmask 523264  }
  0x1c   :  { %v5248_v17 = vld [vmem:[%s8464_s0 + $0x88] sm:$0xff]  ;;  %v5253_v18 = vld [vmem:[%s8464_s0 + $0x80] sm:$0xff]  ;;  %v5260_v19 = vld [vmem:[%s8464_s0 + $0x98] sm:$0xff]  ;;  %vm4286_vm2 = vcmask 1041409   ;;  %vm5107_vm3 = vmmov 0   ;;  %vm4288_vm4 = vcmask 1042434  }
  0x1d   :  { %v5265_v20 = vld [vmem:[%s8464_s0 + $0x90] sm:$0xff]  ;;  %v5272_v21 = vld [vmem:[%s8464_s0 + $0xa8] sm:$0xff]  ;;  %v5277_v22 = vld [vmem:[%s8464_s0 + $0xa0] sm:$0xff]  ;;  %vm4290_vm5 = vcmask 1043459   ;;  %vm4292_vm6 = vcmask 1044484   ;;  %vm4294_vm7 = vcmask 1045509  }
  0x1e   :  { %233 = vperm.xlu1 %4905, %v5236_v15   ;;  %228 = vperm.xlu0 %4904, %v5241_v16   ;;  %v5284_v23 = vld [vmem:[%s8464_s0 + $0xb8] sm:$0xff]  ;;  %v5289_v24 = vld [vmem:[%s8464_s0 + $0xb0] sm:$0xff]  ;;  %v5296_v25 = vld [vmem:[%s8464_s0 + $0xc8] sm:$0xff]  ;;  %vm4296_vm8 = vcmask 1046534   ;;  %vm4298_vm9 = vcmask 1047559   ;;  %vm4373_vm10 = vcmask 130048  }
  0x1f   :  { %v5301_v26 = vld [vmem:[%s8464_s0 + $0xc0] sm:$0xff]  ;;  %v5308_v27 = vld [vmem:[%s8464_s0 + $0xd8] sm:$0xff]  ;;  %v5313_v28 = vld [vmem:[%s8464_s0 + $0xd0] sm:$0xff]  ;;  %s5108_s23 = smov [#allocation2]  }
  0x20   :  { %v5320_v29 = vld [vmem:[%s8464_s0 + $0xe8] sm:$0xff]  ;;  %v5325_v30 = vld [vmem:[%s8464_s0 + $0xe0] sm:$0xff]  ;;  %v5332_v31 = vld [vmem:[%s8464_s0 + $0xf8] sm:$0xff]  ;;  %s4387_s24 = sshll.u32 %s5108_s23, 4  ;;  %s4388_s24 = int_to_ptr.vmem [resolvable:$true] %s4387_s24 }
  0x21   :  { %v5337_v32 = vld [vmem:[%s8464_s0 + $0xf0] sm:$0xff]  ;;  %v5344_v33 = vld [vmem:[%s8464_s0 + $0x108] sm:$0xff]  ;;  %v5349_v34 = vld [vmem:[%s8464_s0 + $0x100] sm:$0xff]  ;;  %s5081_s25 = scalar_lea.vmem %s4388_s24, 128  ;;  %p5086_p1 = scmp.lt.s32.totalorder %s4388_s24, %s4388_s24 }
  0x22   :  { %243 = vperm.xlu1 %4905, %v5248_v17   ;;  %238 = vperm.xlu0 %4904, %v5253_v18   ;;  %v5356_v35 = vld [vmem:[%s8464_s0 + $0x118] sm:$0xff]  ;;  %v5361_v36 = vld [vmem:[%s8464_s0 + $0x110] sm:$0xff]  ;;  %v5368_v37 = vld [vmem:[%s8464_s0 + $0x128] sm:$0xff]  ;;  %p5082_p0 = scmp.ne.s32.totalorder %s4388_s24, %s5081_s25  ;;  %p5087_p2 = scmp.lt.s32.totalorder %s5081_s25, %s5081_s25 }
  0x23   :  { %v5373_v38 = vld [vmem:[%s8464_s0 + $0x120] sm:$0xff]  ;;  %v5380_v39 = vld [vmem:[%s8464_s0 + $0x138] sm:$0xff]  ;;  %v5385_v40 = vld [vmem:[%s8464_s0 + $0x130] sm:$0xff] }
  0x24   :  { %v5392_v41 = vld [vmem:[%s8464_s0 + $0x148] sm:$0xff]  ;;  %v5397_v42 = vld [vmem:[%s8464_s0 + $0x140] sm:$0xff]  ;;  %v5404_v43 = vld [vmem:[%s8464_s0 + $0x158] sm:$0xff]  ;;  %p5088_p3 = por %p5087_p2, %p5086_p1 }
  0x25   :  { %v5409_v44 = vld [vmem:[%s8464_s0 + $0x150] sm:$0xff]  ;;  %v5416_v45 = vld [vmem:[%s8464_s0 + $0x168] sm:$0xff]  ;;  %v5421_v46 = vld [vmem:[%s8464_s0 + $0x160] sm:$0xff] }
  0x26   :  { %253 = vperm.xlu1 %4905, %v5260_v19   ;;  %248 = vperm.xlu0 %4904, %v5265_v20   ;;  %v5428_v47 = vld [vmem:[%s8464_s0 + $0x178] sm:$0xff]  ;;  %v5433_v48 = vld [vmem:[%s8464_s0 + $0x170] sm:$0xff]  ;;  %v5440_v49 = vld [vmem:[%s8464_s0 + $0x188] sm:$0xff]  ;;  %p5089_p4 = pnand %p5088_p3, %p5082_p0 }
  0x27   :  { %v5445_v50 = vld [vmem:[%s8464_s0 + $0x180] sm:$0xff]  ;;  %v5452_v51 = vld [vmem:[%s8464_s0 + $0x198] sm:$0xff]  ;;  %v5457_v52 = vld [vmem:[%s8464_s0 + $0x190] sm:$0xff] }
  0x28   :  { %v5464_v53 = vld [vmem:[%s8464_s0 + $0x1a8] sm:$0xff]  ;;  %v5469_v54 = vld [vmem:[%s8464_s0 + $0x1a0] sm:$0xff]  ;;  %v5476_v55 = vld [vmem:[%s8464_s0 + $0x1b8] sm:$0xff] }
  0x29   :  { %8547 = vst [vmem:[#allocation5_spill] sm:$0xff] %v5476_v55  ;;  %v5481_v56 = vld [vmem:[%s8464_s0 + $0x1b0] sm:$0xff]  ;;  %v5488_v57 = vld [vmem:[%s8464_s0 + $0x1c8] sm:$0xff]  ;;  %v5493_v58 = vld [vmem:[%s8464_s0 + $0x1c0] sm:$0xff] }
  0x2a   :  { %263 = vperm.xlu1 %4905, %v5272_v21   ;;  %258 = vperm.xlu0 %4904, %v5277_v22   ;;  %8548 = vst [vmem:[#allocation6_spill] sm:$0xff] %v5488_v57  ;;  %8549 = vst [vmem:[#allocation7_spill] sm:$0xff] %v5493_v58  ;;  %v5500_v59 = vld [vmem:[%s8464_s0 + $0x1d8] sm:$0xff]  ;;  %v5505_v60 = vld [vmem:[%s8464_s0 + $0x1d0] sm:$0xff] }
  0x2b   :  { %8550 = vst [vmem:[#allocation8_spill] sm:$0xff] %v5500_v59  ;;  %8551 = vst [vmem:[#allocation9_spill] sm:$0xff] %v5505_v60  ;;  %v5512_v61 = vld [vmem:[%s8464_s0 + $0x1e8] sm:$0xff]  ;;  %v5517_v62 = vld [vmem:[%s8464_s0 + $0x1e0] sm:$0xff] }
  0x2c   :  { %8552 = vst [vmem:[#allocation10_spill] sm:$0xff] %v5512_v61  ;;  %8553 = vst [vmem:[#allocation11_spill] sm:$0xff] %v5517_v62  ;;  %v5524_v63 = vld [vmem:[%s8464_s0 + $0x1f8] sm:$0xff]  ;;  %v5529_v2 = vld [vmem:[%s8464_s0 + $0x1f0] sm:$0xff] }
  0x2d   :  { %8554 = vst [vmem:[#allocation12_spill] sm:$0xff] %v5524_v63  ;;  %8555 = vst [vmem:[#allocation13_spill] sm:$0xff] %v5529_v2 }
  0x2e   :  { %273 = vperm.xlu1 %4905, %v5284_v23   ;;  %268 = vperm.xlu0 %4904, %v5289_v24  }
  0x32   :  { %283 = vperm.xlu1 %4905, %v5296_v25   ;;  %278 = vperm.xlu0 %4904, %v5301_v26  }
  0x36   :  { %293 = vperm.xlu1 %4905, %v5308_v27   ;;  %288 = vperm.xlu0 %4904, %v5313_v28  }
  0x3a   :  { %303 = vperm.xlu1 %4905, %v5320_v29   ;;  %298 = vperm.xlu0 %4904, %v5325_v30  }
  0x3e   :  { %313 = vperm.xlu1 %4905, %v5332_v31   ;;  %308 = vperm.xlu0 %4904, %v5337_v32  }
  0x42   :  { %323 = vperm.xlu1 %4905, %v5344_v33   ;;  %318 = vperm.xlu0 %4904, %v5349_v34  }
  0x46   :  { %333 = vperm.xlu1 %4905, %v5356_v35   ;;  %328 = vperm.xlu0 %4904, %v5361_v36  }
  0x4a   :  { %343 = vperm.xlu1 %4905, %v5368_v37   ;;  %338 = vperm.xlu0 %4904, %v5373_v38  }
  0x4e   :  { %353 = vperm.xlu1 %4905, %v5380_v39   ;;  %348 = vperm.xlu0 %4904, %v5385_v40  }
  0x52   :  { %363 = vperm.xlu1 %4905, %v5392_v41   ;;  %358 = vperm.xlu0 %4904, %v5397_v42  }
  0x56   :  { %373 = vperm.xlu1 %4905, %v5404_v43   ;;  %368 = vperm.xlu0 %4904, %v5409_v44  }
  0x5a   :  { %383 = vperm.xlu1 %4905, %v5416_v45   ;;  %378 = vperm.xlu0 %4904, %v5421_v46  }
  0x5e   :  { %393 = vperm.xlu1 %4905, %v5428_v47   ;;  %388 = vperm.xlu0 %4904, %v5433_v48  }
  0x62   :  { %403 = vperm.xlu1 %4905, %v5440_v49   ;;  %398 = vperm.xlu0 %4904, %v5445_v50  }
  0x66   :  { %413 = vperm.xlu1 %4905, %v5452_v51   ;;  %408 = vperm.xlu0 %4904, %v5457_v52  }
  0x6a   :  { %423 = vperm.xlu1 %4905, %v5464_v53   ;;  %418 = vperm.xlu0 %4904, %v5469_v54  }
  0x6e   :  { %433 = vperm.xlu1 %4905, %v5476_v55   ;;  %428 = vperm.xlu0 %4904, %v5481_v56  }
  0x72   :  { %443 = vperm.xlu1 %4905, %v5488_v57   ;;  %438 = vperm.xlu0 %4904, %v5493_v58  }
  0x76   :  { %453 = vperm.xlu1 %4905, %v5500_v59   ;;  %448 = vperm.xlu0 %4904, %v5505_v60  }
  0x7a   :  { %463 = vperm.xlu1 %4905, %v5512_v61   ;;  %458 = vperm.xlu0 %4904, %v5517_v62   ;;  %v5540_v61 = vld [vmem:[%s8464_s0 + $0x208] sm:$0xff]  ;;  %v5545_v62 = vld [vmem:[%s8464_s0 + $0x200] sm:$0xff] }
  0x7b   :  { %8558 = vst [vmem:[#allocation16_spill] sm:$0xff] %v5540_v61  ;;  %8559 = vst [vmem:[#allocation17_spill] sm:$0xff] %v5545_v62 }
  0x7d   :  { %v5531_v59 = vpop.permute.xlu1 %168  ;;  %v5533_v60 = vpop.permute.xlu0 %158 }
  0x7e   :  { %8556 = vst [vmem:[#allocation14_spill] sm:$0xff] %v5531_v59  ;;  %8557 = vst [vmem:[#allocation15_spill] sm:$0xff] %v5533_v60  ;;  %473 = vperm.xlu1 %4905, %v5524_v63   ;;  %468 = vperm.xlu0 %4904, %v5529_v2   ;;  %v5556_v60 = vld [vmem:[%s8464_s0 + $0x218] sm:$0xff]  ;;  %v5561_v59 = vld [vmem:[%s8464_s0 + $0x210] sm:$0xff] }
  0x7f   :  { %8562 = vst [vmem:[#allocation20_spill] sm:$0xff] %v5556_v60  ;;  %8563 = vst [vmem:[#allocation21_spill] sm:$0xff] %v5561_v59 }
  0x81   :  { %v5547_v57 = vpop.permute.xlu1 %173  ;;  %v5549_v58 = vpop.permute.xlu0 %163 }
  0x82   :  { %8560 = vst [vmem:[#allocation18_spill] sm:$0xff] %v5547_v57  ;;  %8561 = vst [vmem:[#allocation19_spill] sm:$0xff] %v5549_v58  ;;  %483 = vperm.xlu1 %4905, %v5540_v61   ;;  %478 = vperm.xlu0 %4904, %v5545_v62   ;;  %v5572_v57 = vld [vmem:[%s8464_s0 + $0x228] sm:$0xff]  ;;  %v5577_v58 = vld [vmem:[%s8464_s0 + $0x220] sm:$0xff] }
  0x83   :  { %8566 = vst [vmem:[#allocation24_spill] sm:$0xff] %v5572_v57  ;;  %8567 = vst [vmem:[#allocation25_spill] sm:$0xff] %v5577_v58 }
  0x85   :  { %v5563_v63 = vpop.permute.xlu1 %183  ;;  %v5565_v2 = vpop.permute.xlu0 %178 }
  0x86   :  { %8564 = vst [vmem:[#allocation22_spill] sm:$0xff] %v5563_v63  ;;  %8565 = vst [vmem:[#allocation23_spill] sm:$0xff] %v5565_v2  ;;  %493 = vperm.xlu1 %4905, %v5556_v60   ;;  %488 = vperm.xlu0 %4904, %v5561_v59   ;;  %v5588_v2 = vld [vmem:[%s8464_s0 + $0x238] sm:$0xff]  ;;  %v5593_v63 = vld [vmem:[%s8464_s0 + $0x230] sm:$0xff] }
  0x87   :  { %8570 = vst [vmem:[#allocation28_spill] sm:$0xff] %v5588_v2  ;;  %8571 = vst [vmem:[#allocation29_spill] sm:$0xff] %v5593_v63 }
  0x89   :  { %v5579_v61 = vpop.permute.xlu1 %193  ;;  %v5581_v62 = vpop.permute.xlu0 %188 }
  0x8a   :  { %8568 = vst [vmem:[#allocation26_spill] sm:$0xff] %v5579_v61  ;;  %8569 = vst [vmem:[#allocation27_spill] sm:$0xff] %v5581_v62  ;;  %503 = vperm.xlu1 %4905, %v5572_v57   ;;  %498 = vperm.xlu0 %4904, %v5577_v58   ;;  %v5604_v62 = vld [vmem:[%s8464_s0 + $0x248] sm:$0xff]  ;;  %v5609_v61 = vld [vmem:[%s8464_s0 + $0x240] sm:$0xff] }
  0x8b   :  { %8574 = vst [vmem:[#allocation32_spill] sm:$0xff] %v5604_v62  ;;  %8575 = vst [vmem:[#allocation33_spill] sm:$0xff] %v5609_v61 }
  0x8d   :  { %v5595_v60 = vpop.permute.xlu1 %203  ;;  %v5597_v59 = vpop.permute.xlu0 %198 }
  0x8e   :  { %8572 = vst [vmem:[#allocation30_spill] sm:$0xff] %v5595_v60  ;;  %8573 = vst [vmem:[#allocation31_spill] sm:$0xff] %v5597_v59  ;;  %513 = vperm.xlu1 %4905, %v5588_v2   ;;  %508 = vperm.xlu0 %4904, %v5593_v63   ;;  %v5620_v59 = vld [vmem:[%s8464_s0 + $0x258] sm:$0xff]  ;;  %v5625_v60 = vld [vmem:[%s8464_s0 + $0x250] sm:$0xff] }
  0x8f   :  { %8578 = vst [vmem:[#allocation36_spill] sm:$0xff] %v5620_v59  ;;  %8579 = vst [vmem:[#allocation37_spill] sm:$0xff] %v5625_v60 }
  0x91   :  { %v5611_v57 = vpop.permute.xlu1 %213  ;;  %v5613_v58 = vpop.permute.xlu0 %208 }
  0x92   :  { %8576 = vst [vmem:[#allocation34_spill] sm:$0xff] %v5611_v57  ;;  %8577 = vst [vmem:[#allocation35_spill] sm:$0xff] %v5613_v58  ;;  %523 = vperm.xlu1 %4905, %v5604_v62   ;;  %518 = vperm.xlu0 %4904, %v5609_v61   ;;  %v5636_v58 = vld [vmem:[%s8464_s0 + $0x268] sm:$0xff]  ;;  %v5641_v57 = vld [vmem:[%s8464_s0 + $0x260] sm:$0xff] }
  0x93   :  { %8582 = vst [vmem:[#allocation40_spill] sm:$0xff] %v5636_v58  ;;  %8583 = vst [vmem:[#allocation41_spill] sm:$0xff] %v5641_v57 }
  0x95   :  { %v5627_v2 = vpop.permute.xlu1 %223  ;;  %v5629_v63 = vpop.permute.xlu0 %218 }
  0x96   :  { %8580 = vst [vmem:[#allocation38_spill] sm:$0xff] %v5627_v2  ;;  %8581 = vst [vmem:[#allocation39_spill] sm:$0xff] %v5629_v63  ;;  %533 = vperm.xlu1 %4905, %v5620_v59   ;;  %528 = vperm.xlu0 %4904, %v5625_v60   ;;  %v5652_v63 = vld [vmem:[%s8464_s0 + $0x278] sm:$0xff]  ;;  %v5657_v2 = vld [vmem:[%s8464_s0 + $0x270] sm:$0xff] }
  0x97   :  { %8586 = vst [vmem:[#allocation44_spill] sm:$0xff] %v5652_v63  ;;  %8587 = vst [vmem:[#allocation45_spill] sm:$0xff] %v5657_v2 }
  0x99   :  { %v5643_v62 = vpop.permute.xlu1 %233  ;;  %v5645_v61 = vpop.permute.xlu0 %228 }
  0x9a   :  { %8584 = vst [vmem:[#allocation42_spill] sm:$0xff] %v5643_v62  ;;  %8585 = vst [vmem:[#allocation43_spill] sm:$0xff] %v5645_v61  ;;  %543 = vperm.xlu1 %4905, %v5636_v58   ;;  %538 = vperm.xlu0 %4904, %v5641_v57   ;;  %v5668_v61 = vld [vmem:[%s8464_s0 + $0x288] sm:$0xff]  ;;  %v5673_v62 = vld [vmem:[%s8464_s0 + $0x280] sm:$0xff] }
  0x9b   :  { %8590 = vst [vmem:[#allocation48_spill] sm:$0xff] %v5668_v61  ;;  %8591 = vst [vmem:[#allocation49_spill] sm:$0xff] %v5673_v62 }
  0x9d   :  { %v5659_v59 = vpop.permute.xlu1 %243  ;;  %v5661_v60 = vpop.permute.xlu0 %238 }
  0x9e   :  { %8588 = vst [vmem:[#allocation46_spill] sm:$0xff] %v5659_v59  ;;  %8589 = vst [vmem:[#allocation47_spill] sm:$0xff] %v5661_v60  ;;  %553 = vperm.xlu1 %4905, %v5652_v63   ;;  %548 = vperm.xlu0 %4904, %v5657_v2   ;;  %v5684_v60 = vld [vmem:[%s8464_s0 + $0x298] sm:$0xff]  ;;  %v5689_v59 = vld [vmem:[%s8464_s0 + $0x290] sm:$0xff] }
  0x9f   :  { %8594 = vst [vmem:[#allocation52_spill] sm:$0xff] %v5684_v60  ;;  %8595 = vst [vmem:[#allocation53_spill] sm:$0xff] %v5689_v59 }
  0xa1   :  { %v5675_v58 = vpop.permute.xlu1 %253  ;;  %v5677_v57 = vpop.permute.xlu0 %248 }
  0xa2   :  { %8592 = vst [vmem:[#allocation50_spill] sm:$0xff] %v5675_v58  ;;  %8593 = vst [vmem:[#allocation51_spill] sm:$0xff] %v5677_v57  ;;  %563 = vperm.xlu1 %4905, %v5668_v61   ;;  %558 = vperm.xlu0 %4904, %v5673_v62   ;;  %v5700_v57 = vld [vmem:[%s8464_s0 + $0x2a8] sm:$0xff]  ;;  %v5705_v58 = vld [vmem:[%s8464_s0 + $0x2a0] sm:$0xff] }
  0xa3   :  { %8598 = vst [vmem:[#allocation56_spill] sm:$0xff] %v5700_v57  ;;  %8599 = vst [vmem:[#allocation57_spill] sm:$0xff] %v5705_v58 }
  0xa5   :  { %v5691_v63 = vpop.permute.xlu1 %263  ;;  %v5693_v2 = vpop.permute.xlu0 %258 }
  0xa6   :  { %8596 = vst [vmem:[#allocation54_spill] sm:$0xff] %v5691_v63  ;;  %8597 = vst [vmem:[#allocation55_spill] sm:$0xff] %v5693_v2  ;;  %573 = vperm.xlu1 %4905, %v5684_v60   ;;  %568 = vperm.xlu0 %4904, %v5689_v59   ;;  %v5716_v2 = vld [vmem:[%s8464_s0 + $0x2b8] sm:$0xff]  ;;  %v5721_v63 = vld [vmem:[%s8464_s0 + $0x2b0] sm:$0xff] }
  0xa7   :  { %8602 = vst [vmem:[#allocation60_spill] sm:$0xff] %v5716_v2  ;;  %8603 = vst [vmem:[#allocation61_spill] sm:$0xff] %v5721_v63 }
  0xa9   :  { %v5707_v61 = vpop.permute.xlu1 %273  ;;  %v5709_v62 = vpop.permute.xlu0 %268 }
  0xaa   :  { %8600 = vst [vmem:[#allocation58_spill] sm:$0xff] %v5707_v61  ;;  %8601 = vst [vmem:[#allocation59_spill] sm:$0xff] %v5709_v62  ;;  %583 = vperm.xlu1 %4905, %v5700_v57   ;;  %578 = vperm.xlu0 %4904, %v5705_v58   ;;  %v5732_v62 = vld [vmem:[%s8464_s0 + $0x2c8] sm:$0xff]  ;;  %v5737_v61 = vld [vmem:[%s8464_s0 + $0x2c0] sm:$0xff] }
  0xab   :  { %8606 = vst [vmem:[#allocation64_spill] sm:$0xff] %v5732_v62  ;;  %8607 = vst [vmem:[#allocation65_spill] sm:$0xff] %v5737_v61 }
  0xad   :  { %v5723_v60 = vpop.permute.xlu1 %283  ;;  %v5725_v59 = vpop.permute.xlu0 %278 }
  0xae   :  { %8604 = vst [vmem:[#allocation62_spill] sm:$0xff] %v5723_v60  ;;  %8605 = vst [vmem:[#allocation63_spill] sm:$0xff] %v5725_v59  ;;  %593 = vperm.xlu1 %4905, %v5716_v2   ;;  %588 = vperm.xlu0 %4904, %v5721_v63   ;;  %v118_v59 = vld [vmem:[%s8464_s0 + $0x2d8] sm:$0xff]  ;;  %v5751_v60 = vld [vmem:[%s8464_s0 + $0x2d0] sm:$0xff] }
  0xaf   :  { %8610 = vst [vmem:[#allocation68_spill] sm:$0xff] %v5751_v60 }
  0xb1   :  { %v5739_v57 = vpop.permute.xlu1 %293  ;;  %v5741_v58 = vpop.permute.xlu0 %288 }
  0xb2   :  { %8608 = vst [vmem:[#allocation66_spill] sm:$0xff] %v5739_v57  ;;  %8609 = vst [vmem:[#allocation67_spill] sm:$0xff] %v5741_v58  ;;  %603 = vperm.xlu1 %4905, %v5732_v62   ;;  %598 = vperm.xlu0 %4904, %v5737_v61   ;;  %v120_v58 = vld [vmem:[%s8464_s0 + $0x2e8] sm:$0xff]  ;;  %v5764_v57 = vld [vmem:[%s8464_s0 + $0x2e0] sm:$0xff] }
  0xb3   :  { %8613 = vst [vmem:[#allocation71_spill] sm:$0xff] %v5764_v57 }
  0xb5   :  { %v5753_v2 = vpop.permute.xlu1 %303  ;;  %v5755_v63 = vpop.permute.xlu0 %298 }
  0xb6   :  { %8611 = vst [vmem:[#allocation69_spill] sm:$0xff] %v5753_v2  ;;  %8612 = vst [vmem:[#allocation70_spill] sm:$0xff] %v5755_v63  ;;  %613 = vperm.xlu1 %4905, %v118_v59   ;;  %608 = vperm.xlu0 %4904, %v5751_v60   ;;  %v122_v59 = vld [vmem:[%s8464_s0 + $0x2f8] sm:$0xff]  ;;  %v5777_v63 = vld [vmem:[%s8464_s0 + $0x2f0] sm:$0xff] }
  0xb7   :  { %8616 = vst [vmem:[#allocation74_spill] sm:$0xff] %v5777_v63 }
  0xb9   :  { %v5766_v62 = vpop.permute.xlu1 %313  ;;  %v5768_v61 = vpop.permute.xlu0 %308 }
  0xba   :  { %8614 = vst [vmem:[#allocation72_spill] sm:$0xff] %v5766_v62  ;;  %8615 = vst [vmem:[#allocation73_spill] sm:$0xff] %v5768_v61  ;;  %623 = vperm.xlu1 %4905, %v120_v58   ;;  %618 = vperm.xlu0 %4904, %v5764_v57   ;;  %v124_v58 = vld [vmem:[%s8464_s0 + $0x308] sm:$0xff]  ;;  %v5790_v61 = vld [vmem:[%s8464_s0 + $0x300] sm:$0xff] }
  0xbb   :  { %8619 = vst [vmem:[#allocation77_spill] sm:$0xff] %v5790_v61 }
  0xbd   :  { %v5779_v2 = vpop.permute.xlu1 %323  ;;  %v5781_v60 = vpop.permute.xlu0 %318 }
  0xbe   :  { %8617 = vst [vmem:[#allocation75_spill] sm:$0xff] %v5779_v2  ;;  %8618 = vst [vmem:[#allocation76_spill] sm:$0xff] %v5781_v60  ;;  %633 = vperm.xlu1 %4905, %v122_v59   ;;  %628 = vperm.xlu0 %4904, %v5777_v63   ;;  %v126_v59 = vld [vmem:[%s8464_s0 + $0x318] sm:$0xff]  ;;  %v5803_v60 = vld [vmem:[%s8464_s0 + $0x310] sm:$0xff] }
  0xbf   :  { %8622 = vst [vmem:[#allocation80_spill] sm:$0xff] %v5803_v60 }
  0xc1   :  { %v5792_v62 = vpop.permute.xlu1 %333  ;;  %v5794_v57 = vpop.permute.xlu0 %328 }
  0xc2   :  { %8620 = vst [vmem:[#allocation78_spill] sm:$0xff] %v5792_v62  ;;  %8621 = vst [vmem:[#allocation79_spill] sm:$0xff] %v5794_v57  ;;  %643 = vperm.xlu1 %4905, %v124_v58   ;;  %638 = vperm.xlu0 %4904, %v5790_v61   ;;  %v128_v58 = vld [vmem:[%s8464_s0 + $0x328] sm:$0xff]  ;;  %v5816_v57 = vld [vmem:[%s8464_s0 + $0x320] sm:$0xff] }
  0xc3   :  { %8625 = vst [vmem:[#allocation83_spill] sm:$0xff] %v5816_v57 }
  0xc5   :  { %v5805_v2 = vpop.permute.xlu1 %343  ;;  %v5807_v63 = vpop.permute.xlu0 %338 }
  0xc6   :  { %8623 = vst [vmem:[#allocation81_spill] sm:$0xff] %v5805_v2  ;;  %8624 = vst [vmem:[#allocation82_spill] sm:$0xff] %v5807_v63  ;;  %653 = vperm.xlu1 %4905, %v126_v59   ;;  %648 = vperm.xlu0 %4904, %v5803_v60   ;;  %v130_v59 = vld [vmem:[%s8464_s0 + $0x338] sm:$0xff]  ;;  %v5829_v63 = vld [vmem:[%s8464_s0 + $0x330] sm:$0xff] }
  0xc7   :  { %8628 = vst [vmem:[#allocation86_spill] sm:$0xff] %v5829_v63 }
  0xc9   :  { %v5818_v62 = vpop.permute.xlu1 %353  ;;  %v5820_v61 = vpop.permute.xlu0 %348 }
  0xca   :  { %8626 = vst [vmem:[#allocation84_spill] sm:$0xff] %v5818_v62  ;;  %8627 = vst [vmem:[#allocation85_spill] sm:$0xff] %v5820_v61  ;;  %663 = vperm.xlu1 %4905, %v128_v58   ;;  %658 = vperm.xlu0 %4904, %v5816_v57   ;;  %v132_v58 = vld [vmem:[%s8464_s0 + $0x348] sm:$0xff]  ;;  %v5842_v61 = vld [vmem:[%s8464_s0 + $0x340] sm:$0xff] }
  0xcb   :  { %8631 = vst [vmem:[#allocation89_spill] sm:$0xff] %v5842_v61 }
  0xcd   :  { %v5831_v2 = vpop.permute.xlu1 %363  ;;  %v5833_v60 = vpop.permute.xlu0 %358 }
  0xce   :  { %8629 = vst [vmem:[#allocation87_spill] sm:$0xff] %v5831_v2  ;;  %8630 = vst [vmem:[#allocation88_spill] sm:$0xff] %v5833_v60  ;;  %673 = vperm.xlu1 %4905, %v130_v59   ;;  %668 = vperm.xlu0 %4904, %v5829_v63   ;;  %v134_v59 = vld [vmem:[%s8464_s0 + $0x358] sm:$0xff]  ;;  %v5855_v60 = vld [vmem:[%s8464_s0 + $0x350] sm:$0xff] }
  0xcf   :  { %8634 = vst [vmem:[#allocation92_spill] sm:$0xff] %v5855_v60 }
  0xd1   :  { %v5844_v62 = vpop.permute.xlu1 %373  ;;  %v5846_v57 = vpop.permute.xlu0 %368 }
  0xd2   :  { %8632 = vst [vmem:[#allocation90_spill] sm:$0xff] %v5844_v62  ;;  %8633 = vst [vmem:[#allocation91_spill] sm:$0xff] %v5846_v57  ;;  %683 = vperm.xlu1 %4905, %v132_v58   ;;  %678 = vperm.xlu0 %4904, %v5842_v61   ;;  %v136_v58 = vld [vmem:[%s8464_s0 + $0x368] sm:$0xff]  ;;  %v5868_v57 = vld [vmem:[%s8464_s0 + $0x360] sm:$0xff] }
  0xd3   :  { %8637 = vst [vmem:[#allocation95_spill] sm:$0xff] %v5868_v57 }
  0xd5   :  { %v5857_v2 = vpop.permute.xlu1 %383  ;;  %v5859_v63 = vpop.permute.xlu0 %378 }
  0xd6   :  { %8635 = vst [vmem:[#allocation93_spill] sm:$0xff] %v5857_v2  ;;  %8636 = vst [vmem:[#allocation94_spill] sm:$0xff] %v5859_v63  ;;  %693 = vperm.xlu1 %4905, %v134_v59   ;;  %688 = vperm.xlu0 %4904, %v5855_v60   ;;  %v138_v59 = vld [vmem:[%s8464_s0 + $0x378] sm:$0xff]  ;;  %v5881_v63 = vld [vmem:[%s8464_s0 + $0x370] sm:$0xff] }
  0xd7   :  { %8640 = vst [vmem:[#allocation98_spill] sm:$0xff] %v5881_v63 }
  0xd9   :  { %v5870_v62 = vpop.permute.xlu1 %393  ;;  %v5872_v61 = vpop.permute.xlu0 %388 }
  0xda   :  { %8638 = vst [vmem:[#allocation96_spill] sm:$0xff] %v5870_v62  ;;  %8639 = vst [vmem:[#allocation97_spill] sm:$0xff] %v5872_v61  ;;  %703 = vperm.xlu1 %4905, %v136_v58   ;;  %698 = vperm.xlu0 %4904, %v5868_v57   ;;  %v140_v58 = vld [vmem:[%s8464_s0 + $0x388] sm:$0xff]  ;;  %v5894_v61 = vld [vmem:[%s8464_s0 + $0x380] sm:$0xff] }
  0xdb   :  { %8643 = vst [vmem:[#allocation101_spill] sm:$0xff] %v5894_v61 }
  0xdd   :  { %v5883_v2 = vpop.permute.xlu1 %403  ;;  %v5885_v60 = vpop.permute.xlu0 %398 }
  0xde   :  { %8641 = vst [vmem:[#allocation99_spill] sm:$0xff] %v5883_v2  ;;  %8642 = vst [vmem:[#allocation100_spill] sm:$0xff] %v5885_v60  ;;  %713 = vperm.xlu1 %4905, %v138_v59   ;;  %708 = vperm.xlu0 %4904, %v5881_v63   ;;  %v142_v59 = vld [vmem:[%s8464_s0 + $0x398] sm:$0xff]  ;;  %v5907_v60 = vld [vmem:[%s8464_s0 + $0x390] sm:$0xff] }
  0xdf   :  { %8646 = vst [vmem:[#allocation104_spill] sm:$0xff] %v5907_v60 }
  0xe1   :  { %v5896_v62 = vpop.permute.xlu1 %413  ;;  %v5898_v57 = vpop.permute.xlu0 %408 }
  0xe2   :  { %8644 = vst [vmem:[#allocation102_spill] sm:$0xff] %v5896_v62  ;;  %8645 = vst [vmem:[#allocation103_spill] sm:$0xff] %v5898_v57  ;;  %723 = vperm.xlu1 %4905, %v140_v58   ;;  %718 = vperm.xlu0 %4904, %v5894_v61   ;;  %v144_v58 = vld [vmem:[%s8464_s0 + $0x3a8] sm:$0xff]  ;;  %v143_v57 = vld [vmem:[%s8464_s0 + $0x3a0] sm:$0xff] }
  0xe5   :  { %v5909_v2 = vpop.permute.xlu1 %423  ;;  %v5911_v63 = vpop.permute.xlu0 %418 }
  0xe6   :  { %8647 = vst [vmem:[#allocation105_spill] sm:$0xff] %v5909_v2  ;;  %8648 = vst [vmem:[#allocation106_spill] sm:$0xff] %v5911_v63  ;;  %733 = vperm.xlu1 %4905, %v142_v59   ;;  %728 = vperm.xlu0 %4904, %v5907_v60   ;;  %v146_v59 = vld [vmem:[%s8464_s0 + $0x3b8] sm:$0xff]  ;;  %v5930_v63 = vld [vmem:[%s8464_s0 + $0x3b0] sm:$0xff] }
  0xe7   :  { %8651 = vst [vmem:[#allocation109_spill] sm:$0xff] %v5930_v63 }
  0xe9   :  { %v5920_v62 = vpop.permute.xlu1 %433  ;;  %v5922_v61 = vpop.permute.xlu0 %428 }
  0xea   :  { %8649 = vst [vmem:[#allocation107_spill] sm:$0xff] %v5920_v62  ;;  %8650 = vst [vmem:[#allocation108_spill] sm:$0xff] %v5922_v61  ;;  %743 = vperm.xlu1 %4905, %v144_v58   ;;  %738 = vperm.xlu0 %4904, %v143_v57   ;;  %v148_v57 = vld [vmem:[%s8464_s0 + $0x3c8] sm:$0xff]  ;;  %v147_v58 = vld [vmem:[%s8464_s0 + $0x3c0] sm:$0xff] }
  0xed   :  { %v5932_v2 = vpop.permute.xlu1 %443  ;;  %v5934_v60 = vpop.permute.xlu0 %438 }
  0xee   :  { %8652 = vst [vmem:[#allocation110_spill] sm:$0xff] %v5932_v2  ;;  %8653 = vst [vmem:[#allocation111_spill] sm:$0xff] %v5934_v60  ;;  %753 = vperm.xlu1 %4905, %v146_v59   ;;  %748 = vperm.xlu0 %4904, %v5930_v63   ;;  %v150_v59 = vld [vmem:[%s8464_s0 + $0x3d8] sm:$0xff]  ;;  %v149_v60 = vld [vmem:[%s8464_s0 + $0x3d0] sm:$0xff] }
  0xf1   :  { %v5943_v61 = vpop.permute.xlu1 %453  ;;  %v5945_v62 = vpop.permute.xlu0 %448 }
  0xf2   :  { %8654 = vst [vmem:[#allocation112_spill] sm:$0xff] %v5943_v61  ;;  %8655 = vst [vmem:[#allocation113_spill] sm:$0xff] %v5945_v62  ;;  %763 = vperm.xlu1 %4905, %v148_v57   ;;  %758 = vperm.xlu0 %4904, %v147_v58   ;;  %v152_v62 = vld [vmem:[%s8464_s0 + $0x3e8] sm:$0xff]  ;;  %v151_v57 = vld [vmem:[%s8464_s0 + $0x3e0] sm:$0xff] }
  0xf5   :  { %v5953_v2 = vpop.permute.xlu1 %463  ;;  %v5955_v63 = vpop.permute.xlu0 %458 }
  0xf6   :  { %8656 = vst [vmem:[#allocation114_spill] sm:$0xff] %v5953_v2  ;;  %8657 = vst [vmem:[#allocation115_spill] sm:$0xff] %v5955_v63  ;;  %773 = vperm.xlu1 %4905, %v150_v59   ;;  %768 = vperm.xlu0 %4904, %v149_v60   ;;  %v154_v63 = vld [vmem:[%s8464_s0 + $0x3f8] sm:$0xff]  ;;  %v153_v60 = vld [vmem:[%s8464_s0 + $0x3f0] sm:$0xff] }
  0xf9   :  { %v5963_v58 = vpop.permute.xlu1 %473  ;;  %v5965_v61 = vpop.permute.xlu0 %468 }
  0xfa   :  { %8658 = vst [vmem:[#allocation116_spill] sm:$0xff] %v5963_v58  ;;  %8659 = vst [vmem:[#allocation117_spill] sm:$0xff] %v5965_v61  ;;  %783 = vperm.xlu1 %4905, %v152_v62   ;;  %778 = vperm.xlu0 %4904, %v151_v57   ;;  %v8543_v62 = vmov 1  }
  0xfd   :  { %v5973_v59 = vpop.permute.xlu1 %483  ;;  %v5975_v2 = vpop.permute.xlu0 %478 }
  0xfe   :  { %8660 = vst [vmem:[#allocation118_spill] sm:$0xff] %v5973_v59  ;;  %8661 = vst [vmem:[#allocation119_spill] sm:$0xff] %v5975_v2  ;;  %793 = vperm.xlu1 %4905, %v154_v63   ;;  %788 = vperm.xlu0 %4904, %v153_v60  }
 0x101   :  { %v5977_v55 = vpop.permute.xlu1 %493  ;;  %v5979_v58 = vpop.permute.xlu0 %488 }
 0x102   :  { %4907 = vset.pattern.permute.xlu1 %v8543_v62  ;;  %4906 = vset.pattern.permute.xlu0 %v8543_v62 }
 0x103   :  { %934 = vperm.xlu1 %4907, %v5169_v4   ;;  %930 = vperm.xlu0 %4906, %v5157_v1  }
 0x105   :  { %v5985_v57 = vpop.permute.xlu1 %503  ;;  %v5987_v59 = vpop.permute.xlu0 %498 }
 0x107   :  { %938 = vperm.xlu1 %4907, %v5152_v0   ;;  %942 = vperm.xlu0 %4906, %v5164_v3  }
 0x109   :  { %v5991_v63 = vpop.permute.xlu1 %513  ;;  %v5993_v60 = vpop.permute.xlu0 %508 }
 0x10a   :  { %8662 = vst [vmem:[#allocation120_spill] sm:$0xff] %v5993_v60 }
 0x10b   :  { %946 = vperm.xlu1 %4907, %v5181_v6   ;;  %950 = vperm.xlu0 %4906, %v5176_v5  }
 0x10d   :  { %v5997_v62 = vpop.permute.xlu1 %523  ;;  %v5999_v2 = vpop.permute.xlu0 %518 }
 0x10e   :  { %8663 = vst [vmem:[#allocation121_spill] sm:$0xff] %v5997_v62  ;;  %8664 = vst [vmem:[#allocation122_spill] sm:$0xff] %v5999_v2 }
 0x10f   :  { %954 = vperm.xlu1 %4907, %v5193_v8   ;;  %958 = vperm.xlu0 %4906, %v5188_v7  }
 0x111   :  { %v6003_v1 = vpop.permute.xlu1 %533  ;;  %v6005_v61 = vpop.permute.xlu0 %528 }
 0x112   :  { %8665 = vst [vmem:[#allocation123_spill] sm:$0xff] %v6003_v1  ;;  %8666 = vst [vmem:[#allocation124_spill] sm:$0xff] %v6005_v61 }
 0x113   :  { %962 = vperm.xlu1 %4907, %v5205_v10   ;;  %966 = vperm.xlu0 %4906, %v5200_v9  }
 0x115   :  { %v6009_v3 = vpop.permute.xlu1 %543  ;;  %v6011_v60 = vpop.permute.xlu0 %538 }
 0x116   :  { %8667 = vst [vmem:[#allocation125_spill] sm:$0xff] %v6009_v3  ;;  %8668 = vst [vmem:[#allocation126_spill] sm:$0xff] %v6011_v60 }
 0x117   :  { %970 = vperm.xlu1 %4907, %v5217_v12   ;;  %974 = vperm.xlu0 %4906, %v5212_v11  }
 0x119   :  { %v6015_v5 = vpop.permute.xlu1 %553  ;;  %v6017_v2 = vpop.permute.xlu0 %548 }
 0x11a   :  { %8669 = vst [vmem:[#allocation127_spill] sm:$0xff] %v6015_v5  ;;  %8670 = vst [vmem:[#allocation128_spill] sm:$0xff] %v6017_v2 }
 0x11b   :  { %978 = vperm.xlu1 %4907, %v5229_v14   ;;  %982 = vperm.xlu0 %4906, %v5224_v13  }
 0x11d   :  { %v6021_v7 = vpop.permute.xlu1 %563  ;;  %v6023_v61 = vpop.permute.xlu0 %558 }
 0x11e   :  { %8671 = vst [vmem:[#allocation129_spill] sm:$0xff] %v6021_v7  ;;  %8672 = vst [vmem:[#allocation130_spill] sm:$0xff] %v6023_v61 }
 0x11f   :  { %986 = vperm.xlu1 %4907, %v5241_v16   ;;  %990 = vperm.xlu0 %4906, %v5236_v15  }
 0x121   :  { %v6027_v9 = vpop.permute.xlu1 %573  ;;  %v6029_v60 = vpop.permute.xlu0 %568 }
 0x122   :  { %8673 = vst [vmem:[#allocation131_spill] sm:$0xff] %v6027_v9  ;;  %8674 = vst [vmem:[#allocation132_spill] sm:$0xff] %v6029_v60 }
 0x123   :  { %994 = vperm.xlu1 %4907, %v5253_v18   ;;  %998 = vperm.xlu0 %4906, %v5248_v17  }
 0x125   :  { %v6033_v11 = vpop.permute.xlu1 %583  ;;  %v6035_v2 = vpop.permute.xlu0 %578 }
 0x126   :  { %8675 = vst [vmem:[#allocation133_spill] sm:$0xff] %v6033_v11  ;;  %8676 = vst [vmem:[#allocation134_spill] sm:$0xff] %v6035_v2 }
 0x127   :  { %1002 = vperm.xlu1 %4907, %v5265_v20   ;;  %1006 = vperm.xlu0 %4906, %v5260_v19  }
 0x129   :  { %v6039_v13 = vpop.permute.xlu1 %593  ;;  %v6041_v61 = vpop.permute.xlu0 %588 }
 0x12a   :  { %8677 = vst [vmem:[#allocation135_spill] sm:$0xff] %v6039_v13  ;;  %8678 = vst [vmem:[#allocation136_spill] sm:$0xff] %v6041_v61  ;;  %v8747_v61 = vld [vmem:[#allocation57_spill] sm:$0xff] }
 0x12b   :  { %1010 = vperm.xlu1 %4907, %v5277_v22   ;;  %1014 = vperm.xlu0 %4906, %v5272_v21  }
 0x12d   :  { %v6045_v15 = vpop.permute.xlu1 %603  ;;  %v6047_v60 = vpop.permute.xlu0 %598 }
 0x12e   :  { %8679 = vst [vmem:[#allocation137_spill] sm:$0xff] %v6045_v15  ;;  %8680 = vst [vmem:[#allocation138_spill] sm:$0xff] %v6047_v60 }
 0x12f   :  { %1018 = vperm.xlu1 %4907, %v5289_v24   ;;  %1022 = vperm.xlu0 %4906, %v5284_v23  }
 0x131   :  { %v6051_v17 = vpop.permute.xlu1 %613  ;;  %v6053_v2 = vpop.permute.xlu0 %608 }
 0x132   :  { %8681 = vst [vmem:[#allocation139_spill] sm:$0xff] %v6051_v17  ;;  %8682 = vst [vmem:[#allocation140_spill] sm:$0xff] %v6053_v2 }
 0x133   :  { %1026 = vperm.xlu1 %4907, %v5301_v26   ;;  %1030 = vperm.xlu0 %4906, %v5296_v25  }
 0x135   :  { %v6057_v19 = vpop.permute.xlu1 %623  ;;  %v6059_v13 = vpop.permute.xlu0 %618 }
 0x136   :  { %8683 = vst [vmem:[#allocation141_spill] sm:$0xff] %v6057_v19  ;;  %8684 = vst [vmem:[#allocation142_spill] sm:$0xff] %v6059_v13  ;;  %v8744_v13 = vld [vmem:[#allocation53_spill] sm:$0xff] }
 0x137   :  { %1034 = vperm.xlu1 %4907, %v5313_v28   ;;  %1038 = vperm.xlu0 %4906, %v5308_v27  }
 0x139   :  { %v6063_v21 = vpop.permute.xlu1 %633  ;;  %v6065_v15 = vpop.permute.xlu0 %628 }
 0x13a   :  { %8685 = vst [vmem:[#allocation143_spill] sm:$0xff] %v6063_v21  ;;  %8686 = vst [vmem:[#allocation144_spill] sm:$0xff] %v6065_v15 }
 0x13b   :  { %1042 = vperm.xlu1 %4907, %v5325_v30   ;;  %1046 = vperm.xlu0 %4906, %v5320_v29  }
 0x13d   :  { %v6069_v23 = vpop.permute.xlu1 %643  ;;  %v6071_v17 = vpop.permute.xlu0 %638 }
 0x13e   :  { %8687 = vst [vmem:[#allocation145_spill] sm:$0xff] %v6069_v23  ;;  %8688 = vst [vmem:[#allocation146_spill] sm:$0xff] %v6071_v17  ;;  %v8545_v23 = vmov 2   ;;  %v8742_v17 = vld [vmem:[#allocation49_spill] sm:$0xff] }
 0x13f   :  { %1050 = vperm.xlu1 %4907, %v5337_v32   ;;  %1054 = vperm.xlu0 %4906, %v5332_v31  }
 0x141   :  { %v6075_v25 = vpop.permute.xlu1 %653  ;;  %v6077_v19 = vpop.permute.xlu0 %648 }
 0x142   :  { %8689 = vst [vmem:[#allocation147_spill] sm:$0xff] %v6075_v25  ;;  %8690 = vst [vmem:[#allocation148_spill] sm:$0xff] %v6077_v19 }
 0x143   :  { %1058 = vperm.xlu1 %4907, %v5349_v34   ;;  %1062 = vperm.xlu0 %4906, %v5344_v33  }
 0x145   :  { %v6081_v27 = vpop.permute.xlu1 %663  ;;  %v6083_v30 = vpop.permute.xlu0 %658 }
 0x146   :  { %8691 = vst [vmem:[#allocation149_spill] sm:$0xff] %v6081_v27  ;;  %8692 = vst [vmem:[#allocation150_spill] sm:$0xff] %v6083_v30  ;;  %v8740_v27 = vld [vmem:[#allocation41_spill] sm:$0xff] }
 0x147   :  { %1066 = vperm.xlu1 %4907, %v5361_v36   ;;  %1070 = vperm.xlu0 %4906, %v5356_v35   ;;  %v8741_v30 = vld [vmem:[#allocation45_spill] sm:$0xff] }
 0x149   :  { %v6087_v29 = vpop.permute.xlu1 %673  ;;  %v6089_v32 = vpop.permute.xlu0 %668 }
 0x14a   :  { %8693 = vst [vmem:[#allocation151_spill] sm:$0xff] %v6087_v29  ;;  %8694 = vst [vmem:[#allocation152_spill] sm:$0xff] %v6089_v32 }
 0x14b   :  { %1074 = vperm.xlu1 %4907, %v5373_v38   ;;  %1078 = vperm.xlu0 %4906, %v5368_v37  }
 0x14d   :  { %v6093_v31 = vpop.permute.xlu1 %683  ;;  %v6095_v34 = vpop.permute.xlu0 %678 }
 0x14e   :  { %8695 = vst [vmem:[#allocation153_spill] sm:$0xff] %v6093_v31  ;;  %8696 = vst [vmem:[#allocation154_spill] sm:$0xff] %v6095_v34  ;;  %v8738_v31 = vld [vmem:[#allocation37_spill] sm:$0xff]  ;;  %v8739_v34 = vld [vmem:[#allocation36_spill] sm:$0xff] }
 0x14f   :  { %1082 = vperm.xlu1 %4907, %v5385_v40   ;;  %1086 = vperm.xlu0 %4906, %v5380_v39  }
 0x151   :  { %v6099_v33 = vpop.permute.xlu1 %693  ;;  %v6101_v36 = vpop.permute.xlu0 %688 }
 0x152   :  { %8697 = vst [vmem:[#allocation155_spill] sm:$0xff] %v6099_v33  ;;  %8698 = vst [vmem:[#allocation156_spill] sm:$0xff] %v6101_v36 }
 0x153   :  { %1090 = vperm.xlu1 %4907, %v5397_v42   ;;  %1094 = vperm.xlu0 %4906, %v5392_v41  }
 0x155   :  { %v6105_v35 = vpop.permute.xlu1 %703  ;;  %v6107_v38 = vpop.permute.xlu0 %698 }
 0x156   :  { %8699 = vst [vmem:[#allocation157_spill] sm:$0xff] %v6105_v35  ;;  %8700 = vst [vmem:[#allocation158_spill] sm:$0xff] %v6107_v38  ;;  %v8736_v35 = vld [vmem:[#allocation33_spill] sm:$0xff]  ;;  %v8737_v38 = vld [vmem:[#allocation32_spill] sm:$0xff] }
 0x157   :  { %1098 = vperm.xlu1 %4907, %v5409_v44   ;;  %1102 = vperm.xlu0 %4906, %v5404_v43  }
 0x159   :  { %v6111_v37 = vpop.permute.xlu1 %713  ;;  %v6113_v40 = vpop.permute.xlu0 %708 }
 0x15a   :  { %8701 = vst [vmem:[#allocation159_spill] sm:$0xff] %v6111_v37  ;;  %8702 = vst [vmem:[#allocation160_spill] sm:$0xff] %v6113_v40 }
 0x15b   :  { %1106 = vperm.xlu1 %4907, %v5421_v46   ;;  %1110 = vperm.xlu0 %4906, %v5416_v45  }
 0x15d   :  { %v6117_v39 = vpop.permute.xlu1 %723  ;;  %v6119_v42 = vpop.permute.xlu0 %718 }
 0x15e   :  { %8703 = vst [vmem:[#allocation161_spill] sm:$0xff] %v6117_v39  ;;  %8704 = vst [vmem:[#allocation162_spill] sm:$0xff] %v6119_v42  ;;  %v8735_v42 = vld [vmem:[#allocation28_spill] sm:$0xff] }
 0x15f   :  { %1114 = vperm.xlu1 %4907, %v5433_v48   ;;  %1118 = vperm.xlu0 %4906, %v5428_v47  }
 0x161   :  { %v6123_v41 = vpop.permute.xlu1 %733  ;;  %v6125_v44 = vpop.permute.xlu0 %728 }
 0x162   :  { %8705 = vst [vmem:[#allocation163_spill] sm:$0xff] %v6123_v41  ;;  %8706 = vst [vmem:[#allocation164_spill] sm:$0xff] %v6125_v44  ;;  %v8733_v41 = vld [vmem:[#allocation24_spill] sm:$0xff] }
 0x163   :  { %1122 = vperm.xlu1 %4907, %v5445_v50   ;;  %1126 = vperm.xlu0 %4906, %v5440_v49   ;;  %v8713_v49 = vld [vmem:[#allocation5_spill] sm:$0xff] }
 0x165   :  { %v6129_v43 = vpop.permute.xlu1 %743  ;;  %v6131_v46 = vpop.permute.xlu0 %738 }
 0x166   :  { %8707 = vst [vmem:[#allocation165_spill] sm:$0xff] %v6129_v43  ;;  %8708 = vst [vmem:[#allocation166_spill] sm:$0xff] %v6131_v46  ;;  %v8731_v46 = vld [vmem:[#allocation20_spill] sm:$0xff] }
 0x167   :  { %1130 = vperm.xlu1 %4907, %v5457_v52   ;;  %1134 = vperm.xlu0 %4906, %v5452_v51   ;;  %v8716_v51 = vld [vmem:[#allocation7_spill] sm:$0xff] }
 0x169   :  { %v6135_v45 = vpop.permute.xlu1 %753  ;;  %v6137_v48 = vpop.permute.xlu0 %748 }
 0x16a   :  { %8709 = vst [vmem:[#allocation167_spill] sm:$0xff] %v6135_v45  ;;  %8710 = vst [vmem:[#allocation168_spill] sm:$0xff] %v6137_v48  ;;  %v8717_v45 = vld [vmem:[#allocation6_spill] sm:$0xff] }
 0x16b   :  { %1138 = vperm.xlu1 %4907, %v5469_v54   ;;  %1142 = vperm.xlu0 %4906, %v5464_v53   ;;  %v8720_v53 = vld [vmem:[#allocation9_spill] sm:$0xff] }
 0x16d   :  { %v6141_v47 = vpop.permute.xlu1 %763  ;;  %v6143_v50 = vpop.permute.xlu0 %758 }
 0x16e   :  { %8711 = vst [vmem:[#allocation169_spill] sm:$0xff] %v6141_v47  ;;  %8712 = vst [vmem:[#allocation170_spill] sm:$0xff] %v6143_v50  ;;  %v8721_v47 = vld [vmem:[#allocation8_spill] sm:$0xff] }
 0x16f   :  { %1146 = vperm.xlu1 %4907, %v5481_v56   ;;  %1150 = vperm.xlu0 %4906, %v8713_v49   ;;  %v8724_v49 = vld [vmem:[#allocation11_spill] sm:$0xff] }
 0x171   :  { %v6147_v43 = vpop.permute.xlu1 %773  ;;  %v6149_v52 = vpop.permute.xlu0 %768 }
 0x172   :  { %8714 = vst [vmem:[#allocation5_spill] sm:$0xff] %v6147_v43  ;;  %8715 = vst [vmem:[#allocation171_spill] sm:$0xff] %v6149_v52  ;;  %v8725_v43 = vld [vmem:[#allocation10_spill] sm:$0xff] }
 0x173   :  { %1154 = vperm.xlu1 %4907, %v8716_v51   ;;  %1158 = vperm.xlu0 %4906, %v8717_v45   ;;  %v8726_v45 = vld [vmem:[#allocation13_spill] sm:$0xff] }
 0x175   :  { %v6153_v48 = vpop.permute.xlu1 %783  ;;  %v6155_v54 = vpop.permute.xlu0 %778 }
 0x176   :  { %8718 = vst [vmem:[#allocation7_spill] sm:$0xff] %v6153_v48  ;;  %8719 = vst [vmem:[#allocation6_spill] sm:$0xff] %v6155_v54  ;;  %v8727_v48 = vld [vmem:[#allocation12_spill] sm:$0xff] }
 0x177   :  { %1162 = vperm.xlu1 %4907, %v8720_v53   ;;  %1166 = vperm.xlu0 %4906, %v8721_v47   ;;  %v8728_v47 = vld [vmem:[#allocation17_spill] sm:$0xff] }
 0x179   :  { %v6159_v50 = vpop.permute.xlu1 %793  ;;  %v6161_v56 = vpop.permute.xlu0 %788 }
 0x17a   :  { %8722 = vst [vmem:[#allocation9_spill] sm:$0xff] %v6159_v50  ;;  %8723 = vst [vmem:[#allocation8_spill] sm:$0xff] %v6161_v56  ;;  %v8729_v50 = vld [vmem:[#allocation16_spill] sm:$0xff] }
 0x17b   :  { %1170 = vperm.xlu1 %4907, %v8724_v49   ;;  %1174 = vperm.xlu0 %4906, %v8725_v43   ;;  %v8730_v43 = vld [vmem:[#allocation21_spill] sm:$0xff] }
 0x17e   :  { %v6165_v52 = vpop.permute.xlu1 %934  ;;  %v6167_v51 = vpop.permute.xlu0 %930 }
 0x17f   :  { %1178 = vperm.xlu1 %4907, %v8726_v45   ;;  %1182 = vperm.xlu0 %4906, %v8727_v48   ;;  %v8732_v48 = vld [vmem:[#allocation25_spill] sm:$0xff] }
 0x182   :  { %v6171_v54 = vpop.permute.xlu1 %938  ;;  %v6173_v53 = vpop.permute.xlu0 %942 }
 0x183   :  { %1186 = vperm.xlu1 %4907, %v8728_v47   ;;  %1190 = vperm.xlu0 %4906, %v8729_v50   ;;  %v8734_v50 = vld [vmem:[#allocation29_spill] sm:$0xff] }
 0x186   :  { %v6177_v56 = vpop.permute.xlu1 %946  ;;  %v6179_v49 = vpop.permute.xlu0 %950 }
 0x187   :  { %1194 = vperm.xlu1 %4907, %v8730_v43   ;;  %1198 = vperm.xlu0 %4906, %v8731_v46  }
 0x18a   :  { %v6183_v44 = vpop.permute.xlu1 %954  ;;  %v6185_v45 = vpop.permute.xlu0 %958 }
 0x18b   :  { %1202 = vperm.xlu1 %4907, %v8732_v48   ;;  %1206 = vperm.xlu0 %4906, %v8733_v41  }
 0x18e   :  { %v6189_v39 = vpop.permute.xlu1 %962  ;;  %v6191_v47 = vpop.permute.xlu0 %966 }
 0x18f   :  { %1210 = vperm.xlu1 %4907, %v8734_v50   ;;  %1214 = vperm.xlu0 %4906, %v8735_v42  }
 0x192   :  { %v6195_v37 = vpop.permute.xlu1 %970  ;;  %v6197_v40 = vpop.permute.xlu0 %974 }
 0x193   :  { %1218 = vperm.xlu1 %4907, %v8736_v35   ;;  %1222 = vperm.xlu0 %4906, %v8737_v38  }
 0x196   :  { %v6201_v33 = vpop.permute.xlu1 %978  ;;  %v6203_v36 = vpop.permute.xlu0 %982 }
 0x197   :  { %1226 = vperm.xlu1 %4907, %v8738_v31   ;;  %1230 = vperm.xlu0 %4906, %v8739_v34  }
 0x19a   :  { %v6207_v29 = vpop.permute.xlu1 %986  ;;  %v6209_v32 = vpop.permute.xlu0 %990 }
 0x19b   :  { %1234 = vperm.xlu1 %4907, %v8740_v27   ;;  %1242 = vperm.xlu0 %4906, %v8741_v30  }
 0x19e   :  { %v6213_v25 = vpop.permute.xlu1 %994  ;;  %v6215_v19 = vpop.permute.xlu0 %998 }
 0x19f   :  { %4908 = vset.pattern.permute.xlu1 %v8545_v23  ;;  %1250 = vperm.xlu0 %4906, %v8742_v17  }
 0x1a0   :  { %1707 = vperm.xlu1 %4908, %v5169_v4   ;;  %v8750_v4 = vld [vmem:[#allocation61_spill] sm:$0xff] }
 0x1a2   :  { %v6220_v21 = vpop.permute.xlu1 %1002  ;;  %v6222_v15 = vpop.permute.xlu0 %1006 }
 0x1a3   :  { %8743 = vst [vmem:[#allocation11_spill] sm:$0xff] %v6222_v15  ;;  %1258 = vperm.xlu0 %4906, %v8744_v13  }
 0x1a4   :  { %1711 = vperm.xlu1 %4908, %v5152_v0   ;;  %v8753_v0 = vld [vmem:[#allocation65_spill] sm:$0xff] }
 0x1a6   :  { %v6226_v2 = vpop.permute.xlu1 %1010  ;;  %v6228_v60 = vpop.permute.xlu0 %1014 }
 0x1a7   :  { %8745 = vst [vmem:[#allocation10_spill] sm:$0xff] %v6226_v2  ;;  %8746 = vst [vmem:[#allocation13_spill] sm:$0xff] %v6228_v60  ;;  %1266 = vperm.xlu0 %4906, %v8747_v61  }
 0x1a8   :  { %1719 = vperm.xlu1 %4908, %v5181_v6   ;;  %v8756_v6 = vld [vmem:[#allocation68_spill] sm:$0xff] }
 0x1aa   :  { %v6232_v23 = vpop.permute.xlu1 %1018  ;;  %v6234_v11 = vpop.permute.xlu0 %1022 }
 0x1ab   :  { %8748 = vst [vmem:[#allocation12_spill] sm:$0xff] %v6232_v23  ;;  %8749 = vst [vmem:[#allocation17_spill] sm:$0xff] %v6234_v11  ;;  %1274 = vperm.xlu0 %4906, %v8750_v4   ;;  %v8867_v23 = vld [vmem:[#allocation35_spill] sm:$0xff] }
 0x1ac   :  { %1727 = vperm.xlu1 %4908, %v5193_v8   ;;  %v8759_v8 = vld [vmem:[#allocation71_spill] sm:$0xff] }
 0x1ae   :  { %v6238_v9 = vpop.permute.xlu1 %1026  ;;  %v6240_v7 = vpop.permute.xlu0 %1030 }
 0x1af   :  { %8751 = vst [vmem:[#allocation16_spill] sm:$0xff] %v6238_v9  ;;  %8752 = vst [vmem:[#allocation21_spill] sm:$0xff] %v6240_v7  ;;  %1282 = vperm.xlu0 %4906, %v8753_v0  }
 0x1b0   :  { %1735 = vperm.xlu1 %4908, %v5205_v10   ;;  %v8762_v10 = vld [vmem:[#allocation74_spill] sm:$0xff] }
 0x1b2   :  { %v6244_v5 = vpop.permute.xlu1 %1034  ;;  %v6246_v3 = vpop.permute.xlu0 %1038 }
 0x1b3   :  { %8754 = vst [vmem:[#allocation20_spill] sm:$0xff] %v6244_v5  ;;  %8755 = vst [vmem:[#allocation25_spill] sm:$0xff] %v6246_v3  ;;  %1290 = vperm.xlu0 %4906, %v8756_v6   ;;  %v4998_v5 = vld [vmem:[%s8464_s0 + $0x2c8] sm:$0xff] }
 0x1b4   :  { %1743 = vperm.xlu1 %4908, %v5217_v12   ;;  %v8765_v12 = vld [vmem:[#allocation77_spill] sm:$0xff] }
 0x1b6   :  { %v6250_v11 = vpop.permute.xlu1 %1042  ;;  %v6252_v60 = vpop.permute.xlu0 %1046 }
 0x1b7   :  { %8757 = vst [vmem:[#allocation24_spill] sm:$0xff] %v6250_v11  ;;  %8758 = vst [vmem:[#allocation29_spill] sm:$0xff] %v6252_v60  ;;  %1298 = vperm.xlu0 %4906, %v8759_v8  }
 0x1b8   :  { %1751 = vperm.xlu1 %4908, %v5229_v14   ;;  %v8768_v14 = vld [vmem:[#allocation80_spill] sm:$0xff] }
 0x1ba   :  { %v6256_v7 = vpop.permute.xlu1 %1050  ;;  %v6258_v0 = vpop.permute.xlu0 %1054 }
 0x1bb   :  { %8760 = vst [vmem:[#allocation28_spill] sm:$0xff] %v6256_v7  ;;  %8761 = vst [vmem:[#allocation33_spill] sm:$0xff] %v6258_v0  ;;  %1306 = vperm.xlu0 %4906, %v8762_v10   ;;  %v4987_v7 = vld [vmem:[%s8464_s0 + $0x108] sm:$0xff] }
 0x1bc   :  { %1759 = vperm.xlu1 %4908, %v5241_v16   ;;  %v8771_v16 = vld [vmem:[#allocation83_spill] sm:$0xff] }
 0x1be   :  { %v6262_v3 = vpop.permute.xlu1 %1058  ;;  %v6264_v6 = vpop.permute.xlu0 %1062 }
 0x1bf   :  { %8763 = vst [vmem:[#allocation32_spill] sm:$0xff] %v6262_v3  ;;  %8764 = vst [vmem:[#allocation37_spill] sm:$0xff] %v6264_v6  ;;  %1314 = vperm.xlu0 %4906, %v8765_v12  }
 0x1c0   :  { %1767 = vperm.xlu1 %4908, %v5253_v18   ;;  %v8774_v18 = vld [vmem:[#allocation86_spill] sm:$0xff] }
 0x1c2   :  { %v6268_v60 = vpop.permute.xlu1 %1066  ;;  %v6270_v8 = vpop.permute.xlu0 %1070 }
 0x1c3   :  { %8766 = vst [vmem:[#allocation36_spill] sm:$0xff] %v6268_v60  ;;  %8767 = vst [vmem:[#allocation41_spill] sm:$0xff] %v6270_v8  ;;  %1322 = vperm.xlu0 %4906, %v8768_v14  }
 0x1c4   :  { %1775 = vperm.xlu1 %4908, %v5265_v20   ;;  %v8777_v20 = vld [vmem:[#allocation89_spill] sm:$0xff] }
 0x1c6   :  { %v6274_v0 = vpop.permute.xlu1 %1074  ;;  %v6276_v10 = vpop.permute.xlu0 %1078 }
 0x1c7   :  { %8769 = vst [vmem:[#allocation45_spill] sm:$0xff] %v6274_v0  ;;  %8770 = vst [vmem:[#allocation49_spill] sm:$0xff] %v6276_v10  ;;  %1330 = vperm.xlu0 %4906, %v8771_v16  }
 0x1c8   :  { %1967 = vperm.xlu1 %4908, %v8730_v43   ;;  %v8780_v43 = vld [vmem:[#allocation92_spill] sm:$0xff] }
 0x1ca   :  { %v6280_v6 = vpop.permute.xlu1 %1082  ;;  %v6282_v12 = vpop.permute.xlu0 %1086 }
 0x1cb   :  { %8772 = vst [vmem:[#allocation53_spill] sm:$0xff] %v6280_v6  ;;  %8773 = vst [vmem:[#allocation57_spill] sm:$0xff] %v6282_v12  ;;  %1338 = vperm.xlu0 %4906, %v8774_v18  }
 0x1cc   :  { %1783 = vperm.xlu1 %4908, %v5277_v22   ;;  %v8783_v22 = vld [vmem:[#allocation95_spill] sm:$0xff] }
 0x1ce   :  { %v6286_v8 = vpop.permute.xlu1 %1090  ;;  %v6288_v14 = vpop.permute.xlu0 %1094 }
 0x1cf   :  { %8775 = vst [vmem:[#allocation61_spill] sm:$0xff] %v6286_v8  ;;  %8776 = vst [vmem:[#allocation65_spill] sm:$0xff] %v6288_v14  ;;  %1346 = vperm.xlu0 %4906, %v8777_v20  }
 0x1d0   :  { %1975 = vperm.xlu1 %4908, %v8732_v48   ;;  %v8786_v48 = vld [vmem:[#allocation98_spill] sm:$0xff] }
 0x1d2   :  { %v6292_v10 = vpop.permute.xlu1 %1098  ;;  %v6294_v16 = vpop.permute.xlu0 %1102 }
 0x1d3   :  { %8778 = vst [vmem:[#allocation68_spill] sm:$0xff] %v6292_v10  ;;  %8779 = vst [vmem:[#allocation71_spill] sm:$0xff] %v6294_v16  ;;  %1354 = vperm.xlu0 %4906, %v8780_v43  }
 0x1d4   :  { %1791 = vperm.xlu1 %4908, %v5289_v24   ;;  %v8789_v24 = vld [vmem:[#allocation101_spill] sm:$0xff] }
 0x1d6   :  { %v6298_v12 = vpop.permute.xlu1 %1106  ;;  %v6300_v18 = vpop.permute.xlu0 %1110 }
 0x1d7   :  { %8781 = vst [vmem:[#allocation74_spill] sm:$0xff] %v6298_v12  ;;  %8782 = vst [vmem:[#allocation77_spill] sm:$0xff] %v6300_v18  ;;  %1362 = vperm.xlu0 %4906, %v8783_v22  }
 0x1d8   :  { %1983 = vperm.xlu1 %4908, %v8734_v50   ;;  %v8792_v50 = vld [vmem:[#allocation104_spill] sm:$0xff] }
 0x1da   :  { %v6304_v8 = vpop.permute.xlu1 %1114  ;;  %v6306_v20 = vpop.permute.xlu0 %1118 }
 0x1db   :  { %8784 = vst [vmem:[#allocation80_spill] sm:$0xff] %v6304_v8  ;;  %8785 = vst [vmem:[#allocation83_spill] sm:$0xff] %v6306_v20  ;;  %1370 = vperm.xlu0 %4906, %v8786_v48   ;;  %v4978_v20 = vld [vmem:[%s8464_s0 + $0x100] sm:$0xff] }
 0x1dc   :  { %1799 = vperm.xlu1 %4908, %v5301_v26   ;;  %v8795_v26 = vld [vmem:[#allocation109_spill] sm:$0xff] }
 0x1de   :  { %v6310_v10 = vpop.permute.xlu1 %1122  ;;  %v6312_v43 = vpop.permute.xlu0 %1126 }
 0x1df   :  { %8787 = vst [vmem:[#allocation86_spill] sm:$0xff] %v6310_v10  ;;  %8788 = vst [vmem:[#allocation89_spill] sm:$0xff] %v6312_v43  ;;  %1378 = vperm.xlu0 %4906, %v8789_v24   ;;  %v4969_v10 = vld [vmem:[%s8464_s0 + $0x28] sm:$0xff] }
 0x1e0   :  { %1991 = vperm.xlu1 %4908, %v8736_v35   ;;  %v2740_v35 = vld [vmem:[%s8467_s3 + $0x18] sm:$0xff] }
 0x1e1   :  { %4671 = vmatprep.subr.mxu0 %v2740_v35  ;;  %4890 = vmatprep.subr.mxu1 %v2740_v35 }
 0x1e2   :  { %v6316_v12 = vpop.permute.xlu1 %1130  ;;  %v6318_v22 = vpop.permute.xlu0 %1134  ;;  %4672 = vmatpush3.msra.mxu0 %v2740_v35  ;;  %4894 = vmatpush3.msra.mxu1 %v2740_v35 }
 0x1e3   :  { %8790 = vst [vmem:[#allocation92_spill] sm:$0xff] %v6316_v12  ;;  %8791 = vst [vmem:[#allocation95_spill] sm:$0xff] %v6318_v22  ;;  %1386 = vperm.xlu0 %4906, %v8792_v50   ;;  %v8798_v50 = vmov 2   ;;  %v2737_v22 = vld [vmem:[%s8467_s3] sm:$0xff] }
 0x1e4   :  { %1807 = vperm.xlu1 %4908, %v5313_v28   ;;  %v2739_v28 = vld [vmem:[%s8467_s3 + $0x10] sm:$0xff] }
 0x1e5   :  { %4673 = vmatprep.subr.mxu0 %v2739_v28  ;;  %4891 = vmatprep.subr.mxu1 %v2739_v28 }
 0x1e6   :  { %v6322_v8 = vpop.permute.xlu1 %1138  ;;  %v6324_v48 = vpop.permute.xlu0 %1142  ;;  %4674 = vmatpush3.msra.mxu0 %v2739_v28  ;;  %4895 = vmatpush3.msra.mxu1 %v2739_v28 }
 0x1e7   :  { %8793 = vst [vmem:[#allocation98_spill] sm:$0xff] %v6322_v8  ;;  %8794 = vst [vmem:[#allocation101_spill] sm:$0xff] %v6324_v48  ;;  %1402 = vperm.xlu0 %4906, %v8795_v26   ;;  %v8799_v26 = vmov 1   ;;  %v8800_v8 = vld [vmem:[#allocation40_spill] sm:$0xff] }
 0x1e8   :  { %1999 = vperm.xlu1 %4908, %v8738_v31   ;;  %v4966_v31 = vld [vmem:[%s8464_s0] sm:$0xff] }
 0x1ea   :  { %v6331_v24 = vpop.permute.xlu1 %1146  ;;  %v6333_v12 = vpop.permute.xlu0 %1150 }
 0x1eb   :  { %8796 = vst [vmem:[#allocation104_spill] sm:$0xff] %v6331_v24  ;;  %8797 = vst [vmem:[#allocation109_spill] sm:$0xff] %v6333_v12  ;;  %4951 = vset.pattern.permute.xlu0 %v8798_v50  ;;  %v2738_v24 = vld [vmem:[%s8467_s3 + $0x8] sm:$0xff] }
 0x1ec   :  { %4909 = vset.pattern.permute.xlu1 %v8799_v26  ;;  %1703 = vperm.xlu0 %4951, %v4966_v31   ;;  %v4967_v31 = vld [vmem:[%s8464_s0 + $0x18] sm:$0xff] }
 0x1ed   :  { %1238 = vperm.xlu1 %4909, %v8800_v8   ;;  %4675 = vmatprep.subr.mxu0 %v2738_v24 }
 0x1ee   :  { %v6347_v12 = vpop.permute.xlu1 %1154  ;;  %v6349_v48 = vpop.permute.xlu0 %1158  ;;  %4676 = vmatpush3.msra.mxu0 %v2738_v24  ;;  %4892 = vmatprep.subr.mxu1 %v2738_v24 }
 0x1ef   :  { %8801 = vst [vmem:[#allocation40_spill] sm:$0xff] %v6347_v12  ;;  %8802 = vst [vmem:[#allocation172_spill] sm:$0xff] %v6349_v48  ;;  %4677 = vmatprep.subr.mxu0 %v2737_v22  ;;  %v4968_v12 = vld [vmem:[%s8464_s0 + $0xe8] sm:$0xff]  ;;  %4896 = vmatpush3.msra.mxu1 %v2738_v24  ;;  %v8809_v24 = vld [vmem:[#allocation44_spill] sm:$0xff] }
 0x1f0   :  { %1715 = vperm.xlu0 %4951, %v4967_v31   ;;  %4678 = vmatpush3.msra.mxu0 %v2737_v22 }
 0x1f1   :  { %4910 = vset.pattern.permute.xlu1 %v8798_v50  ;;  %4893 = vmatprep.subr.mxu1 %v2737_v22 }
 0x1f2   :  { %1819 = vperm.xlu1 %4910, %v4968_v12   ;;  %v6361_v35 = vpop.permute.xlu1 %1162  ;;  %v6363_v48 = vpop.permute.xlu0 %1166  ;;  %4897 = vmatpush3.msra.mxu1 %v2737_v22  ;;  %v4970_v12 = vld [vmem:[%s8464_s0 + $0x38] sm:$0xff] }
 0x1f3   :  { %8803 = vst [vmem:[#allocation173_spill] sm:$0xff] %v6361_v35  ;;  %8804 = vst [vmem:[#allocation174_spill] sm:$0xff] %v6363_v48 }
 0x1f4   :  { %1723 = vperm.xlu0 %4951, %v4969_v10  }
 0x1f6   :  { %2011 = vperm.xlu1 %4910, %v8800_v8   ;;  %v6369_v31 = vpop.permute.xlu1 %1170  ;;  %v6371_v43 = vpop.permute.xlu0 %1174  ;;  %v4971_v8 = vld [vmem:[%s8464_s0 + $0x48] sm:$0xff] }
 0x1f7   :  { %8805 = vst [vmem:[#allocation175_spill] sm:$0xff] %v6369_v31  ;;  %8806 = vst [vmem:[#allocation176_spill] sm:$0xff] %v6371_v43 }
 0x1f8   :  { %1731 = vperm.xlu0 %4951, %v4970_v12   ;;  %v4972_v12 = vld [vmem:[%s8464_s0 + $0xf0] sm:$0xff] }
 0x1fa   :  { %4911 = vset.pattern.permute.xlu1 %v8799_v26  ;;  %v6377_v28 = vpop.permute.xlu1 %1178  ;;  %v6379_v10 = vpop.permute.xlu0 %1182 }
 0x1fb   :  { %8807 = vst [vmem:[#allocation177_spill] sm:$0xff] %v6377_v28  ;;  %8808 = vst [vmem:[#allocation178_spill] sm:$0xff] %v6379_v10  ;;  %1246 = vperm.xlu1 %4911, %v8809_v24   ;;  %v4973_v10 = vld [vmem:[%s8464_s0 + $0x58] sm:$0xff] }
 0x1fc   :  { %1739 = vperm.xlu0 %4951, %v4971_v8   ;;  %v4974_v8 = vld [vmem:[%s8464_s0 + $0x68] sm:$0xff] }
 0x1fe   :  { %v6385_v31 = vpop.permute.xlu1 %1186  ;;  %v6387_v22 = vpop.permute.xlu0 %1190 }
 0x1ff   :  { %8810 = vst [vmem:[#allocation44_spill] sm:$0xff] %v6385_v31  ;;  %8811 = vst [vmem:[#allocation179_spill] sm:$0xff] %v6387_v22  ;;  %4912 = vset.pattern.permute.xlu1 %v8798_v50 }
 0x200   :  { %1823 = vperm.xlu1 %4912, %v4972_v12   ;;  %1747 = vperm.xlu0 %4951, %v4973_v10   ;;  %v4975_v10 = vld [vmem:[%s8464_s0 + $0x78] sm:$0xff] }
 0x202   :  { %v6396_v28 = vpop.permute.xlu1 %1194  ;;  %v6398_v43 = vpop.permute.xlu0 %1198 }
 0x203   :  { %8812 = vst [vmem:[#allocation180_spill] sm:$0xff] %v6398_v43 }
 0x204   :  { %2015 = vperm.xlu1 %4912, %v8741_v30   ;;  %1755 = vperm.xlu0 %4951, %v4974_v8   ;;  %v4976_v30 = vld [vmem:[%s8464_s0 + $0x88] sm:$0xff]  ;;  %v8817_v8 = vld [vmem:[#allocation48_spill] sm:$0xff] }
 0x206   :  { %v6404_v31 = vpop.permute.xlu1 %1202  ;;  %v6406_v22 = vpop.permute.xlu0 %1206 }
 0x207   :  { %8813 = vst [vmem:[#allocation181_spill] sm:$0xff] %v6404_v31  ;;  %8814 = vst [vmem:[#allocation182_spill] sm:$0xff] %v6406_v22  ;;  %v8861_v22 = vld [vmem:[#allocation26_spill] sm:$0xff] }
 0x208   :  { %2019 = vperm.xlu1 %4912, %v8809_v24   ;;  %1763 = vperm.xlu0 %4951, %v4975_v10   ;;  %v4977_v10 = vld [vmem:[%s8464_s0 + $0x98] sm:$0xff] }
 0x20a   :  { %v6412_v12 = vpop.permute.xlu1 %1210  ;;  %v6414_v35 = vpop.permute.xlu0 %1214 }
 0x20b   :  { %8815 = vst [vmem:[#allocation183_spill] sm:$0xff] %v6412_v12  ;;  %8816 = vst [vmem:[#allocation184_spill] sm:$0xff] %v6414_v35 }
 0x20c   :  { %4913 = vset.pattern.permute.xlu1 %v8799_v26  ;;  %1771 = vperm.xlu0 %4951, %v4976_v30  }
 0x20d   :  { %1254 = vperm.xlu1 %4913, %v8817_v8  }
 0x20e   :  { %v6421_v48 = vpop.permute.xlu1 %1218  ;;  %v6423_v24 = vpop.permute.xlu0 %1222 }
 0x20f   :  { %8818 = vst [vmem:[#allocation48_spill] sm:$0xff] %v6421_v48  ;;  %8819 = vst [vmem:[#allocation185_spill] sm:$0xff] %v6423_v24  ;;  %v8857_v48 = vld [vmem:[#allocation15_spill] sm:$0xff] }
 0x210   :  { %1779 = vperm.xlu0 %4951, %v4977_v10   ;;  %v4979_v10 = vld [vmem:[%s8464_s0 + $0xa8] sm:$0xff] }
 0x211   :  { %4914 = vset.pattern.permute.xlu1 %v8798_v50 }
 0x212   :  { %1831 = vperm.xlu1 %4914, %v4978_v20   ;;  %v6432_v18 = vpop.permute.xlu1 %1226  ;;  %v6434_v30 = vpop.permute.xlu0 %1230 }
 0x213   :  { %8820 = vst [vmem:[#allocation186_spill] sm:$0xff] %v6432_v18  ;;  %8821 = vst [vmem:[#allocation187_spill] sm:$0xff] %v6434_v30 }
 0x214   :  { %1971 = vperm.xlu0 %4951, %v8731_v46   ;;  %v8826_v46 = vld [vmem:[#allocation52_spill] sm:$0xff] }
 0x216   :  { %2023 = vperm.xlu1 %4914, %v8742_v17   ;;  %v6438_v16 = vpop.permute.xlu1 %1234  ;;  %v6440_v14 = vpop.permute.xlu0 %1242 }
 0x217   :  { %8822 = vst [vmem:[#allocation188_spill] sm:$0xff] %v6438_v16  ;;  %8823 = vst [vmem:[#allocation189_spill] sm:$0xff] %v6440_v14 }
 0x218   :  { %1787 = vperm.xlu0 %4951, %v4979_v10   ;;  %v4980_v10 = vld [vmem:[%s8464_s0 + $0xb8] sm:$0xff] }
 0x21a   :  { %2027 = vperm.xlu1 %4914, %v8817_v8   ;;  %v6446_v20 = vpop.permute.xlu0 %1250 }
 0x21b   :  { %8824 = vst [vmem:[#allocation190_spill] sm:$0xff] %v6446_v20  ;;  %v6448_v6 = vpop.permute.xlu1 %1707 }
 0x21c   :  { %1979 = vperm.xlu0 %4951, %v8733_v41   ;;  %v4981_v41 = vld [vmem:[%s8464_s0 + $0x110] sm:$0xff] }
 0x21e   :  { %4915 = vset.pattern.permute.xlu1 %v8799_v26  ;;  %v6452_v17 = vpop.permute.xlu0 %1258 }
 0x21f   :  { %8825 = vst [vmem:[#allocation191_spill] sm:$0xff] %v6452_v17  ;;  %1262 = vperm.xlu1 %4915, %v8826_v46   ;;  %v6455_v14 = vpop.permute.xlu1 %1711 }
 0x220   :  { %1795 = vperm.xlu0 %4951, %v4980_v10   ;;  %v4982_v10 = vld [vmem:[%s8464_s0 + $0xc8] sm:$0xff] }
 0x222   :  { %v6460_v8 = vpop.permute.xlu0 %1266 }
 0x223   :  { %8827 = vst [vmem:[#allocation52_spill] sm:$0xff] %v6460_v8  ;;  %4916 = vset.pattern.permute.xlu1 %v8798_v50  ;;  %v6463_v20 = vpop.permute.xlu1 %1719 }
 0x224   :  { %1839 = vperm.xlu1 %4916, %v4981_v41   ;;  %1987 = vperm.xlu0 %4951, %v8735_v42  }
 0x226   :  { %v6469_v17 = vpop.permute.xlu0 %1274 }
 0x227   :  { %8828 = vst [vmem:[#allocation192_spill] sm:$0xff] %v6469_v17  ;;  %v6471_v16 = vpop.permute.xlu1 %1727 }
 0x228   :  { %2031 = vperm.xlu1 %4916, %v8744_v13   ;;  %1803 = vperm.xlu0 %4951, %v4982_v10   ;;  %v4983_v13 = vld [vmem:[%s8464_s0 + $0xd8] sm:$0xff]  ;;  %v8831_v10 = vld [vmem:[#allocation56_spill] sm:$0xff] }
 0x22a   :  { %v6477_v8 = vpop.permute.xlu0 %1282 }
 0x22b   :  { %8829 = vst [vmem:[#allocation193_spill] sm:$0xff] %v6477_v8  ;;  %v6479_v30 = vpop.permute.xlu1 %1735 }
 0x22c   :  { %2035 = vperm.xlu1 %4916, %v8826_v46   ;;  %1995 = vperm.xlu0 %4951, %v8737_v38   ;;  %v4984_v38 = vld [vmem:[%s8464_s0 + $0x120] sm:$0xff] }
 0x22e   :  { %v6483_v42 = vpop.permute.xlu0 %1290 }
 0x22f   :  { %8830 = vst [vmem:[#allocation194_spill] sm:$0xff] %v6483_v42  ;;  %v6485_v41 = vpop.permute.xlu1 %1743 }
 0x230   :  { %4917 = vset.pattern.permute.xlu1 %v8799_v26  ;;  %1811 = vperm.xlu0 %4951, %v4983_v13   ;;  %v4985_v13 = vld [vmem:[%s8464_s0 + $0xe0] sm:$0xff] }
 0x231   :  { %1270 = vperm.xlu1 %4917, %v8831_v10  }
 0x232   :  { %v6492_v8 = vpop.permute.xlu0 %1298 }
 0x233   :  { %8832 = vst [vmem:[#allocation56_spill] sm:$0xff] %v6492_v8  ;;  %v6494_v17 = vpop.permute.xlu1 %1751 }
 0x234   :  { %2003 = vperm.xlu0 %4951, %v8739_v34  }
 0x235   :  { %4918 = vset.pattern.permute.xlu1 %v8798_v50 }
 0x236   :  { %1847 = vperm.xlu1 %4918, %v4984_v38   ;;  %v6501_v46 = vpop.permute.xlu0 %1306 }
 0x237   :  { %8833 = vst [vmem:[#allocation195_spill] sm:$0xff] %v6501_v46  ;;  %v6503_v42 = vpop.permute.xlu1 %1759  ;;  %v6520_v46 = vld [vmem:[%s8465_s1 + $0x1] ss:$0 sm:$0xff] }
 0x238   :  { %1815 = vperm.xlu0 %4951, %v4985_v13   ;;  %v4986_v13 = vld [vmem:[%s8464_s0 + $0xf8] sm:$0xff] }
 0x23a   :  { %2039 = vperm.xlu1 %4918, %v8747_v61   ;;  %v6509_v8 = vpop.permute.xlu0 %1314  ;;  %v1511_v61 = vmul.f32 %v6520_v46, %v6396_v28  ;;  %v6542_v28 = vld [vmem:[%s8465_s1 + $0x2] ss:$0 sm:$0xff] }
 0x23b   :  { %8834 = vst [vmem:[#allocation196_spill] sm:$0xff] %v6509_v8  ;;  %v6511_v34 = vpop.permute.xlu1 %1767  ;;  %v8837_v8 = vld [vmem:[#allocation60_spill] sm:$0xff]  ;;  %v2219_v35 = vmul.f32 %v6542_v28, %v6448_v6 }
 0x23c   :  { %2007 = vperm.xlu0 %4951, %v8740_v27   ;;  %v6532_v27 = vld [vmem:[%s8465_s1] ss:$0 sm:$0xff] }
 0x23e   :  { %2043 = vperm.xlu1 %4918, %v8831_v10   ;;  %v6515_v38 = vpop.permute.xlu0 %1322  ;;  %v866_v10 = vmul.f32 %v6532_v27, %v5979_v58 }
 0x23f   :  { %8835 = vst [vmem:[#allocation197_spill] sm:$0xff] %v6515_v38  ;;  %v6522_v0 = vpop.permute.xlu1 %1775 }
 0x240   :  { %1827 = vperm.xlu0 %4951, %v4986_v13   ;;  %v1639_v60 = vadd.f32 %v1511_v61, %v866_v10  ;;  %v4988_v61 = vld [vmem:[%s8464_s0 + $0x130] sm:$0xff] }
 0x242   :  { %4919 = vset.pattern.permute.xlu1 %v8799_v26  ;;  %v6537_v38 = vpop.permute.xlu0 %1330 }
 0x243   :  { %8836 = vst [vmem:[#allocation198_spill] sm:$0xff] %v6537_v38  ;;  %1278 = vperm.xlu1 %4919, %v8837_v8   ;;  %v1968_v13 = vpop.permute.xlu1 %1967  ;;  %v6554_v38 = vld [vmem:[%s8466_s2] ss:$0 sm:$0xff] }
 0x244   :  { %v2284_v3 = vmul.f32 %v6542_v28, %v1968_v13  ;;  %1835 = vperm.xlu0 %4951, %v4987_v7  }
 0x246   :  { %v2412_v58 = vadd.f32 %v2284_v3, %v1639_v60  ;;  %v6549_v24 = vpop.permute.xlu0 %1338  ;;  %v4989_v60 = vld [vmem:[%s8464_s0 + $0x118] sm:$0xff] }
 0x247   :  { %8838 = vst [vmem:[#allocation60_spill] sm:$0xff] %v6549_v24  ;;  %4920 = vset.pattern.permute.xlu1 %v8798_v50  ;;  %v6557_v11 = vpop.permute.xlu1 %1783 }
 0x248   :  { %8839 = vst [vmem:[#allocation199_spill] sm:$0xff] %v6557_v11  ;;  %1855 = vperm.xlu1 %4920, %v4988_v61   ;;  %1843 = vperm.xlu0 %4951, %v4989_v60   ;;  %v2547_v3 = vadd.f32 %v6554_v38, %v2412_v58  ;;  %v4990_v61 = vld [vmem:[%s8464_s0 + $0x128] sm:$0xff]  ;;  %v4991_v58 = vld [vmem:[%s8464_s0 + $0x138] sm:$0xff]  ;;  %v1451_v11 = vmul.f32 %v6520_v46, %v6183_v44 }
 0x24a   :  { %v6566_v7 = vpop.permute.xlu0 %1346  ;;  %v2675_v10 = vmax.f32 %v2547_v3, 0.0 }
 0x24b   :  { %8840 = vst [vmem:[#allocation200_spill] sm:$0xff] %v6566_v7  ;;  %v6568_v13 = vpop.permute.xlu1 %1975 }
 0x24c   :  { %8841 = vst [vmem:[#allocation201_spill] sm:$0xff] %v6568_v13  ;;  %2047 = vperm.xlu1 %4920, %v8750_v4   ;;  %4778 = vmatprep.mubr.msk.f32.mxu1 %vm2748_vm0, %v2675_v10  ;;  %v4992_v10 = vld [vmem:[%s8464_s0 + $0x148] sm:$0xff]  ;;  %v8869_v13 = vld [vmem:[#allocation39_spill] sm:$0xff] }
 0x24d   :  { %1851 = vperm.xlu0 %4951, %v4990_v61   ;;  %v8846_v61 = vld [vmem:[#allocation64_spill] sm:$0xff]  ;;  %v6696_v62 = vmul.f32 %v6532_v27, %v8869_v13  ;;  %v8872_v13 = vld [vmem:[#allocation46_spill] sm:$0xff] }
 0x24e   :  { %v6575_v24 = vpop.permute.xlu0 %1354 }
 0x24f   :  { %8842 = vst [vmem:[#allocation202_spill] sm:$0xff] %v6575_v24  ;;  %v6577_v60 = vpop.permute.xlu1 %1791 }
 0x250   :  { %8843 = vst [vmem:[#allocation203_spill] sm:$0xff] %v6577_v60  ;;  %2051 = vperm.xlu1 %4920, %v8837_v8  }
 0x251   :  { %1859 = vperm.xlu0 %4951, %v4991_v58   ;;  %v4993_v58 = vld [vmem:[%s8464_s0 + $0x158] sm:$0xff] }
 0x252   :  { %v6583_v3 = vpop.permute.xlu0 %1362 }
 0x253   :  { %8844 = vst [vmem:[#allocation204_spill] sm:$0xff] %v6583_v3  ;;  %v6585_v4 = vpop.permute.xlu1 %1983  ;;  %v4994_v3 = vld [vmem:[%s8464_s0 + $0x140] sm:$0xff] }
 0x254   :  { %8845 = vst [vmem:[#allocation205_spill] sm:$0xff] %v6585_v4  ;;  %4921 = vset.pattern.permute.xlu1 %v8799_v26  ;;  %v8860_v4 = vld [vmem:[#allocation23_spill] sm:$0xff] }
 0x255   :  { %1867 = vperm.xlu0 %4951, %v4992_v10   ;;  %1286 = vperm.xlu1 %4921, %v8846_v61   ;;  %v4995_v61 = vld [vmem:[%s8464_s0 + $0x168] sm:$0xff]  ;;  %v804_v6 = vmul.f32 %v6532_v27, %v8860_v4  ;;  %v1449_v4 = vmul.f32 %v6520_v46, %v6177_v56 }
 0x256   :  { %v6592_v24 = vpop.permute.xlu0 %1370 }
 0x257   :  { %8847 = vst [vmem:[#allocation64_spill] sm:$0xff] %v6592_v24  ;;  %v6594_v8 = vpop.permute.xlu1 %1799 }
 0x258   :  { %8848 = vst [vmem:[#allocation206_spill] sm:$0xff] %v6594_v8  ;;  %v8858_v8 = vld [vmem:[#allocation18_spill] sm:$0xff] }
 0x259   :  { %1875 = vperm.xlu0 %4951, %v4993_v58   ;;  %4922 = vset.pattern.permute.xlu1 %v8798_v50  ;;  %v4996_v58 = vld [vmem:[%s8464_s0 + $0x2c0] sm:$0xff]  ;;  %v803_v9 = vmul.f32 %v6532_v27, %v8858_v8  ;;  %v4999_v8 = vld [vmem:[%s8464_s0 + $0x188] sm:$0xff] }
 0x25a   :  { %1863 = vperm.xlu1 %4922, %v4994_v3   ;;  %v6603_v7 = vpop.permute.xlu0 %1378  ;;  %v1446_v3 = vmul.f32 %v6520_v46, %v6165_v52 }
 0x25b   :  { %8849 = vst [vmem:[#allocation207_spill] sm:$0xff] %v6603_v7  ;;  %v6605_v10 = vpop.permute.xlu1 %1991  ;;  %v4997_v7 = vld [vmem:[%s8464_s0 + $0x178] sm:$0xff] }
 0x25c   :  { %8850 = vst [vmem:[#allocation208_spill] sm:$0xff] %v6605_v10  ;;  %v8855_v10 = vld [vmem:[#allocation19_spill] sm:$0xff] }
 0x25d   :  { %1883 = vperm.xlu0 %4951, %v4995_v61   ;;  %v1447_v61 = vmul.f32 %v6520_v46, %v6171_v54  ;;  %v801_v52 = vmul.f32 %v6532_v27, %v8855_v10  ;;  %v800_v54 = vmul.f32 %v6532_v27, %v8857_v48 }
 0x25e   :  { %2055 = vperm.xlu1 %4922, %v4996_v58   ;;  %v6613_v24 = vpop.permute.xlu0 %1386 }
 0x25f   :  { %8851 = vst [vmem:[#allocation209_spill] sm:$0xff] %v6613_v24  ;;  %v6615_v18 = vpop.permute.xlu1 %1807  ;;  %v8854_v24 = vld [vmem:[#allocation14_spill] sm:$0xff]  ;;  %v1574_v48 = vadd.f32 %v1446_v3, %v801_v52 }
 0x260   :  { %8852 = vst [vmem:[#allocation210_spill] sm:$0xff] %v6615_v18  ;;  %v802_v18 = vmul.f32 %v6532_v27, %v8854_v24  ;;  %v2220_v24 = vmul.f32 %v6542_v28, %v6455_v14  ;;  %v8863_v14 = vld [vmem:[#allocation30_spill] sm:$0xff] }
 0x261   :  { %1891 = vperm.xlu0 %4951, %v4997_v7   ;;  %v6660_v60 = vmul.f32 %v6532_v27, %v8863_v14  ;;  %v8865_v52 = vld [vmem:[#allocation34_spill] sm:$0xff]  ;;  %v2347_v1 = vadd.f32 %v2219_v35, %v1574_v48 }
 0x262   :  { %2059 = vperm.xlu1 %4922, %v4998_v5   ;;  %v6627_v58 = vpop.permute.xlu0 %1402  ;;  %v1445_v5 = vmul.f32 %v6520_v46, %v6167_v51  ;;  %v8862_v51 = vld [vmem:[#allocation27_spill] sm:$0xff]  ;;  %v8868_v35 = vld [vmem:[#allocation38_spill] sm:$0xff] }
 0x263   :  { %8853 = vst [vmem:[#allocation211_spill] sm:$0xff] %v6627_v58  ;;  %v6635_v7 = vpop.permute.xlu1 %1999  ;;  %v8859_v58 = vld [vmem:[#allocation22_spill] sm:$0xff]  ;;  %v806_v12 = vmul.f32 %v6532_v27, %v8862_v51  ;;  %v1448_v51 = vmul.f32 %v6520_v46, %v6173_v53  ;;  %v6688_v53 = vmul.f32 %v6532_v27, %v8867_v23  ;;  %v6692_v48 = vmul.f32 %v6532_v27, %v8868_v35 }
 0x264   :  { %8856 = vst [vmem:[#allocation14_spill] sm:$0xff] %v6635_v7  ;;  %v805_v10 = vmul.f32 %v6532_v27, %v8859_v58  ;;  %v6651_v7 = vmul.f32 %v6532_v27, %v8861_v22  ;;  %v1575_v58 = vadd.f32 %v1447_v61, %v802_v18  ;;  %v8864_v22 = vld [vmem:[#allocation31_spill] sm:$0xff]  ;;  %v1573_v61 = vadd.f32 %v1445_v5, %v800_v54  ;;  %v8870_v54 = vld [vmem:[#allocation42_spill] sm:$0xff] }
 0x265   :  { %1899 = vperm.xlu0 %4951, %v4999_v8   ;;  %v6667_v3 = vmul.f32 %v6532_v27, %v8864_v22  ;;  %v6671_v8 = vmul.f32 %v6532_v27, %v8865_v52  ;;  %v6678_v18 = vld [vmem:[%s8464_s0 + $0x2d8] sm:$0xff]  ;;  %v2222_v22 = vmul.f32 %v6542_v28, %v6463_v20  ;;  %v6700_v5 = vmul.f32 %v6532_v27, %v8870_v54 }
 0x266   :  { %4923 = vset.pattern.permute.xlu1 %v8799_v26  ;;  %v2348_v14 = vadd.f32 %v2220_v24, %v1575_v58  ;;  %v5001_v20 = vld [vmem:[%s8464_s0 + $0x198] sm:$0xff]  ;;  %v1577_v58 = vadd.f32 %v1449_v4, %v804_v6  ;;  %v1576_v54 = vadd.f32 %v1448_v51, %v803_v9  ;;  %v2482_v31 = vadd.f32 %v6554_v38, %v2347_v1  ;;  %v8875_v1 = vld [vmem:[#allocation50_spill] sm:$0xff] }
 0x267   :  { %1294 = vperm.xlu1 %4923, %v6678_v18   ;;  %v1704_v56 = vpop.permute.xlu0 %1703  ;;  %v8871_v24 = vld [vmem:[#allocation43_spill] sm:$0xff] }
 0x268   :  { %v2218_v52 = vmul.f32 %v6542_v28, %v1704_v56  ;;  %v6684_v43 = vpop.permute.xlu1 %1238  ;;  %v6707_v23 = vmul.f32 %v6532_v27, %v8871_v24  ;;  %v1450_v56 = vmul.f32 %v6520_v46, %v6179_v49  ;;  %v2483_v24 = vadd.f32 %v6554_v38, %v2348_v14  ;;  %v5002_v49 = vld [vmem:[%s8464_s0 + $0x150] sm:$0xff]  ;;  %v8874_v51 = vld [vmem:[#allocation47_spill] sm:$0xff] }
 0x269   :  { %8866 = vst [vmem:[#allocation19_spill] sm:$0xff] %v6684_v43  ;;  %1907 = vperm.xlu0 %4951, %v5001_v20   ;;  %v6713_v43 = vmul.f32 %v6532_v27, %v8872_v13  ;;  %v2350_v6 = vadd.f32 %v2222_v22, %v1577_v58  ;;  %v6727_v44 = vmul.f32 %v6532_v27, %v8874_v51  ;;  %v5003_v58 = vld [vmem:[%s8464_s0 + $0x1a8] sm:$0xff]  ;;  %v8879_v13 = vld [vmem:[#allocation54_spill] sm:$0xff] }
 0x26a   :  { %v2346_v35 = vadd.f32 %v2218_v52, %v1573_v61  ;;  %v6731_v61 = vmul.f32 %v6532_v27, %v8875_v1  ;;  %v8877_v52 = vld [vmem:[#allocation51_spill] sm:$0xff]  ;;  %v2224_v22 = vmul.f32 %v6542_v28, %v6471_v16  ;;  %v1453_v16 = vmul.f32 %v6520_v46, %v6189_v39 }
 0x26b   :  { %8873 = vst [vmem:[#allocation15_spill] sm:$0xff] %v6713_v43  ;;  %4924 = vset.pattern.permute.xlu1 %v8798_v50  ;;  %v1716_v20 = vpop.permute.xlu0 %1715  ;;  %v6735_v14 = vmul.f32 %v6532_v27, %v8877_v52  ;;  %v1452_v52 = vmul.f32 %v6520_v46, %v6185_v45  ;;  %v2610_v43 = vmax.f32 %v2482_v31, 0.0  ;;  %v2611_v15 = vmax.f32 %v2483_v24, 0.0  ;;  %v8882_v24 = vld [vmem:[#allocation59_spill] sm:$0xff] }
 0x26c   :  { %v2221_v4 = vmul.f32 %v6542_v28, %v1716_v20  ;;  %1871 = vperm.xlu1 %4924, %v5002_v49   ;;  %v2481_v9 = vadd.f32 %v6554_v38, %v2346_v35  ;;  %8876 = vst [vmem:[#allocation18_spill] sm:$0xff] %v6731_v61  ;;  %v6746_v20 = vmul.f32 %v6532_v27, %v8879_v13 }
 0x26d   :  { %1915 = vperm.xlu0 %4951, %v5003_v58   ;;  %v6742_v35 = vpop.permute.xlu1 %1819  ;;  %v1578_v49 = vadd.f32 %v1450_v56, %v805_v10  ;;  %v1579_v61 = vadd.f32 %v1451_v11, %v806_v12  ;;  %v2485_v58 = vadd.f32 %v6554_v38, %v2350_v6  ;;  %v5004_v10 = vld [vmem:[%s8464_s0 + $0x2d0] sm:$0xff]  ;;  %v8880_v11 = vld [vmem:[#allocation55_spill] sm:$0xff]  ;;  %v2226_v31 = vmul.f32 %v6542_v28, %v6479_v30 }
 0x26e   :  { %8878 = vst [vmem:[#allocation22_spill] sm:$0xff] %v6742_v35  ;;  %v2349_v51 = vadd.f32 %v2221_v4, %v1576_v54  ;;  %v2609_v1 = vmax.f32 %v2481_v9, 0.0  ;;  %v6761_v45 = vmul.f32 %v6532_v27, %v8880_v11  ;;  %v5005_v12 = vld [vmem:[%s8464_s0 + $0x1b8] sm:$0xff]  ;;  %v8881_v56 = vld [vmem:[#allocation58_spill] sm:$0xff]  ;;  %v6777_v6 = vmul.f32 %v6532_v27, %v8882_v24 }
 0x26f   :  { %v1724_v2 = vpop.permute.xlu0 %1723  ;;  %v2352_v39 = vadd.f32 %v2224_v22, %v1579_v61  ;;  %v6773_v54 = vmul.f32 %v6532_v27, %v8881_v56  ;;  %v8883_v30 = vld [vmem:[#allocation62_spill] sm:$0xff]  ;;  %v1580_v22 = vadd.f32 %v1452_v52, %v6651_v7  ;;  %v2613_v11 = vmax.f32 %v2485_v58, 0.0 }
 0x270   :  { %v2484_v35 = vadd.f32 %v6554_v38, %v2349_v51  ;;  %v2223_v13 = vmul.f32 %v6542_v28, %v1724_v2  ;;  %2063 = vperm.xlu1 %4924, %v5004_v10   ;;  %4679 = vmatprep.mubr.msk.f32.mxu0 %vm2748_vm0, %v2609_v1  ;;  %v6782_v61 = vmul.f32 %v6532_v27, %v8883_v30  ;;  %v8885_v52 = vld [vmem:[#allocation66_spill] sm:$0xff] }
 0x271   :  { %1923 = vperm.xlu0 %4951, %v5005_v12   ;;  %v6768_v2 = vpop.permute.xlu1 %2011  ;;  %4680 = vmatmul.mubr.msk.f32.vlgmr.msra.gmra.mxu0 %vm2748_vm0, %v2610_v43  ;;  %v1581_v43 = vadd.f32 %v1453_v16, %v6667_v3  ;;  %v1455_v51 = vmul.f32 %v6520_v46, %v6195_v37  ;;  %v1454_v10 = vmul.f32 %v6520_v46, %v6191_v47  ;;  %v5006_v37 = vld [vmem:[%s8464_s0 + $0x1c8] sm:$0xff]  ;;  %v8884_v47 = vld [vmem:[#allocation63_spill] sm:$0xff] }
 0x272   :  { %v2612_v4 = vmax.f32 %v2484_v35, 0.0  ;;  %v2351_v9 = vadd.f32 %v2223_v13, %v1578_v49  ;;  %4682 = vmatprep.mubr.msk.f32.mxu0 %vm2748_vm0, %v2611_v15  ;;  %v2487_v49 = vadd.f32 %v6554_v38, %v2352_v39  ;;  %v2228_v7 = vmul.f32 %v6542_v28, %v6485_v41  ;;  %v8886_v41 = vld [vmem:[#allocation67_spill] sm:$0xff]  ;;  %v8887_v12 = vld [vmem:[#allocation69_spill] sm:$0xff] }
 0x273   :  { %v1732_v1 = vpop.permute.xlu0 %1731  ;;  %v2354_v13 = vadd.f32 %v2226_v31, %v1581_v43  ;;  %v6802_v3 = vmul.f32 %v6532_v27, %v8884_v47  ;;  %v6813_v31 = vmul.f32 %v6532_v27, %v8886_v41  ;;  %v6817_v56 = vmul.f32 %v6532_v27, %v8887_v12  ;;  %v8891_v47 = vld [vmem:[#allocation75_spill] sm:$0xff] }
 0x274   :  { %v2486_v35 = vadd.f32 %v6554_v38, %v2351_v9  ;;  %v2225_v15 = vmul.f32 %v6542_v28, %v1732_v1  ;;  %2067 = vperm.xlu1 %4924, %v6678_v18   ;;  %v6806_v18 = vmul.f32 %v6532_v27, %v8885_v52  ;;  %v1583_v24 = vadd.f32 %v1455_v51, %v6688_v53 }
 0x275   :  { %1931 = vperm.xlu0 %4951, %v5006_v37   ;;  %4683 = vmatmul.mubr.msk.f32.gmra.mxu0 %vm2748_vm0, %v2612_v4  ;;  %v1457_v4 = vmul.f32 %v6520_v46, %v6201_v33  ;;  %v1582_v30 = vadd.f32 %v1454_v10, %v6660_v60  ;;  %v2230_v53 = vmul.f32 %v6542_v28, %v6494_v17  ;;  %v5007_v33 = vld [vmem:[%s8464_s0 + $0x1d8] sm:$0xff]  ;;  %v8888_v60 = vld [vmem:[#allocation70_spill] sm:$0xff]  ;;  %v8889_v10 = vld [vmem:[#allocation72_spill] sm:$0xff] }
 0x276   :  { %v2614_v16 = vmax.f32 %v2486_v35, 0.0  ;;  %v2353_v58 = vadd.f32 %v2225_v15, %v1580_v22  ;;  %v6808_v39 = vpop.permute.xlu1 %1246  ;;  %4685 = vmatprep.mubr.msk.f32.mxu0 %vm2748_vm0, %v2613_v11  ;;  %v1456_v22 = vmul.f32 %v6520_v46, %v6197_v40  ;;  %v2615_v11 = vmax.f32 %v2487_v49, 0.0  ;;  %v6837_v40 = vld [vmem:[%s8464_s0 + $0x2e8] sm:$0xff] }
 0x277   :  { %v1740_v9 = vpop.permute.xlu0 %1739  ;;  %v2489_v35 = vadd.f32 %v6554_v38, %v2354_v13  ;;  %v2356_v15 = vadd.f32 %v2228_v7, %v1583_v24  ;;  %v6842_v51 = vmul.f32 %v6532_v27, %v8888_v60  ;;  %v6846_v49 = vmul.f32 %v6532_v27, %v8889_v10  ;;  %v8890_v7 = vld [vmem:[#allocation73_spill] sm:$0xff] }
 0x278   :  { %v2488_v43 = vadd.f32 %v6554_v38, %v2353_v58  ;;  %v2227_v1 = vmul.f32 %v6542_v28, %v1740_v9  ;;  %4925 = vset.pattern.permute.xlu1 %v8799_v26  ;;  %v6851_v37 = vmul.f32 %v6532_v27, %v8890_v7  ;;  %v6855_v52 = vmul.f32 %v6532_v27, %v8891_v47  ;;  %v8895_v10 = vld [vmem:[#allocation81_spill] sm:$0xff] }
 0x279   :  { %1939 = vperm.xlu0 %4951, %v5007_v33   ;;  %1302 = vperm.xlu1 %4925, %v6837_v40   ;;  %v1585_v58 = vadd.f32 %v1457_v4, %v6696_v62  ;;  %v1459_v41 = vmul.f32 %v6520_v46, %v6207_v29  ;;  %v1458_v9 = vmul.f32 %v6520_v46, %v6203_v36  ;;  %v8894_v33 = vld [vmem:[#allocation79_spill] sm:$0xff] }
 0x27a   :  { %v2616_v17 = vmax.f32 %v2488_v43, 0.0  ;;  %v2355_v13 = vadd.f32 %v2227_v1, %v1582_v30  ;;  %4686 = vmatmul.mubr.msk.f32.gmra.mxu0 %vm2748_vm0, %v2614_v16  ;;  %v1584_v16 = vadd.f32 %v1456_v22, %v6671_v8  ;;  %v2617_v1 = vmax.f32 %v2489_v35, 0.0  ;;  %v8892_v8 = vld [vmem:[#allocation76_spill] sm:$0xff]  ;;  %v8893_v22 = vld [vmem:[#allocation78_spill] sm:$0xff] }
 0x27b   :  { %4688 = vmatprep.mubr.msk.f32.mxu0 %vm2748_vm0, %v2615_v11  ;;  %v6861_v12 = vpop.permute.xlu1 %1823  ;;  %v1748_v24 = vpop.permute.xlu0 %1747  ;;  %v2491_v62 = vadd.f32 %v6554_v38, %v2356_v15  ;;  %v2358_v4 = vadd.f32 %v2230_v53, %v1585_v58  ;;  %v2232_v29 = vmul.f32 %v6542_v28, %v6503_v42  ;;  %v5009_v11 = vld [vmem:[%s8464_s0 + $0x1e8] sm:$0xff]  ;;  %v6877_v36 = vmul.f32 %v6532_v27, %v8892_v8  ;;  %v5010_v42 = vld [vmem:[%s8464_s0 + $0x160] sm:$0xff] }
 0x27c   :  { %v2490_v30 = vadd.f32 %v6554_v38, %v2355_v13  ;;  %v2229_v43 = vmul.f32 %v6542_v28, %v1748_v24  ;;  %v6881_v35 = vmul.f32 %v6532_v27, %v8893_v22  ;;  %v6889_v60 = vmul.f32 %v6532_v27, %v8894_v33 }
 0x27d   :  { %1947 = vperm.xlu0 %4951, %v5009_v11   ;;  %4926 = vset.pattern.permute.xlu1 %v8798_v50  ;;  %v6893_v13 = vmul.f32 %v6532_v27, %v8895_v10  ;;  %v1587_v7 = vadd.f32 %v1459_v41, %v6707_v23  ;;  %v1461_v47 = vmul.f32 %v6520_v46, %v6213_v25  ;;  %v2619_v11 = vmax.f32 %v2491_v62, 0.0 }
 0x27e   :  { %v2618_v15 = vmax.f32 %v2490_v30, 0.0  ;;  %v2357_v53 = vadd.f32 %v2229_v43, %v1584_v16  ;;  %4689 = vmatmul.mubr.msk.f32.gmra.mxu0 %vm2748_vm0, %v2616_v17  ;;  %1879 = vperm.xlu1 %4926, %v5010_v42   ;;  %v1586_v24 = vadd.f32 %v1458_v9, %v6692_v48  ;;  %v1460_v16 = vmul.f32 %v6520_v46, %v6209_v32  ;;  %v8897_v48 = vld [vmem:[#allocation82_spill] sm:$0xff]  ;;  %v8898_v32 = vld [vmem:[#allocation84_spill] sm:$0xff] }
 0x27f   :  { %8896 = vst [vmem:[#allocation23_spill] sm:$0xff] %v6893_v13  ;;  %4691 = vmatprep.mubr.msk.f32.mxu0 %vm2748_vm0, %v2617_v1  ;;  %v6899_v17 = vpop.permute.xlu1 %2015  ;;  %v1756_v58 = vpop.permute.xlu0 %1755  ;;  %v2493_v23 = vadd.f32 %v6554_v38, %v2358_v4  ;;  %v2360_v41 = vadd.f32 %v2232_v29, %v1587_v7  ;;  %v2234_v25 = vmul.f32 %v6542_v28, %v6511_v34  ;;  %v5011_v1 = vld [vmem:[%s8464_s0 + $0x1f8] sm:$0xff]  ;;  %v5012_v34 = vld [vmem:[%s8464_s0 + $0x2e0] sm:$0xff]  ;;  %v8900_v4 = vld [vmem:[#allocation85_spill] sm:$0xff] }
 0x280   :  { %v2492_v30 = vadd.f32 %v6554_v38, %v2357_v53  ;;  %v2231_v43 = vmul.f32 %v6542_v28, %v1756_v58  ;;  %v6914_v9 = vmul.f32 %v6532_v27, %v8897_v48  ;;  %v6918_v8 = vmul.f32 %v6532_v27, %v8898_v32  ;;  %v8904_v48 = vld [vmem:[#allocation15_spill] sm:$0xff]  ;;  %v8929_v13 = vld [vmem:[#allocation206_spill] sm:$0xff] }
 0x281   :  { %1955 = vperm.xlu0 %4951, %v5011_v1   ;;  %v6926_v29 = vmul.f32 %v6532_v27, %v8900_v4  ;;  %v6930_v53 = vmul.f32 %v6532_v27, %v5977_v55  ;;  %v1589_v42 = vadd.f32 %v1461_v47, %v6727_v44  ;;  %v1463_v33 = vmul.f32 %v6520_v46, %v6220_v21 }
 0x282   :  { %8899 = vst [vmem:[#allocation26_spill] sm:$0xff] %v6918_v8  ;;  %v2620_v62 = vmax.f32 %v2492_v30, 0.0  ;;  %v2359_v22 = vadd.f32 %v2231_v43, %v1586_v24  ;;  %4692 = vmatmul.mubr.msk.f32.gmra.mxu0 %vm2748_vm0, %v2618_v15  ;;  %2071 = vperm.xlu1 %4926, %v5012_v34   ;;  %v1588_v7 = vadd.f32 %v1460_v16, %v6700_v5  ;;  %v2621_v30 = vmax.f32 %v2493_v23, 0.0  ;;  %v5013_v43 = vld [vmem:[%s8464_s0 + $0x208] sm:$0xff] }
 0x283   :  { %8901 = vst [vmem:[#allocation27_spill] sm:$0xff] %v6926_v29  ;;  %4694 = vmatprep.mubr.msk.f32.mxu0 %vm2748_vm0, %v2619_v11  ;;  %v6936_v15 = vpop.permute.xlu1 %2019  ;;  %v1764_v10 = vpop.permute.xlu0 %1763  ;;  %v1462_v58 = vmul.f32 %v6520_v46, %v6215_v19  ;;  %v2495_v44 = vadd.f32 %v6554_v38, %v2360_v41  ;;  %v2362_v47 = vadd.f32 %v2234_v25, %v1589_v42  ;;  %v8902_v41 = vld [vmem:[#allocation11_spill] sm:$0xff] }
 0x284   :  { %v2494_v24 = vadd.f32 %v6554_v38, %v2359_v22  ;;  %v2233_v55 = vmul.f32 %v6542_v28, %v1764_v10  ;;  %v2236_v21 = vmul.f32 %v6542_v28, %v6522_v0  ;;  %v6951_v5 = vmul.f32 %v6532_v27, %v5985_v57  ;;  %v8903_v57 = vld [vmem:[#allocation10_spill] sm:$0xff] }
 0x285   :  { %1963 = vperm.xlu0 %4951, %v5013_v43   ;;  %v868_v19 = vmul.f32 %v6532_v27, %v5987_v59  ;;  %v6959_v0 = vmul.f32 %v6532_v27, %v5991_v63  ;;  %v1591_v23 = vadd.f32 %v1463_v33, %v6735_v14  ;;  %v1464_v25 = vmul.f32 %v6520_v46, %v8902_v41  ;;  %v8906_v33 = vld [vmem:[#allocation199_spill] sm:$0xff] }
 0x286   :  { %v2622_v16 = vmax.f32 %v2494_v24, 0.0  ;;  %v2361_v11 = vadd.f32 %v2233_v55, %v1588_v7  ;;  %4695 = vmatmul.mubr.msk.f32.gmra.mxu0 %vm2748_vm0, %v2620_v62  ;;  %2075 = vperm.xlu1 %4926, %v6837_v40   ;;  %v1465_v1 = vmul.f32 %v6520_v46, %v8903_v57  ;;  %v1590_v32 = vadd.f32 %v1462_v58, %v8904_v48  ;;  %v8905_v62 = vld [vmem:[#allocation181_spill] sm:$0xff]  ;;  %v5014_v7 = vld [vmem:[%s8464_s0 + $0x398] sm:$0xff]  ;;  %v8907_v58 = vld [vmem:[#allocation120_spill] sm:$0xff] }
 0x287   :  { %4697 = vmatprep.mubr.msk.f32.mxu0 %vm2748_vm0, %v2621_v30  ;;  %v1772_v59 = vpop.permute.xlu0 %1771  ;;  %v1513_v40 = vmul.f32 %v6520_v46, %v8905_v62  ;;  %v2623_v14 = vmax.f32 %v2495_v44, 0.0  ;;  %v2497_v4 = vadd.f32 %v6554_v38, %v2362_v47  ;;  %v2364_v42 = vadd.f32 %v2236_v21, %v1591_v23  ;;  %v8908_v55 = vld [vmem:[#allocation121_spill] sm:$0xff]  ;;  %v8909_v47 = vld [vmem:[#allocation18_spill] sm:$0xff]  ;;  %v6998_v57 = vld [vmem:[%s8464_s0 + $0x2f8] sm:$0xff] }
 0x288   :  { %v2496_v22 = vadd.f32 %v6554_v38, %v2361_v11  ;;  %v2235_v63 = vmul.f32 %v6542_v28, %v1772_v59  ;;  %v6972_v34 = vpop.permute.xlu1 %1254  ;;  %v2238_v10 = vmul.f32 %v6542_v28, %v8906_v33  ;;  %v6982_v24 = vmul.f32 %v6532_v27, %v8907_v58  ;;  %v8910_v23 = vld [vmem:[#allocation201_spill] sm:$0xff]  ;;  %v5016_v33 = vld [vmem:[%s8464_s0 + $0x3a0] sm:$0xff]  ;;  %v8913_v58 = vld [vmem:[#allocation122_spill] sm:$0xff] }
 0x289   :  { %2163 = vperm.xlu0 %4951, %v5014_v7   ;;  %v6986_v30 = vmul.f32 %v6532_v27, %v8908_v55  ;;  %v1592_v21 = vadd.f32 %v1464_v25, %v8909_v47  ;;  %v1593_v11 = vadd.f32 %v1465_v1, %v6761_v45  ;;  %v2286_v41 = vmul.f32 %v6542_v28, %v8910_v23  ;;  %v8914_v47 = vld [vmem:[#allocation123_spill] sm:$0xff] }
 0x28a   :  { %v2624_v44 = vmax.f32 %v2496_v22, 0.0  ;;  %v2363_v43 = vadd.f32 %v2235_v63, %v1590_v32  ;;  %4698 = vmatmul.mubr.msk.f32.gmra.mxu0 %vm2748_vm0, %v2622_v16  ;;  %4927 = vset.pattern.permute.xlu1 %v8799_v26  ;;  %v8911_v16 = vld [vmem:[#allocation12_spill] sm:$0xff]  ;;  %v1641_v62 = vadd.f32 %v1513_v40, %v868_v19  ;;  %v2625_v22 = vmax.f32 %v2497_v4, 0.0 }
 0x28b   :  { %4700 = vmatprep.mubr.msk.f32.mxu0 %vm2748_vm0, %v2623_v14  ;;  %1310 = vperm.xlu1 %4927, %v6998_v57   ;;  %v1780_v59 = vpop.permute.xlu0 %1779  ;;  %v1467_v48 = vmul.f32 %v6520_v46, %v8911_v16  ;;  %v8912_v32 = vld [vmem:[#allocation180_spill] sm:$0xff]  ;;  %v2499_v63 = vadd.f32 %v6554_v38, %v2364_v42  ;;  %v2366_v14 = vadd.f32 %v2238_v10, %v1593_v11  ;;  %v8916_v11 = vld [vmem:[#allocation203_spill] sm:$0xff]  ;;  %v8917_v16 = vld [vmem:[#allocation13_spill] sm:$0xff] }
 0x28c   :  { %v1512_v25 = vmul.f32 %v6520_v46, %v8912_v32  ;;  %v2498_v45 = vadd.f32 %v6554_v38, %v2363_v43  ;;  %v2237_v1 = vmul.f32 %v6542_v28, %v1780_v59  ;;  %v7015_v55 = vmul.f32 %v6532_v27, %v8913_v58  ;;  %v8915_v4 = vld [vmem:[#allocation124_spill] sm:$0xff] }
 0x28d   :  { %2167 = vperm.xlu0 %4951, %v5016_v33   ;;  %v7011_v7 = vpop.permute.xlu1 %1831  ;;  %v7019_v43 = vmul.f32 %v6532_v27, %v8914_v47  ;;  %v7024_v42 = vmul.f32 %v6532_v27, %v8915_v4  ;;  %v2414_v10 = vadd.f32 %v2286_v41, %v1641_v62  ;;  %v2240_v23 = vmul.f32 %v6542_v28, %v8916_v11  ;;  %v5017_v41 = vld [vmem:[%s8464_s0 + $0x170] sm:$0xff]  ;;  %v8920_v4 = vld [vmem:[#allocation183_spill] sm:$0xff] }
 0x28e   :  { %v2626_v19 = vmax.f32 %v2498_v45, 0.0  ;;  %v2365_v40 = vadd.f32 %v2237_v1, %v1592_v21  ;;  %4701 = vmatmul.mubr.msk.f32.gmra.mxu0 %vm2748_vm0, %v2624_v44  ;;  %v1466_v32 = vmul.f32 %v6520_v46, %v8917_v16  ;;  %v1640_v21 = vadd.f32 %v1512_v25, %v6930_v53  ;;  %v8918_v1 = vld [vmem:[#allocation125_spill] sm:$0xff]  ;;  %v5018_v53 = vld [vmem:[%s8464_s0 + $0x3b8] sm:$0xff]  ;;  %v8919_v47 = vld [vmem:[#allocation126_spill] sm:$0xff] }
 0x28f   :  { %4703 = vmatprep.mubr.msk.f32.mxu0 %vm2748_vm0, %v2625_v22  ;;  %4928 = vset.pattern.permute.xlu1 %v8798_v50  ;;  %v1972_v59 = vpop.permute.xlu0 %1971  ;;  %v7040_v62 = vmul.f32 %v6532_v27, %v8918_v1  ;;  %v1595_v22 = vadd.f32 %v1467_v48, %v6777_v6  ;;  %v2627_v33 = vmax.f32 %v2499_v63, 0.0  ;;  %v2501_v58 = vadd.f32 %v6554_v38, %v2366_v14  ;;  %v8921_v6 = vld [vmem:[#allocation127_spill] sm:$0xff]  ;;  %v8922_v63 = vld [vmem:[#allocation182_spill] sm:$0xff] }
 0x290   :  { %v2500_v44 = vadd.f32 %v6554_v38, %v2365_v40  ;;  %v2285_v45 = vmul.f32 %v6542_v28, %v1972_v59  ;;  %1887 = vperm.xlu1 %4928, %v5017_v41   ;;  %v7051_v40 = vmul.f32 %v6532_v27, %v8919_v47  ;;  %v1515_v11 = vmul.f32 %v6520_v46, %v8920_v4  ;;  %v8923_v4 = vld [vmem:[#allocation205_spill] sm:$0xff] }
 0x291   :  { %2179 = vperm.xlu0 %4951, %v5018_v53   ;;  %v7047_v25 = vpop.permute.xlu1 %2023  ;;  %v7058_v48 = vmul.f32 %v6532_v27, %v8921_v6  ;;  %v1514_v14 = vmul.f32 %v6520_v46, %v8922_v63  ;;  %v2549_v41 = vadd.f32 %v6554_v38, %v2414_v10  ;;  %v2368_v1 = vadd.f32 %v2240_v23, %v1595_v22  ;;  %v8924_v6 = vld [vmem:[#allocation128_spill] sm:$0xff]  ;;  %v8925_v23 = vld [vmem:[#allocation129_spill] sm:$0xff] }
 0x292   :  { %v2628_v59 = vmax.f32 %v2500_v44, 0.0  ;;  %v2413_v16 = vadd.f32 %v2285_v45, %v1640_v21  ;;  %4704 = vmatmul.mubr.msk.f32.gmra.mxu0 %vm2748_vm0, %v2626_v19  ;;  %v1594_v47 = vadd.f32 %v1466_v32, %v6746_v20  ;;  %v2288_v21 = vmul.f32 %v6542_v28, %v8923_v4  ;;  %v5019_v45 = vld [vmem:[%s8464_s0 + $0x2f0] sm:$0xff]  ;;  %v8927_v20 = vld [vmem:[#allocation16_spill] sm:$0xff] }
 0x293   :  { %4706 = vmatprep.mubr.msk.f32.mxu0 %vm2748_vm0, %v2627_v33  ;;  %v1788_v53 = vpop.permute.xlu0 %1787  ;;  %v7074_v10 = vmul.f32 %v6532_v27, %v8924_v6  ;;  %v7078_v22 = vmul.f32 %v6532_v27, %v8925_v23  ;;  %v1469_v32 = vmul.f32 %v6520_v46, %v8927_v20  ;;  %v2629_v33 = vmax.f32 %v2501_v58, 0.0 }
 0x294   :  { %v2548_v19 = vadd.f32 %v6554_v38, %v2413_v16  ;;  %v2239_v44 = vmul.f32 %v6542_v28, %v1788_v53  ;;  %2079 = vperm.xlu1 %4928, %v5019_v45   ;;  %v5020_v16 = vld [vmem:[%s8464_s0 + $0x3c0] sm:$0xff]  ;;  %v8928_v53 = vld [vmem:[#allocation17_spill] sm:$0xff]  ;;  %v1643_v45 = vadd.f32 %v1515_v11, %v6982_v24  ;;  %v1642_v23 = vadd.f32 %v1514_v14, %v6951_v5  ;;  %v8930_v11 = vld [vmem:[#allocation130_spill] sm:$0xff] }
 0x295   :  { %8926 = vst [vmem:[#allocation30_spill] sm:$0xff] %v7078_v22  ;;  %2183 = vperm.xlu0 %4951, %v5020_v16   ;;  %v7085_v63 = vpop.permute.xlu1 %2027  ;;  %v1468_v4 = vmul.f32 %v6520_v46, %v8928_v53  ;;  %v2677_v20 = vmax.f32 %v2549_v41, 0.0  ;;  %v2503_v58 = vadd.f32 %v6554_v38, %v2368_v1  ;;  %v2242_v29 = vmul.f32 %v6542_v28, %v8929_v13  ;;  %v8931_v14 = vld [vmem:[#allocation48_spill] sm:$0xff]  ;;  %v5021_v41 = vld [vmem:[%s8464_s0 + $0x3d8] sm:$0xff] }
 0x296   :  { %v2676_v6 = vmax.f32 %v2548_v19, 0.0  ;;  %v2367_v8 = vadd.f32 %v2239_v44, %v1594_v47  ;;  %4707 = vmatmul.mubr.msk.f32.gmra.mxu0 %vm2748_vm0, %v2628_v59  ;;  %v2416_v22 = vadd.f32 %v2288_v21, %v1643_v45  ;;  %v7102_v5 = vmul.f32 %v6532_v27, %v8930_v11  ;;  %v8933_v1 = vld [vmem:[#allocation132_spill] sm:$0xff] }
 0x297   :  { %4709 = vmatprep.mubr.msk.f32.mxu0 %vm2748_vm0, %v2629_v33  ;;  %v1980_v16 = vpop.permute.xlu0 %1979  ;;  %v1597_v59 = vadd.f32 %v1469_v32, %v6802_v3  ;;  %v1517_v13 = vmul.f32 %v6520_v46, %v8931_v14  ;;  %v7117_v47 = vmul.f32 %v6532_v27, %v8933_v1  ;;  %v1596_v44 = vadd.f32 %v1468_v4, %v6773_v54  ;;  %v8934_v32 = vld [vmem:[#allocation184_spill] sm:$0xff]  ;;  %v8936_v54 = vld [vmem:[#allocation133_spill] sm:$0xff] }
 0x298   :  { %v2502_v53 = vadd.f32 %v6554_v38, %v2367_v8  ;;  %v2287_v24 = vmul.f32 %v6542_v28, %v1980_v16  ;;  %2083 = vperm.xlu1 %4928, %v6998_v57   ;;  %4779 = vmatmul.mubr.msk.f32.vlgmr.msra.gmra.mxu1 %vm2748_vm0, %v2676_v6  ;;  %v8932_v8 = vld [vmem:[#allocation131_spill] sm:$0xff]  ;;  %v1516_v33 = vmul.f32 %v6520_v46, %v8934_v32  ;;  %v8935_v6 = vld [vmem:[#allocation208_spill] sm:$0xff]  ;;  %v2631_v11 = vmax.f32 %v2503_v58, 0.0  ;;  %v7144_v58 = vld [vmem:[%s8464_s0 + $0x308] sm:$0xff] }
 0x299   :  { %2195 = vperm.xlu0 %4951, %v5021_v41   ;;  %4781 = vmatprep.mubr.msk.f32.mxu1 %vm2748_vm0, %v2677_v20  ;;  %v7113_v57 = vmul.f32 %v6532_v27, %v8932_v8  ;;  %v2370_v45 = vadd.f32 %v2242_v29, %v1597_v59  ;;  %v2290_v20 = vmul.f32 %v6542_v28, %v8935_v6  ;;  %v8938_v29 = vld [vmem:[#allocation20_spill] sm:$0xff]  ;;  %v8939_v59 = vld [vmem:[#allocation21_spill] sm:$0xff] }
 0x29a   :  { %v2630_v21 = vmax.f32 %v2502_v53, 0.0  ;;  %v2415_v3 = vadd.f32 %v2287_v24, %v1642_v23  ;;  %v7119_v19 = vpop.permute.xlu1 %1262  ;;  %v2551_v14 = vadd.f32 %v6554_v38, %v2416_v22  ;;  %v7133_v4 = vmul.f32 %v6532_v27, %v8936_v54  ;;  %v5022_v22 = vld [vmem:[%s8464_s0 + $0x3e0] sm:$0xff]  ;;  %v8940_v1 = vld [vmem:[#allocation25_spill] sm:$0xff]  ;;  %v8942_v54 = vld [vmem:[#allocation210_spill] sm:$0xff] }
 0x29b   :  { %v1796_v16 = vpop.permute.xlu0 %1795  ;;  %v1471_v23 = vmul.f32 %v6520_v46, %v8938_v29  ;;  %v1645_v24 = vadd.f32 %v1517_v13, %v7015_v55  ;;  %v1470_v8 = vmul.f32 %v6520_v46, %v8939_v59  ;;  %v8941_v13 = vld [vmem:[#allocation134_spill] sm:$0xff]  ;;  %v2505_v6 = vadd.f32 %v6554_v38, %v2370_v45 }
 0x29c   :  { %v2550_v41 = vadd.f32 %v6554_v38, %v2415_v3  ;;  %v2241_v53 = vmul.f32 %v6542_v28, %v1796_v16  ;;  %4929 = vset.pattern.permute.xlu1 %v8799_v26  ;;  %4710 = vmatmul.mubr.msk.f32.gmra.mxu0 %vm2748_vm0, %v2630_v21  ;;  %8937 = vst [vmem:[#allocation31_spill] sm:$0xff] %v7133_v4 }
 0x29d   :  { %2199 = vperm.xlu0 %4951, %v5022_v22   ;;  %1318 = vperm.xlu1 %4929, %v7144_v58   ;;  %v1472_v21 = vmul.f32 %v6520_v46, %v8940_v1  ;;  %v7154_v32 = vmul.f32 %v6532_v27, %v8941_v13  ;;  %v2418_v16 = vadd.f32 %v2290_v20, %v1645_v24  ;;  %v2679_v1 = vmax.f32 %v2551_v14, 0.0  ;;  %v8944_v20 = vld [vmem:[#allocation186_spill] sm:$0xff] }
 0x29e   :  { %v2678_v3 = vmax.f32 %v2550_v41, 0.0  ;;  %v2369_v55 = vadd.f32 %v2241_v53, %v1596_v44  ;;  %4712 = vmatprep.mubr.msk.f32.mxu0 %vm2748_vm0, %v2631_v11  ;;  %v2244_v29 = vmul.f32 %v6542_v28, %v8942_v54  ;;  %v1644_v4 = vadd.f32 %v1516_v33, %v6959_v0  ;;  %v8943_v41 = vld [vmem:[#allocation136_spill] sm:$0xff]  ;;  %v8945_v13 = vld [vmem:[#allocation14_spill] sm:$0xff] }
 0x29f   :  { %v7159_v22 = vpop.permute.xlu1 %1839  ;;  %v1988_v59 = vpop.permute.xlu0 %1987  ;;  %v7167_v53 = vmul.f32 %v6532_v27, %v8943_v41  ;;  %v1599_v45 = vadd.f32 %v1471_v23, %v6813_v31  ;;  %v1519_v24 = vmul.f32 %v6520_v46, %v8944_v20  ;;  %v1598_v0 = vadd.f32 %v1470_v8, %v6782_v61  ;;  %v5024_v27 = vld [vmem:[%s8464_s0 + $0x3d0] sm:$0xff]  ;;  %v5025_v61 = vld [vmem:[%s8464_s0 + $0x180] sm:$0xff] }
 0x2a0   :  { %v2504_v44 = vadd.f32 %v6554_v38, %v2369_v55  ;;  %v2289_v11 = vmul.f32 %v6542_v28, %v1988_v59  ;;  %4782 = vmatmul.mubr.msk.f32.gmra.mxu1 %vm2748_vm0, %v2678_v3  ;;  %v7176_v33 = vadd.f32 %v1472_v21, %v6806_v18  ;;  %v2633_v31 = vmax.f32 %v2505_v6, 0.0  ;;  %v8946_v8 = vld [vmem:[#allocation24_spill] sm:$0xff]  ;;  %v8947_v59 = vld [vmem:[#allocation185_spill] sm:$0xff] }
 0x2a1   :  { %4959 = vset.pattern.permute.xlu0 %v8799_v26  ;;  %4930 = vset.pattern.permute.xlu1 %v8798_v50  ;;  %v2553_v23 = vadd.f32 %v6554_v38, %v2418_v16  ;;  %v2372_v55 = vadd.f32 %v2244_v29, %v1599_v45  ;;  %v2292_v54 = vmul.f32 %v6542_v28, %v8945_v13  ;;  %v8950_v45 = vld [vmem:[#allocation33_spill] sm:$0xff]  ;;  %v8951_v13 = vld [vmem:[#allocation32_spill] sm:$0xff] }
 0x2a2   :  { %v2632_v14 = vmax.f32 %v2504_v44, 0.0  ;;  %v2417_v3 = vadd.f32 %v2289_v11, %v1644_v4  ;;  %1418 = vperm.xlu0 %4959, %v5024_v27   ;;  %4784 = vmatprep.mubr.msk.f32.mxu1 %vm2748_vm0, %v2679_v1  ;;  %v1473_v21 = vmul.f32 %v6520_v46, %v8946_v8  ;;  %v1518_v6 = vmul.f32 %v6520_v46, %v8947_v59  ;;  %v8948_v1 = vld [vmem:[#allocation29_spill] sm:$0xff]  ;;  %v8949_v11 = vld [vmem:[#allocation28_spill] sm:$0xff]  ;;  %v5026_v59 = vld [vmem:[%s8464_s0 + $0x3f0] sm:$0xff] }
 0x2a3   :  { %1895 = vperm.xlu1 %4930, %v5025_v61   ;;  %v7188_v18 = vpop.permute.xlu1 %2031  ;;  %v1804_v4 = vpop.permute.xlu0 %1803  ;;  %v1474_v44 = vmul.f32 %v6520_v46, %v8948_v1  ;;  %v1475_v41 = vmul.f32 %v6520_v46, %v8949_v11  ;;  %v1476_v20 = vmul.f32 %v6520_v46, %v8950_v45  ;;  %v1647_v27 = vadd.f32 %v1519_v24, %v7024_v42  ;;  %v8952_v61 = vld [vmem:[#allocation37_spill] sm:$0xff]  ;;  %v8953_v1 = vld [vmem:[#allocation36_spill] sm:$0xff] }
 0x2a4   :  { %v2552_v16 = vadd.f32 %v6554_v38, %v2417_v3  ;;  %v2243_v29 = vmul.f32 %v6542_v28, %v1804_v4  ;;  %4713 = vmatmul.mubr.msk.f32.gmra.mxu0 %vm2748_vm0, %v2632_v14  ;;  %v1477_v3 = vmul.f32 %v6520_v46, %v8951_v13  ;;  %v1478_v4 = vmul.f32 %v6520_v46, %v8952_v61 }
 0x2a5   :  { %4715 = vmatprep.mubr.msk.f32.mxu0 %vm2748_vm0, %v2633_v31  ;;  %v1479_v11 = vmul.f32 %v6520_v46, %v8953_v1  ;;  %v2681_v45 = vmax.f32 %v2553_v23, 0.0  ;;  %v2507_v42 = vadd.f32 %v6554_v38, %v2372_v55  ;;  %v2420_v24 = vadd.f32 %v2292_v54, %v1647_v27  ;;  %v5027_v31 = vld [vmem:[%s8464_s0 + $0x300] sm:$0xff]  ;;  %v8955_v1 = vld [vmem:[#allocation45_spill] sm:$0xff] }
 0x2a6   :  { %v2680_v14 = vmax.f32 %v2552_v16, 0.0  ;;  %v2371_v8 = vadd.f32 %v2243_v29, %v1598_v0  ;;  %1434 = vperm.xlu0 %4959, %v5026_v59   ;;  %v8954_v16 = vld [vmem:[#allocation41_spill] sm:$0xff]  ;;  %v1646_v61 = vadd.f32 %v1518_v6, %v6986_v30  ;;  %v7227_v55 = vadd.f32 %v1473_v21, %v6842_v51 }
 0x2a7   :  { %2087 = vperm.xlu1 %4930, %v5027_v31   ;;  %v7218_v13 = vpop.permute.xlu1 %2035  ;;  %v1996_v0 = vpop.permute.xlu0 %1995  ;;  %v1480_v29 = vmul.f32 %v6520_v46, %v8954_v16  ;;  %v1602_v54 = vadd.f32 %v1474_v44, %v6817_v56  ;;  %v1603_v27 = vadd.f32 %v1475_v41, %v6851_v37  ;;  %v1481_v31 = vmul.f32 %v6520_v46, %v8955_v1  ;;  %v8956_v56 = vld [vmem:[#allocation187_spill] sm:$0xff] }
 0x2a8   :  { %v2506_v59 = vadd.f32 %v6554_v38, %v2371_v8  ;;  %v2291_v23 = vmul.f32 %v6542_v28, %v1996_v0  ;;  %4785 = vmatmul.mubr.msk.f32.gmra.mxu1 %vm2748_vm0, %v2680_v14  ;;  %v7235_v30 = vadd.f32 %v1476_v20, %v6846_v49  ;;  %v7238_v6 = vadd.f32 %v1477_v3, %v6877_v36  ;;  %v5028_v36 = vld [vmem:[%s8464_s0 + $0x3f8] sm:$0xff]  ;;  %v8960_v0 = vld [vmem:[#allocation53_spill] sm:$0xff] }
 0x2a9   :  { %4787 = vmatprep.mubr.msk.f32.mxu1 %vm2748_vm0, %v2681_v45  ;;  %v7242_v51 = vadd.f32 %v1478_v4, %v6855_v52  ;;  %v1520_v37 = vmul.f32 %v6520_v46, %v8956_v56  ;;  %v2635_v21 = vmax.f32 %v2507_v42, 0.0  ;;  %v2555_v44 = vadd.f32 %v6554_v38, %v2420_v24  ;;  %v8957_v45 = vld [vmem:[#allocation49_spill] sm:$0xff] }
 0x2aa   :  { %v2634_v8 = vmax.f32 %v2506_v59, 0.0  ;;  %v2419_v14 = vadd.f32 %v2291_v23, %v1646_v61  ;;  %4963 = vset.pattern.permute.xlu0 %v8798_v50  ;;  %v7252_v41 = vadd.f32 %v1479_v11, %v6889_v60  ;;  %v7255_v52 = vadd.f32 %v1480_v29, %v6881_v35  ;;  %v8958_v60 = vld [vmem:[#allocation188_spill] sm:$0xff]  ;;  %v8959_v35 = vld [vmem:[#allocation189_spill] sm:$0xff]  ;;  %v8961_v29 = vld [vmem:[#allocation22_spill] sm:$0xff] }
 0x2ab   :  { %2091 = vperm.xlu1 %4930, %v7144_v58   ;;  %v1812_v49 = vpop.permute.xlu0 %1811  ;;  %2211 = vperm.xlu0 %4963, %v5028_v36   ;;  %v7263_v58 = vadd.f32 %v1481_v31, %v6914_v9  ;;  %v7267_v42 = vmul.f32 %v6520_v46, %v8957_v45  ;;  %v1521_v11 = vmul.f32 %v6520_v46, %v8958_v60  ;;  %v2683_v1 = vmax.f32 %v2555_v44, 0.0  ;;  %v8962_v31 = vld [vmem:[#allocation19_spill] sm:$0xff]  ;;  %v8965_v60 = vld [vmem:[#allocation52_spill] sm:$0xff] }
 0x2ac   :  { %v2554_v20 = vadd.f32 %v6554_v38, %v2419_v14  ;;  %v2245_v3 = vmul.f32 %v6542_v28, %v1812_v49  ;;  %v7259_v4 = vpop.permute.xlu1 %1270  ;;  %4716 = vmatmul.mubr.msk.f32.gmra.mxu0 %vm2748_vm0, %v2634_v8  ;;  %v1523_v24 = vmul.f32 %v6520_v46, %v8959_v35  ;;  %v7276_v16 = vmul.f32 %v6520_v46, %v8960_v0  ;;  %v8964_v44 = vld [vmem:[#allocation191_spill] sm:$0xff] }
 0x2ad   :  { %4718 = vmatprep.mubr.msk.f32.mxu0 %vm2748_vm0, %v2635_v21  ;;  %v2247_v9 = vmul.f32 %v6542_v28, %v8961_v29  ;;  %v1648_v23 = vadd.f32 %v1520_v37, %v7019_v43  ;;  %v1522_v8 = vmul.f32 %v6520_v46, %v8962_v31  ;;  %v2248_v14 = vmul.f32 %v6542_v28, %v6861_v12  ;;  %v8963_v21 = vld [vmem:[#allocation190_spill] sm:$0xff] }
 0x2ae   :  { %v2682_v61 = vmax.f32 %v2554_v20, 0.0  ;;  %v2373_v59 = vadd.f32 %v2245_v3, %v7176_v33  ;;  %v1525_v49 = vmul.f32 %v6520_v46, %v8963_v21  ;;  %v7293_v33 = vld [vmem:[%s8464_s0 + $0x318] sm:$0xff]  ;;  %v1649_v12 = vadd.f32 %v1521_v11, %v7051_v40 }
 0x2af   :  { %4931 = vset.pattern.permute.xlu1 %v8799_v26  ;;  %v2004_v56 = vpop.permute.xlu0 %2003  ;;  %v1651_v37 = vadd.f32 %v1523_v24, %v7074_v10  ;;  %v1527_v20 = vmul.f32 %v6520_v46, %v8964_v44  ;;  %v2295_v3 = vmul.f32 %v6542_v28, %v6768_v2  ;;  %v1529_v35 = vmul.f32 %v6520_v46, %v8965_v60 }
 0x2b0   :  { %v2508_v36 = vadd.f32 %v6554_v38, %v2373_v59  ;;  %1326 = vperm.xlu1 %4931, %v7293_v33   ;;  %v2293_v43 = vmul.f32 %v6542_v28, %v2004_v56  ;;  %4788 = vmatmul.mubr.msk.f32.gmra.mxu1 %vm2748_vm0, %v2682_v61  ;;  %v2375_v0 = vadd.f32 %v2247_v9, %v1602_v54 }
 0x2b1   :  { %v7304_v45 = vpop.permute.xlu1 %1847  ;;  %4790 = vmatprep.mubr.msk.f32.mxu1 %vm2748_vm0, %v2683_v1  ;;  %v1650_v40 = vadd.f32 %v1522_v8, %v7040_v62  ;;  %v1524_v10 = vmul.f32 %v6520_v46, %v6808_v39  ;;  %v2376_v11 = vadd.f32 %v2248_v14, %v1603_v27  ;;  %v2296_v24 = vmul.f32 %v6542_v28, %v6899_v17 }
 0x2b2   :  { %v2636_v29 = vmax.f32 %v2508_v36, 0.0  ;;  %v2421_v61 = vadd.f32 %v2293_v43, %v1648_v23  ;;  %v1653_v59 = vadd.f32 %v1525_v49, %v7102_v5  ;;  %v1655_v62 = vadd.f32 %v1527_v20, %v7117_v47  ;;  %v5030_v5 = vld [vmem:[%s8464_s0 + $0x190] sm:$0xff]  ;;  %v8966_v49 = vld [vmem:[#allocation192_spill] sm:$0xff] }
 0x2b3   :  { %v1816_v2 = vpop.permute.xlu0 %1815  ;;  %v2423_v9 = vadd.f32 %v2295_v3, %v1650_v40  ;;  %v2297_v39 = vmul.f32 %v6542_v28, %v6936_v15  ;;  %v2250_v17 = vmul.f32 %v6542_v28, %v7011_v7  ;;  %v7328_v23 = vadd.f32 %v1529_v35, %v7154_v32 }
 0x2b4   :  { %v2556_v1 = vadd.f32 %v6554_v38, %v2421_v61  ;;  %4932 = vset.pattern.permute.xlu1 %v8798_v50  ;;  %v2246_v54 = vmul.f32 %v6542_v28, %v1816_v2  ;;  %4719 = vmatmul.mubr.msk.f32.gmra.mxu0 %vm2748_vm0, %v2636_v29  ;;  %v2510_v31 = vadd.f32 %v6554_v38, %v2375_v0  ;;  %v8967_v61 = vld [vmem:[#allocation30_spill] sm:$0xff] }
 0x2b5   :  { %1903 = vperm.xlu1 %4932, %v5030_v5   ;;  %v2040_v27 = vpop.permute.xlu1 %2039  ;;  %v1652_v14 = vadd.f32 %v1524_v10, %v7058_v48  ;;  %v2511_v15 = vadd.f32 %v6554_v38, %v2376_v11  ;;  %v2424_v56 = vadd.f32 %v2296_v24, %v1651_v37  ;;  %v1526_v7 = vmul.f32 %v6520_v46, %v6972_v34 }
 0x2b6   :  { %v2684_v8 = vmax.f32 %v2556_v1, 0.0  ;;  %v2374_v47 = vadd.f32 %v2246_v54, %v7227_v55  ;;  %v7338_v36 = vmul.f32 %v6520_v46, %v8966_v49  ;;  %v2298_v32 = vmul.f32 %v6542_v28, %v7047_v25  ;;  %v5031_v46 = vld [vmem:[%s8464_s0 + $0x310] sm:$0xff]  ;;  %v7405_v49 = vld [vmem:[%s8464_s0 + $0x328] sm:$0xff] }
 0x2b7   :  { %v2008_v21 = vpop.permute.xlu0 %2007  ;;  %v2558_v48 = vadd.f32 %v6554_v38, %v2423_v9  ;;  %v2425_v37 = vadd.f32 %v2297_v39, %v1652_v14  ;;  %v2378_v44 = vadd.f32 %v2250_v17, %v7238_v6  ;;  %v2299_v34 = vmul.f32 %v6542_v28, %v7085_v63  ;;  %v7359_v63 = vld [vmem:[%s8465_s1 + $0x2] ss:$0 sm:$0xff] }
 0x2b8   :  { %v2509_v43 = vadd.f32 %v6554_v38, %v2374_v47  ;;  %v2294_v55 = vmul.f32 %v6542_v28, %v2008_v21  ;;  %4791 = vmatmul.mubr.msk.f32.gmra.mxu1 %vm2748_vm0, %v2684_v8  ;;  %v2638_v20 = vmax.f32 %v2510_v31, 0.0  ;;  %v2252_v3 = vmul.f32 %v6542_v28, %v7159_v22  ;;  %v7366_v28 = vld [vmem:[%s8465_s1 + $0x1] ss:$0 sm:$0xff]  ;;  %v7373_v22 = vld [vmem:[%s8466_s2] ss:$0 sm:$0xff] }
 0x2b9   :  { %2095 = vperm.xlu1 %4932, %v5031_v46   ;;  %v2044_v25 = vpop.permute.xlu1 %2043  ;;  %v2639_v0 = vmax.f32 %v2511_v15, 0.0  ;;  %v2559_v29 = vadd.f32 %v6554_v38, %v2424_v56  ;;  %v1654_v6 = vadd.f32 %v1526_v7, %v8967_v61  ;;  %v2300_v40 = vmul.f32 %v7359_v63, %v7188_v18 }
 0x2ba   :  { %v2637_v60 = vmax.f32 %v2509_v43, 0.0  ;;  %v2422_v35 = vadd.f32 %v2294_v55, %v1649_v12  ;;  %v2426_v11 = vadd.f32 %v2298_v32, %v1653_v59  ;;  %v1528_v38 = vmul.f32 %v7366_v28, %v7119_v19 }
 0x2bb   :  { %v1828_v10 = vpop.permute.xlu0 %1827  ;;  %v2686_v18 = vmax.f32 %v2558_v48, 0.0  ;;  %v2560_v2 = vadd.f32 %v7373_v22, %v2425_v37  ;;  %v2513_v59 = vadd.f32 %v7373_v22, %v2378_v44  ;;  %v2427_v1 = vadd.f32 %v2299_v34, %v1654_v6 }
 0x2bc   :  { %v2557_v12 = vadd.f32 %v7373_v22, %v2422_v35  ;;  %v2249_v24 = vmul.f32 %v7359_v63, %v1828_v10  ;;  %4721 = vmatprep.mubr.msk.f32.mxu0 %vm2748_vm0, %v2637_v60  ;;  %v2380_v19 = vadd.f32 %v2252_v3, %v7252_v41  ;;  %v2301_v54 = vmul.f32 %v7359_v63, %v7218_v13  ;;  %v8969_v60 = vld [vmem:[#allocation31_spill] sm:$0xff] }
 0x2bd   :  { %2099 = vperm.xlu1 %4932, %v7293_v33   ;;  %4722 = vmatmul.mubr.msk.f32.gmra.mxu0 %vm2748_vm0, %v2638_v20  ;;  %v2687_v5 = vmax.f32 %v2559_v29, 0.0  ;;  %v2428_v31 = vadd.f32 %v2300_v40, %v1655_v62  ;;  %v2254_v8 = vmul.f32 %v7359_v63, %v7304_v45  ;;  %v2302_v33 = vmul.f32 %v7359_v63, %v2040_v27  ;;  %v8968_v20 = vld [vmem:[#allocation27_spill] sm:$0xff]  ;;  %v5036_v40 = vld [vmem:[%s8464_s0 + $0x1a0] sm:$0xff] }
 0x2be   :  { %v2685_v9 = vmax.f32 %v2557_v12, 0.0  ;;  %v2377_v39 = vadd.f32 %v2249_v24, %v7235_v30  ;;  %v1279_v17 = vpop.permute.xlu1 %1278  ;;  %4724 = vmatprep.mubr.msk.f32.mxu0 %vm2748_vm0, %v2639_v0  ;;  %v2561_v14 = vadd.f32 %v7373_v22, %v2426_v11  ;;  %v1656_v41 = vadd.f32 %v1528_v38, %v7113_v57 }
 0x2bf   :  { %v1836_v47 = vpop.permute.xlu0 %1835  ;;  %v2688_v30 = vmax.f32 %v2560_v2, 0.0  ;;  %v2641_v56 = vmax.f32 %v2513_v59, 0.0  ;;  %v2562_v62 = vadd.f32 %v7373_v22, %v2427_v1  ;;  %v1530_v45 = vmul.f32 %v7366_v28, %v7259_v4  ;;  %v8971_v59 = vld [vmem:[#allocation57_spill] sm:$0xff] }
 0x2c0   :  { %v2512_v13 = vadd.f32 %v7373_v22, %v2377_v39  ;;  %v2251_v15 = vmul.f32 %v7359_v63, %v1836_v47  ;;  %4793 = vmatprep.mubr.msk.f32.mxu1 %vm2748_vm0, %v2685_v9  ;;  %v2515_v27 = vadd.f32 %v7373_v22, %v2380_v19  ;;  %v2429_v57 = vadd.f32 %v2301_v54, %v1656_v41  ;;  %v7447_v54 = vld [vmem:[%s8465_s1] ss:$0 sm:$0xff]  ;;  %v8972_v9 = vld [vmem:[#allocation135_spill] sm:$0xff] }
 0x2c1   :  { %4933 = vset.pattern.permute.xlu1 %v8799_v26  ;;  %4794 = vmatmul.mubr.msk.f32.gmra.mxu1 %vm2748_vm0, %v2686_v18  ;;  %v2563_v4 = vadd.f32 %v7373_v22, %v2428_v31  ;;  %v2382_v32 = vadd.f32 %v2254_v8, %v7263_v58  ;;  %v2430_v43 = vadd.f32 %v2302_v33, %v7328_v23  ;;  %v2690_v23 = vmax.f32 %v2562_v62, 0.0  ;;  %v8970_v18 = vld [vmem:[#allocation23_spill] sm:$0xff] }
 0x2c2   :  { %v2640_v7 = vmax.f32 %v2512_v13, 0.0  ;;  %v2379_v21 = vadd.f32 %v2251_v15, %v7242_v51  ;;  %1334 = vperm.xlu1 %4933, %v7405_v49   ;;  %4796 = vmatprep.mubr.msk.f32.mxu1 %vm2748_vm0, %v2687_v5  ;;  %v2303_v55 = vmul.f32 %v7359_v63, %v2044_v25  ;;  %v2689_v51 = vmax.f32 %v2561_v14, 0.0  ;;  %v5038_v14 = vld [vmem:[%s8464_s0 + $0x320] sm:$0xff] }
 0x2c3   :  { %v1856_v48 = vpop.permute.xlu1 %1855  ;;  %v1844_v37 = vpop.permute.xlu0 %1843  ;;  %v1611_v3 = vadd.f32 %v7276_v16, %v8968_v20  ;;  %v1659_v58 = vadd.f32 %v7338_v36, %v7167_v53  ;;  %v1658_v25 = vadd.f32 %v1530_v45, %v8969_v60  ;;  %v2643_v35 = vmax.f32 %v2515_v27, 0.0  ;;  %v8973_v45 = vld [vmem:[#allocation26_spill] sm:$0xff]  ;;  %v8975_v20 = vld [vmem:[#allocation87_spill] sm:$0xff]  ;;  %v8976_v60 = vld [vmem:[#allocation61_spill] sm:$0xff] }
 0x2c4   :  { %v2514_v44 = vadd.f32 %v7373_v22, %v2379_v21  ;;  %v2256_v34 = vmul.f32 %v7359_v63, %v1856_v48  ;;  %v2253_v46 = vmul.f32 %v7359_v63, %v1844_v37  ;;  %4725 = vmatmul.mubr.msk.f32.gmra.mxu0 %vm2748_vm0, %v2640_v7  ;;  %v2564_v0 = vadd.f32 %v7373_v22, %v2429_v57 }
 0x2c5   :  { %4727 = vmatprep.mubr.msk.f32.mxu0 %vm2748_vm0, %v2641_v56  ;;  %4797 = vmatmul.mubr.msk.f32.gmra.mxu1 %vm2748_vm0, %v2688_v30  ;;  %v2691_v16 = vmax.f32 %v2563_v4, 0.0  ;;  %v2517_v53 = vadd.f32 %v7373_v22, %v2382_v32  ;;  %v2565_v36 = vadd.f32 %v7373_v22, %v2430_v43  ;;  %v2431_v6 = vadd.f32 %v2303_v55, %v1658_v25  ;;  %v8974_v4 = vld [vmem:[#allocation65_spill] sm:$0xff] }
 0x2c6   :  { %v2642_v29 = vmax.f32 %v2514_v44, 0.0  ;;  %v2381_v61 = vadd.f32 %v2253_v46, %v7255_v52  ;;  %4934 = vset.pattern.permute.xlu1 %v8798_v50  ;;  %4799 = vmatprep.mubr.msk.f32.mxu1 %vm2748_vm0, %v2689_v51  ;;  %v1532_v11 = vmul.f32 %v7366_v28, %v1279_v17  ;;  %v2384_v38 = vadd.f32 %v2256_v34, %v1611_v3 }
 0x2c7   :  { %1911 = vperm.xlu1 %4934, %v5036_v40   ;;  %v2048_v10 = vpop.permute.xlu1 %2047  ;;  %v1610_v2 = vadd.f32 %v7267_v42, %v8970_v18  ;;  %v1484_v1 = vmul.f32 %v7366_v28, %v8971_v59  ;;  %v887_v39 = vmul.f32 %v7447_v54, %v8972_v9  ;;  %v2692_v17 = vmax.f32 %v2564_v0, 0.0  ;;  %v8978_v40 = vld [vmem:[#allocation193_spill] sm:$0xff]  ;;  %v5040_v18 = vld [vmem:[%s8464_s0 + $0x1b0] sm:$0xff] }
 0x2c8   :  { %v2516_v52 = vadd.f32 %v7373_v22, %v2381_v61  ;;  %v2304_v12 = vmul.f32 %v7359_v63, %v2048_v10  ;;  %v1852_v24 = vpop.permute.xlu0 %1851  ;;  %4728 = vmatmul.mubr.msk.f32.gmra.mxu0 %vm2748_vm0, %v2642_v29  ;;  %v2645_v31 = vmax.f32 %v2517_v53, 0.0  ;;  %v2693_v8 = vmax.f32 %v2565_v36, 0.0  ;;  %v8977_v29 = vld [vmem:[#allocation88_spill] sm:$0xff] }
 0x2c9   :  { %v2255_v19 = vmul.f32 %v7359_v63, %v1852_v24  ;;  %4730 = vmatprep.mubr.msk.f32.mxu0 %vm2748_vm0, %v2643_v35  ;;  %4800 = vmatmul.mubr.msk.f32.gmra.mxu1 %vm2748_vm0, %v2690_v23  ;;  %v2566_v33 = vadd.f32 %v7373_v22, %v2431_v6  ;;  %v1660_v13 = vadd.f32 %v1532_v11, %v887_v39  ;;  %v8980_v39 = vld [vmem:[#allocation137_spill] sm:$0xff] }
 0x2ca   :  { %v2644_v5 = vmax.f32 %v2516_v52, 0.0  ;;  %v2432_v42 = vadd.f32 %v2304_v12, %v1659_v58  ;;  %4802 = vmatprep.mubr.msk.f32.mxu1 %vm2748_vm0, %v2691_v16  ;;  %v2519_v15 = vadd.f32 %v7373_v22, %v2384_v38  ;;  %v1612_v27 = vadd.f32 %v1484_v1, %v8973_v45  ;;  %v5039_v16 = vld [vmem:[%s8464_s0 + $0x338] sm:$0xff]  ;;  %v8979_v38 = vld [vmem:[#allocation138_spill] sm:$0xff] }
 0x2cb   :  { %v2383_v47 = vadd.f32 %v2255_v19, %v1610_v2  ;;  %2103 = vperm.xlu1 %4934, %v5038_v14   ;;  %v2052_v41 = vpop.permute.xlu1 %2051  ;;  %v1486_v32 = vmul.f32 %v7366_v28, %v8974_v4  ;;  %v2694_v43 = vmax.f32 %v2566_v33, 0.0  ;;  %v841_v3 = vmul.f32 %v7447_v54, %v8975_v20  ;;  %v8983_v4 = vld [vmem:[#allocation68_spill] sm:$0xff]  ;;  %v8985_v20 = vld [vmem:[#allocation194_spill] sm:$0xff] }
 0x2cc   :  { %v2567_v30 = vadd.f32 %v7373_v22, %v2432_v42  ;;  %v2305_v56 = vmul.f32 %v7359_v63, %v2052_v41  ;;  %v1860_v62 = vpop.permute.xlu0 %1859  ;;  %4731 = vmatmul.mubr.msk.f32.gmra.mxu0 %vm2748_vm0, %v2644_v5  ;;  %v2647_v37 = vmax.f32 %v2519_v15, 0.0  ;;  %v840_v61 = vmul.f32 %v7447_v54, %v8977_v29 }
 0x2cd   :  { %v2518_v57 = vadd.f32 %v7373_v22, %v2383_v47  ;;  %v2257_v7 = vmul.f32 %v7359_v63, %v1860_v62  ;;  %4733 = vmatprep.mubr.msk.f32.mxu0 %vm2748_vm0, %v2645_v31  ;;  %4803 = vmatmul.mubr.msk.f32.gmra.mxu1 %vm2748_vm0, %v2692_v17  ;;  %v1614_v35 = vadd.f32 %v1486_v32, %v841_v3 }
 0x2ce   :  { %v2433_v21 = vadd.f32 %v2305_v56, %v1660_v13  ;;  %4805 = vmatprep.mubr.msk.f32.mxu1 %vm2748_vm0, %v2693_v8  ;;  %v2695_v51 = vmax.f32 %v2567_v30, 0.0  ;;  %v1533_v10 = vmul.f32 %v7366_v28, %v8978_v40  ;;  %v888_v52 = vmul.f32 %v7447_v54, %v8979_v38  ;;  %v5041_v8 = vld [vmem:[%s8464_s0 + $0x330] sm:$0xff]  ;;  %v8981_v56 = vld [vmem:[#allocation71_spill] sm:$0xff]  ;;  %v5044_v38 = vld [vmem:[%s8464_s0 + $0x340] sm:$0xff] }
 0x2cf   :  { %v2646_v55 = vmax.f32 %v2518_v57, 0.0  ;;  %v2385_v48 = vadd.f32 %v2257_v7, %v1612_v27  ;;  %2107 = vperm.xlu1 %4934, %v7405_v49   ;;  %v1485_v49 = vmul.f32 %v7366_v28, %v8976_v60  ;;  %v889_v17 = vmul.f32 %v7447_v54, %v8980_v39  ;;  %v8982_v57 = vld [vmem:[#allocation90_spill] sm:$0xff] }
 0x2d0   :  { %v2568_v44 = vadd.f32 %v7373_v22, %v2433_v21  ;;  %v1868_v34 = vpop.permute.xlu0 %1867  ;;  %v1287_v46 = vpop.permute.xlu1 %1286  ;;  %v1661_v59 = vadd.f32 %v1533_v10, %v888_v52  ;;  %v1488_v62 = vmul.f32 %v7366_v28, %v8981_v56  ;;  %v843_v7 = vmul.f32 %v7447_v54, %v8982_v57 }
 0x2d1   :  { %v2520_v58 = vadd.f32 %v7373_v22, %v2385_v48  ;;  %v2259_v23 = vmul.f32 %v7359_v63, %v1868_v34  ;;  %4734 = vmatmul.mubr.msk.f32.gmra.mxu0 %vm2748_vm0, %v2646_v55  ;;  %4806 = vmatmul.mubr.msk.f32.gmra.mxu1 %vm2748_vm0, %v2694_v43  ;;  %v1613_v6 = vadd.f32 %v1485_v49, %v840_v61  ;;  %v8984_v48 = vld [vmem:[#allocation91_spill] sm:$0xff] }
 0x2d2   :  { %v2696_v25 = vmax.f32 %v2568_v44, 0.0  ;;  %4736 = vmatprep.mubr.msk.f32.mxu0 %vm2748_vm0, %v2647_v37  ;;  %4808 = vmatprep.mubr.msk.f32.mxu1 %vm2748_vm0, %v2695_v51  ;;  %v1534_v1 = vmul.f32 %v7366_v28, %v1287_v46  ;;  %v1487_v32 = vmul.f32 %v7366_v28, %v8983_v4  ;;  %v1616_v55 = vadd.f32 %v1488_v62, %v843_v7  ;;  %v5042_v51 = vld [vmem:[%s8464_s0 + $0x348] sm:$0xff]  ;;  %v8993_v7 = vld [vmem:[#allocation142_spill] sm:$0xff] }
 0x2d3   :  { %v2648_v0 = vmax.f32 %v2520_v58, 0.0  ;;  %4935 = vset.pattern.permute.xlu1 %v8799_v26  ;;  %v2387_v53 = vadd.f32 %v2259_v23, %v1614_v35  ;;  %v842_v37 = vmul.f32 %v7447_v54, %v8984_v48  ;;  %v1535_v3 = vmul.f32 %v7366_v28, %v8985_v20  ;;  %v8986_v23 = vld [vmem:[#allocation140_spill] sm:$0xff] }
 0x2d4   :  { %1342 = vperm.xlu1 %4935, %v5039_v16   ;;  %v1662_v47 = vadd.f32 %v1534_v1, %v889_v17  ;;  %v1876_v13 = vpop.permute.xlu0 %1875  ;;  %v890_v60 = vmul.f32 %v7447_v54, %v8986_v23  ;;  %v5043_v35 = vld [vmem:[%s8464_s0 + $0x1c0] sm:$0xff]  ;;  %v5047_v23 = vld [vmem:[%s8464_s0 + $0x350] sm:$0xff] }
 0x2d5   :  { %4737 = vmatmul.mubr.msk.f32.gmra.mxu0 %vm2748_vm0, %v2648_v0  ;;  %v1864_v36 = vpop.permute.xlu1 %1863  ;;  %4809 = vmatmul.mubr.msk.f32.gmra.mxu1 %vm2748_vm0, %v2696_v25  ;;  %v2522_v24 = vadd.f32 %v7373_v22, %v2387_v53  ;;  %v2261_v21 = vmul.f32 %v7359_v63, %v1876_v13  ;;  %v1615_v46 = vadd.f32 %v1487_v32, %v842_v37 }
 0x2d6   :  { %v2258_v11 = vmul.f32 %v7359_v63, %v1864_v36  ;;  %v1663_v29 = vadd.f32 %v1535_v3, %v890_v60  ;;  %v8987_v36 = vld [vmem:[#allocation139_spill] sm:$0xff] }
 0x2d7   :  { %v2650_v31 = vmax.f32 %v2522_v24, 0.0  ;;  %v2389_v44 = vadd.f32 %v2261_v21, %v1616_v55  ;;  %v892_v21 = vmul.f32 %v7447_v54, %v8993_v7  ;;  %v5050_v7 = vld [vmem:[%s8464_s0 + $0x360] sm:$0xff] }
 0x2d8   :  { %v2386_v12 = vadd.f32 %v2258_v11, %v1613_v6  ;;  %4936 = vset.pattern.permute.xlu1 %v8798_v50  ;;  %v891_v6 = vmul.f32 %v7447_v54, %v8987_v36 }
 0x2d9   :  { %1919 = vperm.xlu1 %4936, %v5040_v18   ;;  %v2056_v2 = vpop.permute.xlu1 %2055  ;;  %v2524_v25 = vadd.f32 %v7373_v22, %v2389_v44 }
 0x2da   :  { %v2521_v19 = vadd.f32 %v7373_v22, %v2386_v12  ;;  %v2306_v9 = vmul.f32 %v7359_v63, %v2056_v2  ;;  %v1884_v2 = vpop.permute.xlu0 %1883 }
 0x2db   :  { %v2652_v11 = vmax.f32 %v2524_v25, 0.0 }
 0x2dc   :  { %v2649_v5 = vmax.f32 %v2521_v19, 0.0  ;;  %v2434_v42 = vadd.f32 %v2306_v9, %v1661_v59  ;;  %v8988_v19 = vld [vmem:[#allocation77_spill] sm:$0xff] }
 0x2dd   :  { %2111 = vperm.xlu1 %4936, %v5041_v8   ;;  %v2060_v33 = vpop.permute.xlu1 %2059  ;;  %v1490_v9 = vmul.f32 %v7366_v28, %v8988_v19  ;;  %v8990_v8 = vld [vmem:[#allocation74_spill] sm:$0xff] }
 0x2de   :  { %v2569_v14 = vadd.f32 %v7373_v22, %v2434_v42  ;;  %v2307_v41 = vmul.f32 %v7359_v63, %v2060_v33  ;;  %4739 = vmatprep.mubr.msk.f32.mxu0 %vm2748_vm0, %v2649_v5  ;;  %v8989_v5 = vld [vmem:[#allocation93_spill] sm:$0xff]  ;;  %v1489_v33 = vmul.f32 %v7366_v28, %v8990_v8 }
 0x2df   :  { %4740 = vmatmul.mubr.msk.f32.gmra.mxu0 %vm2748_vm0, %v2650_v31  ;;  %v845_v42 = vmul.f32 %v7447_v54, %v8989_v5  ;;  %v2263_v31 = vmul.f32 %v7359_v63, %v1884_v2 }
 0x2e0   :  { %v2697_v15 = vmax.f32 %v2569_v14, 0.0  ;;  %v2435_v30 = vadd.f32 %v2307_v41, %v1662_v47  ;;  %v8991_v41 = vld [vmem:[#allocation94_spill] sm:$0xff] }
 0x2e1   :  { %2115 = vperm.xlu1 %4936, %v5039_v16   ;;  %v1618_v14 = vadd.f32 %v1490_v9, %v845_v42  ;;  %v844_v13 = vmul.f32 %v7447_v54, %v8991_v41  ;;  %v9000_v42 = vld [vmem:[#allocation144_spill] sm:$0xff] }
 0x2e2   :  { %v2570_v45 = vadd.f32 %v7373_v22, %v2435_v30  ;;  %v1295_v27 = vpop.permute.xlu1 %1294  ;;  %4811 = vmatprep.mubr.msk.f32.mxu1 %vm2748_vm0, %v2697_v15  ;;  %v5045_v15 = vld [vmem:[%s8464_s0 + $0x358] sm:$0xff] }
 0x2e3   :  { %v1536_v61 = vmul.f32 %v7366_v28, %v1295_v27  ;;  %v2391_v30 = vadd.f32 %v2263_v31, %v1618_v14  ;;  %v1617_v62 = vadd.f32 %v1489_v33, %v844_v13  ;;  %v894_v31 = vmul.f32 %v7447_v54, %v9000_v42 }
 0x2e4   :  { %v2698_v43 = vmax.f32 %v2570_v45, 0.0  ;;  %v8992_v45 = vld [vmem:[#allocation56_spill] sm:$0xff] }
 0x2e5   :  { %4937 = vset.pattern.permute.xlu1 %v8799_v26  ;;  %v1664_v12 = vadd.f32 %v1536_v61, %v891_v6  ;;  %v1537_v27 = vmul.f32 %v7366_v28, %v8992_v45  ;;  %v2526_v32 = vadd.f32 %v7373_v22, %v2391_v30 }
 0x2e6   :  { %1350 = vperm.xlu1 %4937, %v5042_v51   ;;  %4812 = vmatmul.mubr.msk.f32.gmra.mxu1 %vm2748_vm0, %v2698_v43  ;;  %v5046_v43 = vld [vmem:[%s8464_s0 + $0x1d0] sm:$0xff] }
 0x2e7   :  { %v1872_v34 = vpop.permute.xlu1 %1871  ;;  %v1665_v48 = vadd.f32 %v1537_v27, %v892_v21 }
 0x2e8   :  { %v2260_v58 = vmul.f32 %v7359_v63, %v1872_v34  ;;  %v8994_v34 = vld [vmem:[#allocation141_spill] sm:$0xff] }
 0x2ea   :  { %v2388_v49 = vadd.f32 %v2260_v58, %v1615_v46  ;;  %4938 = vset.pattern.permute.xlu1 %v8798_v50  ;;  %v893_v46 = vmul.f32 %v7447_v54, %v8994_v34  ;;  %v2654_v58 = vmax.f32 %v2526_v32, 0.0 }
 0x2eb   :  { %1927 = vperm.xlu1 %4938, %v5043_v35   ;;  %v2064_v0 = vpop.permute.xlu1 %2063 }
 0x2ec   :  { %v2523_v16 = vadd.f32 %v7373_v22, %v2388_v49  ;;  %v2308_v53 = vmul.f32 %v7359_v63, %v2064_v0  ;;  %v1892_v0 = vpop.permute.xlu0 %1891 }
 0x2ee   :  { %v2651_v40 = vmax.f32 %v2523_v16, 0.0  ;;  %v2436_v10 = vadd.f32 %v2308_v53, %v1663_v29  ;;  %v8995_v16 = vld [vmem:[#allocation83_spill] sm:$0xff] }
 0x2ef   :  { %2119 = vperm.xlu1 %4938, %v5044_v38   ;;  %v2068_v52 = vpop.permute.xlu1 %2067  ;;  %v1492_v53 = vmul.f32 %v7366_v28, %v8995_v16  ;;  %v8997_v38 = vld [vmem:[#allocation80_spill] sm:$0xff] }
 0x2f0   :  { %v2571_v24 = vadd.f32 %v7373_v22, %v2436_v10  ;;  %v2309_v18 = vmul.f32 %v7359_v63, %v2068_v52  ;;  %4742 = vmatprep.mubr.msk.f32.mxu0 %vm2748_vm0, %v2651_v40  ;;  %v8996_v40 = vld [vmem:[#allocation96_spill] sm:$0xff]  ;;  %v1491_v52 = vmul.f32 %v7366_v28, %v8997_v38 }
 0x2f1   :  { %4743 = vmatmul.mubr.msk.f32.gmra.mxu0 %vm2748_vm0, %v2652_v11  ;;  %v847_v10 = vmul.f32 %v7447_v54, %v8996_v40  ;;  %v2265_v11 = vmul.f32 %v7359_v63, %v1892_v0  ;;  %v9005_v0 = vld [vmem:[#allocation100_spill] sm:$0xff] }
 0x2f2   :  { %v2699_v59 = vmax.f32 %v2571_v24, 0.0  ;;  %v2437_v1 = vadd.f32 %v2309_v18, %v1664_v12  ;;  %v8998_v18 = vld [vmem:[#allocation97_spill] sm:$0xff] }
 0x2f3   :  { %2123 = vperm.xlu1 %4938, %v5042_v51   ;;  %v1620_v24 = vadd.f32 %v1492_v53, %v847_v10  ;;  %v846_v2 = vmul.f32 %v7447_v54, %v8998_v18  ;;  %v9007_v10 = vld [vmem:[#allocation146_spill] sm:$0xff] }
 0x2f4   :  { %v2572_v39 = vadd.f32 %v7373_v22, %v2437_v1  ;;  %v1303_v17 = vpop.permute.xlu1 %1302  ;;  %4814 = vmatprep.mubr.msk.f32.mxu1 %vm2748_vm0, %v2699_v59  ;;  %v5048_v59 = vld [vmem:[%s8464_s0 + $0x368] sm:$0xff] }
 0x2f5   :  { %v1538_v37 = vmul.f32 %v7366_v28, %v1303_v17  ;;  %v2393_v1 = vadd.f32 %v2265_v11, %v1620_v24  ;;  %v1619_v9 = vadd.f32 %v1491_v52, %v846_v2  ;;  %v896_v11 = vmul.f32 %v7447_v54, %v9007_v10  ;;  %v5052_v52 = vld [vmem:[%s8464_s0 + $0x1f0] sm:$0xff] }
 0x2f6   :  { %v2700_v47 = vmax.f32 %v2572_v39, 0.0  ;;  %v8999_v39 = vld [vmem:[#allocation195_spill] sm:$0xff] }
 0x2f7   :  { %4939 = vset.pattern.permute.xlu1 %v8799_v26  ;;  %v1666_v49 = vadd.f32 %v1538_v37, %v893_v46  ;;  %v1539_v17 = vmul.f32 %v7366_v28, %v8999_v39  ;;  %v2528_v33 = vadd.f32 %v7373_v22, %v2393_v1  ;;  %v1900_v37 = vpop.permute.xlu0 %1899 }
 0x2f8   :  { %1358 = vperm.xlu1 %4939, %v5045_v15   ;;  %4815 = vmatmul.mubr.msk.f32.gmra.mxu1 %vm2748_vm0, %v2700_v47  ;;  %v5049_v47 = vld [vmem:[%s8464_s0 + $0x1e0] sm:$0xff] }
 0x2f9   :  { %v1880_v56 = vpop.permute.xlu1 %1879  ;;  %v1667_v41 = vadd.f32 %v1539_v17, %v894_v31 }
 0x2fa   :  { %v2262_v57 = vmul.f32 %v7359_v63, %v1880_v56  ;;  %v9001_v56 = vld [vmem:[#allocation143_spill] sm:$0xff] }
 0x2fc   :  { %v2390_v4 = vadd.f32 %v2262_v57, %v1617_v62  ;;  %4940 = vset.pattern.permute.xlu1 %v8798_v50  ;;  %v895_v62 = vmul.f32 %v7447_v54, %v9001_v56  ;;  %v2656_v57 = vmax.f32 %v2528_v33, 0.0 }
 0x2fd   :  { %1935 = vperm.xlu1 %4940, %v5046_v43   ;;  %v2072_v55 = vpop.permute.xlu1 %2071 }
 0x2fe   :  { %v2525_v51 = vadd.f32 %v7373_v22, %v2390_v4  ;;  %v2310_v44 = vmul.f32 %v7359_v63, %v2072_v55 }
 0x300   :  { %v2653_v20 = vmax.f32 %v2525_v51, 0.0  ;;  %v2438_v3 = vadd.f32 %v2310_v44, %v1665_v48  ;;  %v9002_v51 = vld [vmem:[#allocation89_spill] sm:$0xff] }
 0x301   :  { %2127 = vperm.xlu1 %4940, %v5047_v23   ;;  %v2076_v60 = vpop.permute.xlu1 %2075  ;;  %v1494_v44 = vmul.f32 %v7366_v28, %v9002_v51  ;;  %v9013_v51 = vld [vmem:[#allocation197_spill] sm:$0xff] }
 0x302   :  { %v2573_v25 = vadd.f32 %v7373_v22, %v2438_v3  ;;  %v2311_v35 = vmul.f32 %v7359_v63, %v2076_v60  ;;  %4745 = vmatprep.mubr.msk.f32.mxu0 %vm2748_vm0, %v2653_v20  ;;  %v9003_v20 = vld [vmem:[#allocation99_spill] sm:$0xff]  ;;  %v9004_v60 = vld [vmem:[#allocation86_spill] sm:$0xff] }
 0x303   :  { %4746 = vmatmul.mubr.msk.f32.gmra.mxu0 %vm2748_vm0, %v2654_v58  ;;  %v849_v3 = vmul.f32 %v7447_v54, %v9003_v20  ;;  %v2267_v58 = vmul.f32 %v7359_v63, %v1900_v37  ;;  %v7681_v37 = vld [vmem:[%s8468_s4] ss:$0 sm:$0xff] }
 0x304   :  { %v2701_v29 = vmax.f32 %v2573_v25, 0.0  ;;  %v2439_v61 = vadd.f32 %v2311_v35, %v1666_v49  ;;  %v1493_v49 = vmul.f32 %v7366_v28, %v9004_v60  ;;  %v5051_v35 = vld [vmem:[%s8464_s0 + $0x378] sm:$0xff] }
 0x305   :  { %2131 = vperm.xlu1 %4940, %v5045_v15   ;;  %v1622_v25 = vadd.f32 %v1494_v44, %v849_v3  ;;  %v1543_v44 = vmul.f32 %v7366_v28, %v9013_v51  ;;  %v9018_v51 = vld [vmem:[#allocation98_spill] sm:$0xff] }
 0x306   :  { %v2574_v36 = vadd.f32 %v7373_v22, %v2439_v61  ;;  %v1311_v6 = vpop.permute.xlu1 %1310  ;;  %4817 = vmatprep.mubr.msk.f32.mxu1 %vm2748_vm0, %v2701_v29  ;;  %v848_v29 = vmul.f32 %v7447_v54, %v9005_v0 }
 0x307   :  { %v1540_v13 = vmul.f32 %v7366_v28, %v1311_v6  ;;  %v2395_v61 = vadd.f32 %v2267_v58, %v1622_v25 }
 0x308   :  { %v2702_v12 = vmax.f32 %v2574_v36, 0.0  ;;  %v1621_v53 = vadd.f32 %v1493_v49, %v848_v29  ;;  %v9006_v36 = vld [vmem:[#allocation196_spill] sm:$0xff] }
 0x309   :  { %4941 = vset.pattern.permute.xlu1 %v8799_v26  ;;  %v1668_v4 = vadd.f32 %v1540_v13, %v895_v62  ;;  %v1541_v6 = vmul.f32 %v7366_v28, %v9006_v36 }
 0x30a   :  { %1366 = vperm.xlu1 %4941, %v5048_v59   ;;  %4818 = vmatmul.mubr.msk.f32.gmra.mxu1 %vm2748_vm0, %v2702_v12  ;;  %v2530_v12 = vadd.f32 %v7373_v22, %v2395_v61 }
 0x30b   :  { %v1888_v19 = vpop.permute.xlu1 %1887  ;;  %v1669_v18 = vadd.f32 %v1541_v6, %v896_v11 }
 0x30c   :  { %v2264_v5 = vmul.f32 %v7359_v63, %v1888_v19  ;;  %v9008_v19 = vld [vmem:[#allocation145_spill] sm:$0xff]  ;;  %v2658_v42 = vmax.f32 %v2530_v12, 0.0  ;;  %v9015_v12 = vld [vmem:[#allocation147_spill] sm:$0xff] }
 0x30e   :  { %v2392_v8 = vadd.f32 %v2264_v5, %v1619_v9  ;;  %4942 = vset.pattern.permute.xlu1 %v8798_v50  ;;  %v897_v9 = vmul.f32 %v7447_v54, %v9008_v19  ;;  %v5053_v5 = vld [vmem:[%s8464_s0 + $0x370] sm:$0xff] }
 0x30f   :  { %1943 = vperm.xlu1 %4942, %v5049_v47   ;;  %v2080_v14 = vpop.permute.xlu1 %2079 }
 0x310   :  { %v2527_v15 = vadd.f32 %v7373_v22, %v2392_v8  ;;  %v2312_v30 = vmul.f32 %v7359_v63, %v2080_v14  ;;  %v1908_v14 = vpop.permute.xlu0 %1907 }
 0x312   :  { %v2655_v45 = vmax.f32 %v2527_v15, 0.0  ;;  %v2440_v27 = vadd.f32 %v2312_v30, %v1667_v41  ;;  %v9009_v15 = vld [vmem:[#allocation95_spill] sm:$0xff] }
 0x313   :  { %2135 = vperm.xlu1 %4942, %v5050_v7   ;;  %v2084_v21 = vpop.permute.xlu1 %2083  ;;  %v1496_v30 = vmul.f32 %v7366_v28, %v9009_v15  ;;  %v9011_v7 = vld [vmem:[#allocation92_spill] sm:$0xff] }
 0x314   :  { %v2575_v32 = vadd.f32 %v7373_v22, %v2440_v27  ;;  %v2313_v43 = vmul.f32 %v7359_v63, %v2084_v21  ;;  %4748 = vmatprep.mubr.msk.f32.mxu0 %vm2748_vm0, %v2655_v45  ;;  %v9010_v45 = vld [vmem:[#allocation102_spill] sm:$0xff]  ;;  %v1495_v21 = vmul.f32 %v7366_v28, %v9011_v7  ;;  %v9017_v7 = vld [vmem:[#allocation105_spill] sm:$0xff] }
 0x315   :  { %4749 = vmatmul.mubr.msk.f32.gmra.mxu0 %vm2748_vm0, %v2656_v57  ;;  %v851_v27 = vmul.f32 %v7447_v54, %v9010_v45  ;;  %v2269_v57 = vmul.f32 %v7359_v63, %v1908_v14 }
 0x316   :  { %v2703_v55 = vmax.f32 %v2575_v32, 0.0  ;;  %v2441_v48 = vadd.f32 %v2313_v43, %v1668_v4  ;;  %v5054_v43 = vld [vmem:[%s8464_s0 + $0x388] sm:$0xff] }
 0x317   :  { %2139 = vperm.xlu1 %4942, %v5048_v59   ;;  %v1624_v32 = vadd.f32 %v1496_v30, %v851_v27 }
 0x318   :  { %v2576_v34 = vadd.f32 %v7373_v22, %v2441_v48  ;;  %v1319_v46 = vpop.permute.xlu1 %1318  ;;  %4820 = vmatprep.mubr.msk.f32.mxu1 %vm2748_vm0, %v2703_v55  ;;  %v9012_v55 = vld [vmem:[#allocation103_spill] sm:$0xff] }
 0x319   :  { %v1542_v2 = vmul.f32 %v7366_v28, %v1319_v46  ;;  %v850_v48 = vmul.f32 %v7447_v54, %v9012_v55 }
 0x31a   :  { %v2704_v23 = vmax.f32 %v2576_v34, 0.0  ;;  %v2397_v34 = vadd.f32 %v2269_v57, %v1624_v32 }
 0x31b   :  { %4943 = vset.pattern.permute.xlu1 %v8799_v26  ;;  %v1670_v8 = vadd.f32 %v1542_v2, %v897_v9  ;;  %v1623_v20 = vadd.f32 %v1495_v21, %v850_v48  ;;  %v853_v21 = vmul.f32 %v7447_v54, %v9017_v7 }
 0x31c   :  { %1374 = vperm.xlu1 %4943, %v5051_v35   ;;  %4821 = vmatmul.mubr.msk.f32.gmra.mxu1 %vm2748_vm0, %v2704_v23  ;;  %v9014_v23 = vld [vmem:[#allocation148_spill] sm:$0xff]  ;;  %v2532_v61 = vadd.f32 %v7373_v22, %v2397_v34 }
 0x31d   :  { %v898_v60 = vmul.f32 %v7447_v54, %v9014_v23 }
 0x31e   :  { %v1896_v16 = vpop.permute.xlu1 %1895  ;;  %v2660_v19 = vmax.f32 %v2532_v61, 0.0  ;;  %v9020_v61 = vld [vmem:[#allocation150_spill] sm:$0xff] }
 0x31f   :  { %v2266_v40 = vmul.f32 %v7359_v63, %v1896_v16  ;;  %v1671_v29 = vadd.f32 %v1543_v44, %v898_v60  ;;  %v9019_v60 = vld [vmem:[#allocation106_spill] sm:$0xff] }
 0x320   :  { %4944 = vset.pattern.permute.xlu1 %v8798_v50 }
 0x321   :  { %v2394_v38 = vadd.f32 %v2266_v40, %v1621_v53  ;;  %1951 = vperm.xlu1 %4944, %v5052_v52  }
 0x322   :  { %v2088_v24 = vpop.permute.xlu1 %2087 }
 0x323   :  { %v2529_v59 = vadd.f32 %v7373_v22, %v2394_v38  ;;  %v2314_v1 = vmul.f32 %v7359_v63, %v2088_v24  ;;  %v899_v24 = vmul.f32 %v7447_v54, %v9015_v12 }
 0x325   :  { %v2657_v39 = vmax.f32 %v2529_v59, 0.0  ;;  %v2442_v17 = vadd.f32 %v2314_v1, %v1669_v18  ;;  %2143 = vperm.xlu1 %4944, %v5053_v5   ;;  %v5056_v59 = vld [vmem:[%s8464_s0 + $0x380] sm:$0xff] }
 0x326   :  { %v2092_v31 = vpop.permute.xlu1 %2091 }
 0x327   :  { %v2577_v33 = vadd.f32 %v7373_v22, %v2442_v17  ;;  %v2315_v47 = vmul.f32 %v7359_v63, %v2092_v31  ;;  %4751 = vmatprep.mubr.msk.f32.mxu0 %vm2748_vm0, %v2657_v39 }
 0x328   :  { %4752 = vmatmul.mubr.msk.f32.gmra.mxu0 %vm2748_vm0, %v2658_v42 }
 0x329   :  { %v2705_v41 = vmax.f32 %v2577_v33, 0.0  ;;  %v2443_v13 = vadd.f32 %v2315_v47, %v1670_v8  ;;  %2147 = vperm.xlu1 %4944, %v5051_v35   ;;  %v5055_v35 = vld [vmem:[%s8464_s0 + $0x200] sm:$0xff] }
 0x32b   :  { %v2578_v56 = vadd.f32 %v7373_v22, %v2443_v13  ;;  %v1327_v62 = vpop.permute.xlu1 %1326  ;;  %4823 = vmatprep.mubr.msk.f32.mxu1 %vm2748_vm0, %v2705_v41  ;;  %v1916_v13 = vpop.permute.xlu0 %1915 }
 0x32c   :  { %v1544_v6 = vmul.f32 %v7366_v28, %v1327_v62  ;;  %v9016_v62 = vld [vmem:[#allocation101_spill] sm:$0xff]  ;;  %v2271_v44 = vmul.f32 %v7359_v63, %v1916_v13 }
 0x32d   :  { %v2706_v4 = vmax.f32 %v2578_v56, 0.0  ;;  %4945 = vset.pattern.permute.xlu1 %v8799_v26  ;;  %v1498_v45 = vmul.f32 %v7366_v28, %v9016_v62 }
 0x32e   :  { %1382 = vperm.xlu1 %4945, %v5054_v43   ;;  %v1672_v42 = vadd.f32 %v1544_v6, %v899_v24 }
 0x32f   :  { %4824 = vmatmul.mubr.msk.f32.gmra.mxu1 %vm2748_vm0, %v2706_v4 }
 0x330   :  { %v1904_v46 = vpop.permute.xlu1 %1903 }
 0x331   :  { %v2268_v3 = vmul.f32 %v7359_v63, %v1904_v46  ;;  %v4681_v58 = vpop.f32.mrf.mxu0 }
 0x332   :  { %4946 = vset.pattern.permute.xlu1 %v8798_v50  ;;  %v3205_v49 = vadd.f32 %v4681_v58, %v7681_v37 }
 0x333   :  { %v2396_v25 = vadd.f32 %v2268_v3, %v1623_v20  ;;  %1959 = vperm.xlu1 %4946, %v5055_v35   ;;  %v3199_v0 = vpop.f32.mrf.mxu0 }
 0x334   :  { %v3839_v16 = vmax.f32 %v3205_v49, 0.0  ;;  %v2096_v53 = vpop.permute.xlu1 %2095  ;;  %v3200_v36 = vadd.f32 %v7681_v37, %v3199_v0  ;;  %v852_v49 = vmul.f32 %v7447_v54, %v9019_v60  ;;  %v5057_v0 = vld [vmem:[%s8464_s0 + $0x398] sm:$0xff] }
 0x335   :  { %v2531_v40 = vadd.f32 %v7373_v22, %v2396_v25  ;;  %v2316_v10 = vmul.f32 %v7359_v63, %v2096_v53  ;;  %v4684_v11 = vpop.f32.mrf.mxu0  ;;  %v1626_v25 = vadd.f32 %v1498_v45, %v853_v21  ;;  %v9021_v53 = vld [vmem:[#allocation198_spill] sm:$0xff]  ;;  %v9022_v45 = vld [vmem:[#allocation149_spill] sm:$0xff] }
 0x336   :  { %v3838_v38 = vmax.f32 %v3200_v36, 0.0  ;;  %v3215_v52 = vadd.f32 %v4684_v11, %v7681_v37  ;;  %v3968_v9 = vsel %vm3966_vm1, %v3839_v16, -inf  ;;  %v900_v16 = vmul.f32 %v7447_v54, %v9020_v61  ;;  %v9023_v61 = vld [vmem:[#allocation109_spill] sm:$0xff] }
 0x337   :  { %v2659_v18 = vmax.f32 %v2531_v40, 0.0  ;;  %v2444_v2 = vadd.f32 %v2316_v10, %v1671_v29  ;;  %2151 = vperm.xlu1 %4946, %v5056_v59   ;;  %v3209_v1 = vpop.f32.mrf.mxu0  ;;  %v1545_v36 = vmul.f32 %v7366_v28, %v9021_v53  ;;  %v2399_v11 = vadd.f32 %v2271_v44, %v1626_v25  ;;  %v1924_v25 = vpop.permute.xlu0 %1923 }
 0x338   :  { %v3967_v39 = vsel %vm3966_vm1, %v3838_v38, -inf  ;;  %v2100_v17 = vpop.permute.xlu1 %2099  ;;  %v3210_v5 = vadd.f32 %v7681_v37, %v3209_v1  ;;  %v3841_v47 = vmax.f32 %v3215_v52, 0.0 }
 0x339   :  { %v2579_v31 = vadd.f32 %v7373_v22, %v2444_v2  ;;  %v3969_v8 = vmax.f32 %v3967_v39, %v3968_v9  ;;  %v2317_v33 = vmul.f32 %v7359_v63, %v2100_v17  ;;  %4754 = vmatprep.mubr.msk.f32.mxu0 %vm2748_vm0, %v2659_v18  ;;  %v1673_v39 = vadd.f32 %v1545_v36, %v900_v16 }
 0x33a   :  { %v3840_v14 = vmax.f32 %v3210_v5, 0.0  ;;  %v4687_v41 = vpop.f32.mrf.mxu0  ;;  %4755 = vmatmul.mubr.msk.f32.gmra.mxu0 %vm2748_vm0, %v2660_v19  ;;  %v3972_v34 = vsel %vm3966_vm1, %v3841_v47, -inf  ;;  %v1500_v16 = vmul.f32 %v7366_v28, %v9023_v61 }
 0x33b   :  { %v2707_v15 = vmax.f32 %v2579_v31, 0.0  ;;  %v2445_v30 = vadd.f32 %v2317_v33, %v1672_v42  ;;  %v3225_v56 = vadd.f32 %v4687_v41, %v7681_v37  ;;  %2155 = vperm.xlu1 %4946, %v5054_v43   ;;  %v1497_v43 = vmul.f32 %v7366_v28, %v9018_v51  ;;  %v5058_v31 = vld [vmem:[%s8464_s0 + $0x390] sm:$0xff] }
 0x33c   :  { %v3970_v27 = vsel %vm3966_vm1, %v3840_v14, -inf  ;;  %v3219_v57 = vpop.f32.mrf.mxu0 }
 0x33d   :  { %v2580_v4 = vadd.f32 %v7373_v22, %v2445_v30  ;;  %v3971_v32 = vmax.f32 %v3969_v8, %v3970_v27  ;;  %v3220_v55 = vadd.f32 %v7681_v37, %v3219_v57  ;;  %v1335_v48 = vpop.permute.xlu1 %1334  ;;  %4826 = vmatprep.mubr.msk.f32.mxu1 %vm2748_vm0, %v2707_v15  ;;  %v3843_v46 = vmax.f32 %v3225_v56, 0.0 }
 0x33e   :  { %v4690_v20 = vpop.f32.mrf.mxu0  ;;  %v1625_v10 = vadd.f32 %v1497_v43, %v852_v49  ;;  %v2534_v8 = vadd.f32 %v7373_v22, %v2399_v11  ;;  %v1546_v33 = vmul.f32 %v7366_v28, %v1335_v48  ;;  %v901_v27 = vmul.f32 %v7447_v54, %v9022_v45  ;;  %v5060_v11 = vld [vmem:[%s8464_s0 + $0x3a8] sm:$0xff] }
 0x33f   :  { %v2708_v3 = vmax.f32 %v2580_v4, 0.0  ;;  %v3842_v58 = vmax.f32 %v3220_v55, 0.0  ;;  %v3973_v23 = vmax.f32 %v3971_v32, %v3972_v34  ;;  %4947 = vset.pattern.permute.xlu1 %v8799_v26  ;;  %v3235_v35 = vadd.f32 %v4690_v20, %v7681_v37 }
 0x340   :  { %1390 = vperm.xlu1 %4947, %v5057_v0   ;;  %v3229_v29 = vpop.f32.mrf.mxu0  ;;  %v3976_v38 = vsel %vm3966_vm1, %v3843_v46, -inf  ;;  %v2662_v51 = vmax.f32 %v2534_v8, 0.0  ;;  %v1674_v43 = vadd.f32 %v1546_v33, %v901_v27  ;;  %v5059_v46 = vld [vmem:[%s8464_s0 + $0x3a0] sm:$0xff] }
 0x341   :  { %v3974_v6 = vsel %vm3966_vm1, %v3842_v58, -inf  ;;  %v3230_v40 = vadd.f32 %v7681_v37, %v3229_v29  ;;  %4827 = vmatmul.mubr.msk.f32.gmra.mxu1 %vm2748_vm0, %v2708_v3  ;;  %v3845_v18 = vmax.f32 %v3235_v35, 0.0  ;;  %v9026_v33 = vld [vmem:[#allocation108_spill] sm:$0xff] }
 0x342   :  { %v3975_v52 = vmax.f32 %v3973_v23, %v3974_v6  ;;  %v1912_v12 = vpop.permute.xlu1 %1911  ;;  %v4693_v24 = vpop.f32.mrf.mxu0 }
 0x343   :  { %v3844_v2 = vmax.f32 %v3230_v40, 0.0  ;;  %v2270_v59 = vmul.f32 %v7359_v63, %v1912_v12  ;;  %v3245_v1 = vadd.f32 %v4693_v24, %v7681_v37  ;;  %v3980_v15 = vsel %vm3966_vm1, %v3845_v18, -inf }
 0x344   :  { %v3977_v19 = vmax.f32 %v3975_v52, %v3976_v38  ;;  %4948 = vset.pattern.permute.xlu1 %v8798_v50  ;;  %v3239_v9 = vpop.f32.mrf.mxu0  ;;  %v9024_v52 = vld [vmem:[#allocation107_spill] sm:$0xff]  ;;  %v2273_v24 = vmul.f32 %v7359_v63, %v1924_v25 }
 0x345   :  { %v3978_v17 = vsel %vm3966_vm1, %v3844_v2, -inf  ;;  %v2398_v5 = vadd.f32 %v2270_v59, %v1625_v10  ;;  %v3240_v42 = vadd.f32 %v7681_v37, %v3239_v9  ;;  %2159 = vperm.xlu1 %4948, %v5058_v31   ;;  %v3847_v14 = vmax.f32 %v3245_v1, 0.0 }
 0x346   :  { %v3979_v47 = vmax.f32 %v3977_v19, %v3978_v17  ;;  %v2104_v41 = vpop.permute.xlu1 %2103  ;;  %v4696_v13 = vpop.f32.mrf.mxu0  ;;  %v855_v12 = vmul.f32 %v7447_v54, %v9024_v52 }
 0x347   :  { %v2533_v30 = vadd.f32 %v7373_v22, %v2398_v5  ;;  %v3846_v56 = vmax.f32 %v3240_v42, 0.0  ;;  %v2318_v62 = vmul.f32 %v7359_v63, %v2104_v41  ;;  %v3255_v7 = vadd.f32 %v4696_v13, %v7681_v37  ;;  %v9025_v5 = vld [vmem:[#allocation104_spill] sm:$0xff] }
 0x348   :  { %v3981_v57 = vmax.f32 %v3979_v47, %v3980_v15  ;;  %v3249_v21 = vpop.f32.mrf.mxu0  ;;  %v3984_v44 = vsel %vm3966_vm1, %v3847_v14, -inf  ;;  %v1499_v42 = vmul.f32 %v7366_v28, %v9025_v5  ;;  %v1628_v31 = vadd.f32 %v1500_v16, %v855_v12  ;;  %v9029_v12 = vld [vmem:[#allocation151_spill] sm:$0xff] }
 0x349   :  { %v2661_v4 = vmax.f32 %v2533_v30, 0.0  ;;  %v3982_v32 = vsel %vm3966_vm1, %v3846_v56, -inf  ;;  %v2446_v55 = vadd.f32 %v2318_v62, %v1673_v39  ;;  %v3250_v48 = vadd.f32 %v7681_v37, %v3249_v21  ;;  %4949 = vset.pattern.permute.xlu1 %v8799_v26  ;;  %v9027_v56 = vld [vmem:[#allocation60_spill] sm:$0xff] }
 0x34a   :  { %v3983_v34 = vmax.f32 %v3981_v57, %v3982_v32  ;;  %1394 = vperm.xlu1 %4949, %v5059_v46   ;;  %v2108_v20 = vpop.permute.xlu1 %2107  ;;  %v4699_v3 = vpop.f32.mrf.mxu0  ;;  %v3849_v23 = vmax.f32 %v3255_v7, 0.0  ;;  %v854_v47 = vmul.f32 %v7447_v54, %v9026_v33  ;;  %v2401_v41 = vadd.f32 %v2273_v24, %v1628_v31  ;;  %v7806_v46 = vld [vmem:[%s8466_s2] ss:$0 sm:$0xff] }
 0x34b   :  { %v2581_v58 = vadd.f32 %v7373_v22, %v2446_v55  ;;  %v3848_v60 = vmax.f32 %v3250_v48, 0.0  ;;  %v2319_v49 = vmul.f32 %v7359_v63, %v2108_v20  ;;  %4757 = vmatprep.mubr.msk.f32.mxu0 %vm2748_vm0, %v2661_v4  ;;  %v3265_v0 = vadd.f32 %v4699_v3, %v7681_v37  ;;  %v7797_v55 = vld [vmem:[%s8465_s1 + $0x2] ss:$0 sm:$0xff] }
 0x34c   :  { %v3985_v35 = vmax.f32 %v3983_v34, %v3984_v44  ;;  %v3259_v29 = vpop.f32.mrf.mxu0  ;;  %4758 = vmatmul.mubr.msk.f32.gmra.mxu0 %vm2748_vm0, %v2662_v51  ;;  %v3988_v18 = vsel %vm3966_vm1, %v3849_v23, -inf  ;;  %v1547_v62 = vmul.f32 %v7366_v28, %v9027_v56  ;;  %v1627_v21 = vadd.f32 %v1499_v42, %v854_v47  ;;  %v9028_v51 = vld [vmem:[#allocation152_spill] sm:$0xff] }
 0x34d   :  { %v2709_v53 = vmax.f32 %v2581_v58, 0.0  ;;  %v3986_v36 = vsel %vm3966_vm1, %v3848_v60, -inf  ;;  %v2447_v6 = vadd.f32 %v2319_v49, %v1674_v43  ;;  %v3260_v10 = vadd.f32 %v7681_v37, %v3259_v29  ;;  %v7814_v49 = vld [vmem:[%s8465_s1 + $0x1] ss:$0 sm:$0xff] }
 0x34e   :  { %v3987_v40 = vmax.f32 %v3985_v35, %v3986_v36  ;;  %1398 = vperm.xlu1 %4949, %v5060_v11   ;;  %v4702_v38 = vpop.f32.mrf.mxu0  ;;  %v3851_v1 = vmax.f32 %v3265_v0, 0.0  ;;  %v902_v43 = vmul.f32 %v7447_v54, %v9028_v51  ;;  %v2536_v20 = vadd.f32 %v7806_v46, %v2401_v41  ;;  %v5064_v0 = vld [vmem:[%s8464_s0 + $0x3b8] sm:$0xff]  ;;  %v9031_v41 = vld [vmem:[#allocation172_spill] sm:$0xff] }
 0x34f   :  { %v2582_v2 = vadd.f32 %v7373_v22, %v2447_v6  ;;  %v1343_v59 = vpop.permute.xlu1 %1342  ;;  %4829 = vmatprep.mubr.msk.f32.mxu1 %vm2748_vm0, %v2709_v53  ;;  %v3850_v19 = vmax.f32 %v3260_v10, 0.0  ;;  %v3275_v39 = vadd.f32 %v4702_v38, %v7681_v37  ;;  %v903_v24 = vmul.f32 %v7447_v54, %v9029_v12  ;;  %v9032_v51 = vld [vmem:[#allocation40_spill] sm:$0xff] }
 0x350   :  { %v3989_v9 = vmax.f32 %v3987_v40, %v3988_v18  ;;  %v3269_v17 = vpop.f32.mrf.mxu0  ;;  %v3992_v45 = vsel %vm3966_vm1, %v3851_v1, -inf  ;;  %v1675_v23 = vadd.f32 %v1547_v62, %v902_v43  ;;  %v1548_v25 = vmul.f32 %v7814_v49, %v1343_v59 }
 0x351   :  { %v2710_v8 = vmax.f32 %v2582_v2, 0.0  ;;  %v3270_v63 = vadd.f32 %v7681_v37, %v3269_v17  ;;  %v3990_v22 = vsel %vm3966_vm1, %v3850_v19, -inf  ;;  %v3853_v27 = vmax.f32 %v3275_v39, 0.0  ;;  %v1932_v2 = vpop.permute.xlu0 %1931 }
 0x352   :  { %4950 = vset.pattern.permute.xlu1 %v8798_v50  ;;  %v4705_v14 = vpop.f32.mrf.mxu0  ;;  %v3991_v13 = vmax.f32 %v3989_v9, %v3990_v22  ;;  %v2664_v18 = vmax.f32 %v2536_v20, 0.0  ;;  %v1676_v33 = vadd.f32 %v1548_v25, %v903_v24  ;;  %v2275_v62 = vmul.f32 %v7797_v55, %v1932_v2  ;;  %v5066_v25 = vld [vmem:[%s8464_s0 + $0x3c0] sm:$0xff] }
 0x353   :  { %v3852_v15 = vmax.f32 %v3270_v63, 0.0  ;;  %v3285_v30 = vadd.f32 %v4705_v14, %v7681_v37  ;;  %2171 = vperm.xlu1 %4950, %v5060_v11   ;;  %4830 = vmatmul.mubr.msk.f32.gmra.mxu1 %vm2748_vm0, %v2710_v8  ;;  %v3996_v60 = vsel %vm3966_vm1, %v3853_v27, -inf  ;;  %v9030_v8 = vld [vmem:[#allocation110_spill] sm:$0xff]  ;;  %v1501_v43 = vmul.f32 %v7814_v49, %v9032_v51 }
 0x354   :  { %v1920_v57 = vpop.permute.xlu1 %1919  ;;  %v3279_v7 = vpop.f32.mrf.mxu0  ;;  %v3993_v4 = vmax.f32 %v3991_v13, %v3992_v45  ;;  %v857_v63 = vmul.f32 %v7447_v54, %v9030_v8  ;;  %v5065_v14 = vld [vmem:[%s8464_s0 + $0x3b0] sm:$0xff]  ;;  %v1502_v13 = vmul.f32 %v7814_v49, %v9031_v41 }
 0x355   :  { %v3994_v32 = vsel %vm3966_vm1, %v3852_v15, -inf  ;;  %v2272_v48 = vmul.f32 %v7797_v55, %v1920_v57  ;;  %v3855_v28 = vmax.f32 %v3285_v30, 0.0  ;;  %v3280_v44 = vadd.f32 %v7681_v37, %v3279_v7 }
 0x356   :  { %v4708_v34 = vpop.f32.mrf.mxu0  ;;  %v3995_v3 = vmax.f32 %v3993_v4, %v3994_v32 }
 0x357   :  { %v2400_v58 = vadd.f32 %v2272_v48, %v1627_v21  ;;  %4952 = vset.pattern.permute.xlu1 %v8799_v26  ;;  %v3854_v35 = vmax.f32 %v3280_v44, 0.0  ;;  %v3295_v36 = vadd.f32 %v4708_v34, %v7681_v37  ;;  %v4005_v10 = vsel %vm3966_vm1, %v3855_v28, -inf }
 0x358   :  { %1406 = vperm.xlu1 %4952, %v5064_v0   ;;  %v2112_v29 = vpop.permute.xlu1 %2111  ;;  %v3289_v61 = vpop.f32.mrf.mxu0  ;;  %v7820_v16 = vmax.f32 %v3995_v3, %v3996_v60  ;;  %v1630_v3 = vadd.f32 %v1502_v13, %v857_v63 }
 0x359   :  { %v2535_v53 = vadd.f32 %v7806_v46, %v2400_v58  ;;  %v2320_v6 = vmul.f32 %v7797_v55, %v2112_v29  ;;  %v4780_v40 = vpop.f32.mrf.mxu1  ;;  %v4004_v11 = vsel %vm3966_vm1, %v3854_v35, -inf  ;;  %v3290_v38 = vadd.f32 %v7681_v37, %v3289_v61 }
 0x35a   :  { %v3535_v52 = vadd.f32 %v4780_v40, %v7681_v37  ;;  %v4006_v1 = vmax.f32 %v4004_v11, %v4005_v10  ;;  %v3857_v47 = vmax.f32 %v3295_v36, 0.0  ;;  %v9033_v36 = vld [vmem:[#allocation111_spill] sm:$0xff]  ;;  %v2403_v40 = vadd.f32 %v2275_v62, %v1630_v3 }
 0x35b   :  { %v2663_v59 = vmax.f32 %v2535_v53, 0.0  ;;  %v3529_v19 = vpop.f32.mrf.mxu1  ;;  %v2448_v9 = vadd.f32 %v2320_v6, %v1675_v23  ;;  %v3856_v39 = vmax.f32 %v3290_v38, 0.0  ;;  %v7864_v53 = vld [vmem:[%s8465_s1] ss:$0 sm:$0xff] }
 0x35c   :  { %v3905_v17 = vmax.f32 %v3535_v52, 0.0  ;;  %v3530_v5 = vadd.f32 %v7681_v37, %v3529_v19  ;;  %4953 = vset.pattern.permute.xlu1 %v8798_v50  ;;  %v2116_v42 = vpop.permute.xlu1 %2115  ;;  %v4711_v31 = vpop.f32.mrf.mxu0  ;;  %v4009_v28 = vsel %vm3966_vm1, %v3857_v47, -inf  ;;  %v856_v6 = vmul.f32 %v7864_v53, %v9033_v36  ;;  %v9034_v52 = vld [vmem:[#allocation154_spill] sm:$0xff] }
 0x35d   :  { %v2321_v22 = vmul.f32 %v7797_v55, %v2116_v42  ;;  %2175 = vperm.xlu1 %4953, %v5065_v14   ;;  %4760 = vmatprep.mubr.msk.f32.mxu0 %vm2748_vm0, %v2663_v59  ;;  %v2583_v15 = vadd.f32 %v7806_v46, %v2448_v9  ;;  %v4007_v30 = vsel %vm3966_vm1, %v3856_v39, -inf  ;;  %v3305_v57 = vadd.f32 %v4711_v31, %v7681_v37  ;;  %v9035_v59 = vld [vmem:[#allocation200_spill] sm:$0xff]  ;;  %v5068_v39 = vld [vmem:[%s8464_s0 + $0x3c8] sm:$0xff] }
 0x35e   :  { %v3904_v56 = vmax.f32 %v3530_v5, 0.0  ;;  %4761 = vmatmul.mubr.msk.f32.gmra.mxu0 %vm2748_vm0, %v2664_v18  ;;  %v3299_v54 = vpop.f32.mrf.mxu0  ;;  %v4008_v45 = vmax.f32 %v4006_v1, %v4007_v30  ;;  %v4120_v21 = vsel %vm3966_vm1, %v3905_v17, -inf  ;;  %v904_v12 = vmul.f32 %v7864_v53, %v9034_v52 }
 0x35f   :  { %v2449_v27 = vadd.f32 %v2321_v22, %v1676_v33  ;;  %v2711_v7 = vmax.f32 %v2583_v15, 0.0  ;;  %v3300_v32 = vadd.f32 %v7681_v37, %v3299_v54  ;;  %v3859_v29 = vmax.f32 %v3305_v57, 0.0 }
 0x360   :  { %v4118_v4 = vsel %vm3966_vm1, %v3904_v56, -inf  ;;  %v4783_v48 = vpop.f32.mrf.mxu1  ;;  %v4010_v23 = vmax.f32 %v4008_v45, %v4009_v28  ;;  %v1629_v2 = vadd.f32 %v1501_v43, %v856_v6  ;;  %v1549_v1 = vmul.f32 %v7814_v49, %v9035_v59  ;;  %v9036_v56 = vld [vmem:[#allocation153_spill] sm:$0xff] }
 0x361   :  { %v4119_v44 = vmax.f32 %v4120_v21, %v4118_v4  ;;  %v2584_v34 = vadd.f32 %v7806_v46, %v2449_v27  ;;  %4954 = vset.pattern.permute.xlu1 %v8799_v26  ;;  %v1351_v20 = vpop.permute.xlu1 %1350  ;;  %v3858_v58 = vmax.f32 %v3300_v32, 0.0  ;;  %v3545_v60 = vadd.f32 %v4783_v48, %v7681_v37  ;;  %4832 = vmatprep.mubr.msk.f32.mxu1 %vm2748_vm0, %v2711_v7 }
 0x362   :  { %1410 = vperm.xlu1 %4954, %v5066_v25   ;;  %v3539_v35 = vpop.f32.mrf.mxu1  ;;  %v4013_v42 = vsel %vm3966_vm1, %v3859_v29, -inf  ;;  %v2538_v33 = vadd.f32 %v7806_v46, %v2403_v40  ;;  %v1550_v47 = vmul.f32 %v7814_v49, %v1351_v20  ;;  %v905_v54 = vmul.f32 %v7864_v53, %v9036_v56 }
 0x363   :  { %v2712_v0 = vmax.f32 %v2584_v34, 0.0  ;;  %v3540_v61 = vadd.f32 %v7681_v37, %v3539_v35  ;;  %v4011_v10 = vsel %vm3966_vm1, %v3858_v58, -inf  ;;  %v3907_v11 = vmax.f32 %v3545_v60, 0.0 }
 0x364   :  { %v4714_v38 = vpop.f32.mrf.mxu0  ;;  %v4012_v24 = vmax.f32 %v4010_v23, %v4011_v10  ;;  %v1677_v62 = vadd.f32 %v1549_v1, %v904_v12  ;;  %v2666_v51 = vmax.f32 %v2538_v33, 0.0  ;;  %v1678_v43 = vadd.f32 %v1550_v47, %v905_v54  ;;  %v1940_v12 = vpop.permute.xlu0 %1939  ;;  %v9037_v1 = vld [vmem:[#allocation174_spill] sm:$0xff]  ;;  %v9039_v33 = vld [vmem:[#allocation173_spill] sm:$0xff] }
 0x365   :  { %v3906_v18 = vmax.f32 %v3540_v61, 0.0  ;;  %4833 = vmatmul.mubr.msk.f32.gmra.mxu1 %vm2748_vm0, %v2712_v0  ;;  %v4124_v19 = vsel %vm3966_vm1, %v3907_v11, -inf  ;;  %v3315_v9 = vadd.f32 %v4714_v38, %v7681_v37  ;;  %v5069_v38 = vld [vmem:[%s8464_s0 + $0x3d8] sm:$0xff]  ;;  %v1503_v47 = vmul.f32 %v7814_v49, %v9039_v33  ;;  %v5070_v54 = vld [vmem:[%s8464_s0 + $0x3d0] sm:$0xff] }
 0x366   :  { %1414 = vperm.xlu1 %4954, %v5068_v39   ;;  %v1928_v17 = vpop.permute.xlu1 %1927  ;;  %v3309_v5 = vpop.f32.mrf.mxu0  ;;  %v4121_v31 = vmax.f32 %v4119_v44, %v4124_v19  ;;  %v4014_v14 = vmax.f32 %v4012_v24, %v4013_v42  ;;  %v1504_v19 = vmul.f32 %v7814_v49, %v9037_v1 }
 0x367   :  { %v4122_v8 = vsel %vm3966_vm1, %v3906_v18, -inf  ;;  %v2274_v63 = vmul.f32 %v7797_v55, %v1928_v17  ;;  %v3310_v22 = vadd.f32 %v7681_v37, %v3309_v5  ;;  %v3861_v45 = vmax.f32 %v3315_v9, 0.0  ;;  %v9038_v17 = vld [vmem:[#allocation112_spill] sm:$0xff] }
 0x368   :  { %v4786_v41 = vpop.f32.mrf.mxu1  ;;  %v4123_v13 = vmax.f32 %v4121_v31, %v4122_v8  ;;  %v859_v5 = vmul.f32 %v7864_v53, %v9038_v17  ;;  %v1948_v1 = vpop.permute.xlu0 %1947 }
 0x369   :  { %v2402_v15 = vadd.f32 %v2274_v63, %v1629_v2  ;;  %v3555_v30 = vadd.f32 %v4786_v41, %v7681_v37  ;;  %v3860_v27 = vmax.f32 %v3310_v22, 0.0  ;;  %v4017_v23 = vsel %vm3966_vm1, %v3861_v45, -inf  ;;  %v9040_v45 = vld [vmem:[#allocation113_spill] sm:$0xff] }
 0x36a   :  { %4955 = vset.pattern.permute.xlu1 %v8798_v50  ;;  %v2120_v57 = vpop.permute.xlu1 %2119  ;;  %v3549_v7 = vpop.f32.mrf.mxu1  ;;  %v2277_v22 = vmul.f32 %v7797_v55, %v1940_v12 }
 0x36b   :  { %v2537_v21 = vadd.f32 %v7806_v46, %v2402_v15  ;;  %v3909_v4 = vmax.f32 %v3555_v30, 0.0  ;;  %v2322_v32 = vmul.f32 %v7797_v55, %v2120_v57  ;;  %2187 = vperm.xlu1 %4955, %v5068_v39   ;;  %v3550_v48 = vadd.f32 %v7681_v37, %v3549_v7 }
 0x36c   :  { %v4015_v28 = vsel %vm3966_vm1, %v3860_v27, -inf  ;;  %v4717_v44 = vpop.f32.mrf.mxu0  ;;  %v858_v27 = vmul.f32 %v7864_v53, %v9040_v45  ;;  %v1632_v57 = vadd.f32 %v1504_v19, %v859_v5 }
 0x36d   :  { %v2665_v34 = vmax.f32 %v2537_v21, 0.0  ;;  %v4016_v20 = vmax.f32 %v4014_v14, %v4015_v28  ;;  %v4128_v3 = vsel %vm3966_vm1, %v3909_v4, -inf  ;;  %v2450_v58 = vadd.f32 %v2322_v32, %v1677_v62  ;;  %v9041_v32 = vld [vmem:[#allocation202_spill] sm:$0xff] }
 0x36e   :  { %v4125_v60 = vmax.f32 %v4123_v13, %v4128_v3  ;;  %v3908_v25 = vmax.f32 %v3550_v48, 0.0  ;;  %v3325_v35 = vadd.f32 %v4717_v44, %v7681_v37  ;;  %v2124_v0 = vpop.permute.xlu1 %2123  ;;  %v3319_v29 = vpop.f32.mrf.mxu0  ;;  %v1551_v48 = vmul.f32 %v7814_v49, %v9041_v32  ;;  %v9042_v44 = vld [vmem:[#allocation156_spill] sm:$0xff] }
 0x36f   :  { %v2585_v61 = vadd.f32 %v7806_v46, %v2450_v58  ;;  %v2323_v36 = vmul.f32 %v7797_v55, %v2124_v0  ;;  %4956 = vset.pattern.permute.xlu1 %v8799_v26  ;;  %v3320_v6 = vadd.f32 %v7681_v37, %v3319_v29  ;;  %v4018_v40 = vmax.f32 %v4016_v20, %v4017_v23  ;;  %v9043_v29 = vld [vmem:[#allocation155_spill] sm:$0xff] }
 0x370   :  { %v4126_v10 = vsel %vm3966_vm1, %v3908_v25, -inf  ;;  %v3863_v11 = vmax.f32 %v3325_v35, 0.0  ;;  %4763 = vmatprep.mubr.msk.f32.mxu0 %vm2748_vm0, %v2665_v34  ;;  %1422 = vperm.xlu1 %4956, %v5069_v38   ;;  %v4789_v52 = vpop.f32.mrf.mxu1  ;;  %v906_v34 = vmul.f32 %v7864_v53, %v9042_v44  ;;  %v1631_v20 = vadd.f32 %v1503_v47, %v858_v27 }
 0x371   :  { %v2713_v24 = vmax.f32 %v2585_v61, 0.0  ;;  %v4127_v18 = vmax.f32 %v4125_v60, %v4126_v10  ;;  %v2451_v2 = vadd.f32 %v2323_v36, %v1678_v43  ;;  %v3862_v59 = vmax.f32 %v3320_v6, 0.0  ;;  %4764 = vmatmul.mubr.msk.f32.gmra.mxu0 %vm2748_vm0, %v2666_v51  ;;  %v5071_v6 = vld [vmem:[%s8464_s0 + $0x3e0] sm:$0xff] }
 0x372   :  { %v3565_v9 = vadd.f32 %v4789_v52, %v7681_v37  ;;  %v3559_v39 = vpop.f32.mrf.mxu1  ;;  %v4021_v15 = vsel %vm3966_vm1, %v3863_v11, -inf  ;;  %v2405_v3 = vadd.f32 %v2277_v22, %v1632_v57  ;;  %v907_v61 = vmul.f32 %v7864_v53, %v9043_v29 }
 0x373   :  { %v2586_v42 = vadd.f32 %v7806_v46, %v2451_v2  ;;  %v4019_v31 = vsel %vm3966_vm1, %v3862_v59, -inf  ;;  %v1359_v8 = vpop.permute.xlu1 %1358  ;;  %v3560_v63 = vadd.f32 %v7681_v37, %v3559_v39  ;;  %4835 = vmatprep.mubr.msk.f32.mxu1 %vm2748_vm0, %v2713_v24  ;;  %v1679_v10 = vadd.f32 %v1551_v48, %v906_v34  ;;  %v9046_v48 = vld [vmem:[#allocation115_spill] sm:$0xff] }
 0x374   :  { %v4020_v14 = vmax.f32 %v4018_v40, %v4019_v31  ;;  %v3911_v41 = vmax.f32 %v3565_v9, 0.0  ;;  %4957 = vset.pattern.permute.xlu1 %v8798_v50  ;;  %v4720_v13 = vpop.f32.mrf.mxu0  ;;  %v2540_v12 = vadd.f32 %v7806_v46, %v2405_v3  ;;  %v1552_v24 = vmul.f32 %v7814_v49, %v1359_v8  ;;  %v5072_v8 = vld [vmem:[%s8464_s0 + $0x3e8] sm:$0xff] }
 0x375   :  { %v2714_v30 = vmax.f32 %v2586_v42, 0.0  ;;  %v3910_v56 = vmax.f32 %v3560_v63, 0.0  ;;  %2191 = vperm.xlu1 %4957, %v5070_v54   ;;  %v3335_v62 = vadd.f32 %v4720_v13, %v7681_v37  ;;  %v9044_v42 = vld [vmem:[#allocation176_spill] sm:$0xff] }
 0x376   :  { %v4132_v7 = vsel %vm3966_vm1, %v3911_v41, -inf  ;;  %v3329_v21 = vpop.f32.mrf.mxu0  ;;  %v4022_v4 = vmax.f32 %v4020_v14, %v4021_v15  ;;  %v1506_v31 = vmul.f32 %v7814_v49, %v9044_v42  ;;  %v2668_v54 = vmax.f32 %v2540_v12, 0.0 }
 0x377   :  { %v4129_v51 = vmax.f32 %v4127_v18, %v4132_v7  ;;  %v4130_v43 = vsel %vm3966_vm1, %v3910_v56, -inf  ;;  %v3330_v28 = vadd.f32 %v7681_v37, %v3329_v21  ;;  %4836 = vmatmul.mubr.msk.f32.gmra.mxu1 %vm2748_vm0, %v2714_v30  ;;  %v3865_v25 = vmax.f32 %v3335_v62, 0.0  ;;  %v9045_v30 = vld [vmem:[#allocation114_spill] sm:$0xff] }
 0x378   :  { %v1936_v58 = vpop.permute.xlu1 %1935  ;;  %v4792_v23 = vpop.f32.mrf.mxu1  ;;  %v861_v56 = vmul.f32 %v7864_v53, %v9045_v30  ;;  %v2279_v62 = vmul.f32 %v7797_v55, %v1948_v1  ;;  %v1680_v57 = vadd.f32 %v1552_v24, %v907_v61 }
 0x379   :  { %v4131_v60 = vmax.f32 %v4129_v51, %v4130_v43  ;;  %v3864_v35 = vmax.f32 %v3330_v28, 0.0  ;;  %v2276_v0 = vmul.f32 %v7797_v55, %v1936_v58  ;;  %4958 = vset.pattern.permute.xlu1 %v8799_v26  ;;  %v3575_v36 = vadd.f32 %v4792_v23, %v7681_v37  ;;  %v9047_v23 = vld [vmem:[#allocation175_spill] sm:$0xff] }
 0x37a   :  { %1426 = vperm.xlu1 %4958, %v5071_v6   ;;  %v3569_v40 = vpop.f32.mrf.mxu1  ;;  %v4025_v19 = vsel %vm3966_vm1, %v3865_v25, -inf  ;;  %v860_v51 = vmul.f32 %v7864_v53, %v9046_v48  ;;  %v1634_v44 = vadd.f32 %v1506_v31, %v861_v56  ;;  %v5073_v31 = vld [vmem:[%s8464_s0 + $0x3f8] sm:$0xff] }
 0x37b   :  { %v4023_v11 = vsel %vm3966_vm1, %v3864_v35, -inf  ;;  %v2404_v38 = vadd.f32 %v2276_v0, %v1631_v20  ;;  %v3570_v52 = vadd.f32 %v7681_v37, %v3569_v40  ;;  %v3913_v2 = vmax.f32 %v3575_v36, 0.0 }
 0x37c   :  { %v4024_v18 = vmax.f32 %v4022_v4, %v4023_v11  ;;  %v2128_v59 = vpop.permute.xlu1 %2127  ;;  %v2407_v61 = vadd.f32 %v2279_v62, %v1634_v44 }
 0x37d   :  { %v2539_v9 = vadd.f32 %v7806_v46, %v2404_v38  ;;  %v3912_v39 = vmax.f32 %v3570_v52, 0.0  ;;  %v2324_v17 = vmul.f32 %v7797_v55, %v2128_v59  ;;  %v4723_v5 = vpop.f32.mrf.mxu0  ;;  %v4136_v63 = vsel %vm3966_vm1, %v3913_v2, -inf }
 0x37e   :  { %1430 = vperm.xlu1 %4958, %v5072_v8   ;;  %v3345_v33 = vadd.f32 %v4723_v5, %v7681_v37  ;;  %v4026_v47 = vmax.f32 %v4024_v18, %v4025_v19  ;;  %v4133_v14 = vmax.f32 %v4131_v60, %v4136_v63  ;;  %v1505_v60 = vmul.f32 %v7814_v49, %v9047_v23 }
 0x37f   :  { %v2667_v22 = vmax.f32 %v2539_v9, 0.0  ;;  %v4134_v41 = vsel %vm3966_vm1, %v3912_v39, -inf  ;;  %v2452_v13 = vadd.f32 %v2324_v17, %v1679_v10  ;;  %v3339_v15 = vpop.f32.mrf.mxu0  ;;  %v3998_v38 = vrot.slane %v7820_v16, 4 }
 0x380   :  { %v2132_v45 = vpop.permute.xlu1 %2131  ;;  %v3340_v27 = vadd.f32 %v7681_v37, %v3339_v15  ;;  %v4135_v7 = vmax.f32 %v4133_v14, %v4134_v41  ;;  %v3867_v20 = vmax.f32 %v3345_v33, 0.0  ;;  %v1633_v63 = vadd.f32 %v1505_v60, %v860_v51 }
 0x381   :  { %v2587_v21 = vadd.f32 %v7806_v46, %v2452_v13  ;;  %v2325_v4 = vmul.f32 %v7797_v55, %v2132_v45  ;;  %4766 = vmatprep.mubr.msk.f32.mxu0 %vm2748_vm0, %v2667_v22  ;;  %v4795_v32 = vpop.f32.mrf.mxu1  ;;  %v9048_v22 = vld [vmem:[#allocation204_spill] sm:$0xff]  ;;  %v3999_v41 = vmax.f32 %v7820_v16, %v3998_v38 }
 0x382   :  { %v3866_v43 = vmax.f32 %v3340_v27, 0.0  ;;  %4960 = vset.pattern.permute.xlu1 %v8798_v50  ;;  %4767 = vmatmul.mubr.msk.f32.gmra.mxu0 %vm2748_vm0, %v2668_v54  ;;  %v3585_v28 = vadd.f32 %v4795_v32, %v7681_v37  ;;  %v4029_v2 = vsel %vm3966_vm1, %v3867_v20, -inf  ;;  %v1553_v14 = vmul.f32 %v7814_v49, %v9048_v22 }
 0x383   :  { %v2715_v34 = vmax.f32 %v2587_v21, 0.0  ;;  %v2453_v3 = vadd.f32 %v2325_v4, %v1680_v57  ;;  %2203 = vperm.xlu1 %4960, %v5072_v8   ;;  %v3579_v58 = vpop.f32.mrf.mxu1  ;;  %v9049_v57 = vld [vmem:[#allocation158_spill] sm:$0xff]  ;;  %v2542_v21 = vadd.f32 %v7806_v46, %v2407_v61 }
 0x384   :  { %v4027_v25 = vsel %vm3966_vm1, %v3866_v43, -inf  ;;  %v3915_v35 = vmax.f32 %v3585_v28, 0.0  ;;  %v3580_v0 = vadd.f32 %v7681_v37, %v3579_v58  ;;  %v4726_v29 = vpop.f32.mrf.mxu0  ;;  %v5074_v28 = vld [vmem:[%s8464_s0 + $0x3f0] sm:$0xff] }
 0x385   :  { %v2588_v36 = vadd.f32 %v7806_v46, %v2453_v3  ;;  %v4028_v6 = vmax.f32 %v4026_v47, %v4027_v25  ;;  %v1367_v40 = vpop.permute.xlu1 %1366  ;;  %v3355_v10 = vadd.f32 %v4726_v29, %v7681_v37  ;;  %4838 = vmatprep.mubr.msk.f32.mxu1 %vm2748_vm0, %v2715_v34  ;;  %v4798_v11 = vpop.f32.mrf.mxu1  ;;  %v4000_v34 = vrot.slane %v3999_v41, 2 }
 0x386   :  { %v4140_v52 = vsel %vm3966_vm1, %v3915_v35, -inf  ;;  %v3914_v12 = vmax.f32 %v3580_v0, 0.0  ;;  %v3595_v24 = vadd.f32 %v4798_v11, %v7681_v37  ;;  %v3349_v18 = vpop.f32.mrf.mxu0  ;;  %v2670_v29 = vmax.f32 %v2542_v21, 0.0 }
 0x387   :  { %v2716_v59 = vmax.f32 %v2588_v36, 0.0  ;;  %v4137_v1 = vmax.f32 %v4135_v7, %v4140_v52  ;;  %4961 = vset.pattern.permute.xlu1 %v8799_v26  ;;  %v3350_v19 = vadd.f32 %v7681_v37, %v3349_v18  ;;  %v3589_v9 = vpop.f32.mrf.mxu1  ;;  %v3869_v17 = vmax.f32 %v3355_v10, 0.0 }
 0x388   :  { %v4138_v39 = vsel %vm3966_vm1, %v3914_v12, -inf  ;;  %v3917_v5 = vmax.f32 %v3595_v24, 0.0  ;;  %v4030_v42 = vmax.f32 %v4028_v6, %v4029_v2  ;;  %1438 = vperm.xlu1 %4961, %v5073_v31   ;;  %v3590_v47 = vadd.f32 %v7681_v37, %v3589_v9 }
 0x389   :  { %v4139_v8 = vmax.f32 %v4137_v1, %v4138_v39  ;;  %v3868_v33 = vmax.f32 %v3350_v19, 0.0  ;;  %4839 = vmatmul.mubr.msk.f32.gmra.mxu1 %vm2748_vm0, %v2716_v59  ;;  %v4801_v26 = vpop.f32.mrf.mxu1  ;;  %v908_v7 = vmul.f32 %v7864_v53, %v9049_v57  ;;  %v4033_v16 = vsel %vm3966_vm1, %v3869_v17, -inf }
 0x38a   :  { %v4144_v13 = vsel %vm3966_vm1, %v3917_v5, -inf  ;;  %v1944_v15 = vpop.permute.xlu1 %1943  ;;  %v3605_v30 = vadd.f32 %v4801_v26, %v7681_v37  ;;  %v3916_v62 = vmax.f32 %v3590_v47, 0.0  ;;  %v1554_v61 = vmul.f32 %v7814_v49, %v1367_v40 }
 0x38b   :  { %v7993_v56 = vmax.f32 %v4139_v8, %v4144_v13  ;;  %v4031_v54 = vsel %vm3966_vm1, %v3868_v33, -inf  ;;  %v2278_v45 = vmul.f32 %v7797_v55, %v1944_v15  ;;  %v3599_v27 = vpop.f32.mrf.mxu1  ;;  %v1681_v60 = vadd.f32 %v1553_v14, %v908_v7  ;;  %v9051_v14 = vld [vmem:[#allocation116_spill] sm:$0xff]  ;;  %v9052_v13 = vld [vmem:[#allocation177_spill] sm:$0xff] }
 0x38c   :  { %v4032_v4 = vmax.f32 %v4030_v42, %v4031_v54  ;;  %4962 = vset.pattern.permute.xlu1 %v8798_v50  ;;  %v8003_v32 = vsel %vm3966_vm1, %v3916_v62, -inf  ;;  %v3919_v51 = vmax.f32 %v3605_v30, 0.0  ;;  %v3600_v43 = vadd.f32 %v7681_v37, %v3599_v27  ;;  %v9050_v50 = vld [vmem:[#allocation157_spill] sm:$0xff] }
 0x38d   :  { %v2406_v48 = vadd.f32 %v2278_v45, %v1633_v63  ;;  %2207 = vperm.xlu1 %4962, %v5074_v28   ;;  %v4804_v44 = vpop.f32.mrf.mxu1  ;;  %v4143_v3 = vmax.f32 %v7993_v56, %v8003_v32  ;;  %v909_v23 = vmul.f32 %v7864_v53, %v9050_v50  ;;  %v4001_v24 = vmax.f32 %v3999_v41, %v4000_v34  ;;  %v1956_v63 = vpop.permute.xlu0 %1955  ;;  %v9053_v45 = vld [vmem:[#allocation178_spill] sm:$0xff] }
 0x38e   :  { %v4034_v20 = vmax.f32 %v4032_v4, %v4033_v16  ;;  %v2136_v58 = vpop.permute.xlu1 %2135  ;;  %v3918_v35 = vmax.f32 %v3600_v43, 0.0  ;;  %v4153_v11 = vsel %vm3966_vm1, %v3919_v51, -inf  ;;  %v3615_v52 = vadd.f32 %v4804_v44, %v7681_v37 }
 0x38f   :  { %v2541_v25 = vadd.f32 %v7806_v46, %v2406_v48  ;;  %v3609_v0 = vpop.f32.mrf.mxu1  ;;  %v2326_v6 = vmul.f32 %v7797_v55, %v2136_v58  ;;  %v1682_v9 = vadd.f32 %v1554_v61, %v909_v23  ;;  %v4002_v8 = vrot.slane %v4001_v24, 1  ;;  %v8039_v48 = vld [vmem:[%s8468_s4] ss:$0 sm:$0xff]  ;;  %v9054_v23 = vld [vmem:[#allocation117_spill] sm:$0xff] }
 0x390   :  { %v4035_v36 = vrot.slane %v4034_v20, 4  ;;  %v4152_v38 = vsel %vm3966_vm1, %v3918_v35, -inf  ;;  %v3610_v19 = vadd.f32 %v7681_v37, %v3609_v0  ;;  %v3921_v42 = vmax.f32 %v3615_v52, 0.0  ;;  %v9055_v35 = vld [vmem:[#allocation64_spill] sm:$0xff] }
 0x391   :  { %v2669_v10 = vmax.f32 %v2541_v25, 0.0  ;;  %v4807_v12 = vpop.f32.mrf.mxu1  ;;  %v4154_v2 = vmax.f32 %v4152_v38, %v4153_v11  ;;  %v2454_v59 = vadd.f32 %v2326_v6, %v1681_v60  ;;  %v863_v41 = vmul.f32 %v7864_v53, %v9051_v14 }
 0x392   :  { %v4036_v18 = vmax.f32 %v4034_v20, %v4035_v36  ;;  %v2140_v1 = vpop.permute.xlu1 %2139  ;;  %v3920_v31 = vmax.f32 %v3610_v19, 0.0  ;;  %v1507_v15 = vmul.f32 %v7814_v49, %v9052_v13  ;;  %v3625_v54 = vadd.f32 %v4807_v12, %v7681_v37 }
 0x393   :  { %4769 = vmatprep.mubr.msk.f32.mxu0 %vm2748_vm0, %v2669_v10  ;;  %v3619_v40 = vpop.f32.mrf.mxu1  ;;  %v2589_v17 = vadd.f32 %v7806_v46, %v2454_v59  ;;  %v2327_v5 = vmul.f32 %v7797_v55, %v2140_v1  ;;  %v1508_v27 = vmul.f32 %v7814_v49, %v9053_v45  ;;  %v2281_v16 = vmul.f32 %v7797_v55, %v1956_v63  ;;  %v9056_v10 = vld [vmem:[#allocation160_spill] sm:$0xff]  ;;  %v9057_v63 = vld [vmem:[#allocation159_spill] sm:$0xff]  ;;  %v1964_v45 = vpop.permute.xlu0 %1963 }
 0x394   :  { %v4037_v39 = vrot.slane %v4036_v18, 2  ;;  %4770 = vmatmul.mubr.msk.f32.gmra.mxu0 %vm2748_vm0, %v2670_v29  ;;  %v4155_v30 = vsel %vm3966_vm1, %v3920_v31, -inf  ;;  %v4157_v4 = vsel %vm3966_vm1, %v3921_v42, -inf  ;;  %v3620_v37 = vadd.f32 %v8039_v48, %v3619_v40 }
 0x395   :  { %v2717_v47 = vmax.f32 %v2589_v17, 0.0  ;;  %v2455_v26 = vadd.f32 %v2327_v5, %v1682_v9  ;;  %v4810_v22 = vpop.f32.mrf.mxu1  ;;  %v4156_v7 = vmax.f32 %v4154_v2, %v4155_v30  ;;  %v4003_v51 = vmax.f32 %v4001_v24, %v4002_v8 }
 0x396   :  { %v4038_v33 = vmax.f32 %v4036_v18, %v4037_v39  ;;  %v3923_v20 = vmax.f32 %v3625_v54, 0.0  ;;  %v3922_v58 = vmax.f32 %v3620_v37, 0.0  ;;  %v3635_v50 = vadd.f32 %v8039_v48, %v4810_v22 }
 0x397   :  { %v1375_v62 = vpop.permute.xlu1 %1374  ;;  %v2590_v21 = vadd.f32 %v7806_v46, %v2455_v26  ;;  %4841 = vmatprep.mubr.msk.f32.mxu1 %vm2748_vm0, %v2717_v47  ;;  %v4158_v44 = vmax.f32 %v4156_v7, %v4157_v4  ;;  %v3629_v34 = vpop.f32.mrf.mxu1  ;;  %v862_v60 = vmul.f32 %v7864_v53, %v9054_v23  ;;  %v1636_v25 = vadd.f32 %v1508_v27, %v863_v41 }
 0x398   :  { %v4039_v57 = vrot.slane %v4038_v33, 1  ;;  %v1555_v0 = vmul.f32 %v7814_v49, %v9055_v35  ;;  %v4159_v36 = vsel %vm3966_vm1, %v3922_v58, -inf  ;;  %v3630_v6 = vadd.f32 %v8039_v48, %v3629_v34  ;;  %v9061_v35 = vld [vmem:[#allocation119_spill] sm:$0xff] }
 0x399   :  { %v2718_v28 = vmax.f32 %v2590_v21, 0.0  ;;  %v910_v11 = vmul.f32 %v7864_v53, %v9056_v10  ;;  %v1635_v38 = vadd.f32 %v1507_v15, %v862_v60  ;;  %v2409_v52 = vadd.f32 %v2281_v16, %v1636_v25  ;;  %v9058_v21 = vld [vmem:[#allocation179_spill] sm:$0xff] }
 0x39a   :  { %v4040_v43 = vmax.f32 %v4038_v33, %v4039_v57  ;;  %v4160_v12 = vmax.f32 %v4158_v44, %v4159_v36  ;;  %v4161_v24 = vsel %vm3966_vm1, %v3923_v20, -inf  ;;  %v3925_v18 = vmax.f32 %v3635_v50, 0.0  ;;  %v9060_v20 = vld [vmem:[#allocation44_spill] sm:$0xff] }
 0x39b   :  { %4842 = vmatmul.mubr.msk.f32.gmra.mxu1 %vm2748_vm0, %v2718_v28  ;;  %v3924_v2 = vmax.f32 %v3630_v6, 0.0  ;;  %v1683_v1 = vadd.f32 %v1555_v0, %v910_v11  ;;  %v1556_v9 = vmul.f32 %v7814_v49, %v1375_v62  ;;  %v2544_v42 = vadd.f32 %v7806_v46, %v2409_v52  ;;  %v9059_v28 = vld [vmem:[#allocation118_spill] sm:$0xff] }
 0x39c   :  { %v8047_v29 = vsel %vm4286_vm2, %v4040_v43, %v4003_v51  ;;  %v1952_v61 = vpop.permute.xlu1 %1951  ;;  %v4162_v19 = vmax.f32 %v4160_v12, %v4161_v24  ;;  %v911_v8 = vmul.f32 %v7864_v53, %v9057_v63  ;;  %v4165_v33 = vsel %vm3966_vm1, %v3925_v18, -inf }
 0x39d   :  { %v2280_v59 = vmul.f32 %v7797_v55, %v1952_v61  ;;  %v4163_v39 = vsel %vm3966_vm1, %v3924_v2, -inf  ;;  %v2672_v54 = vmax.f32 %v2544_v42, 0.0  ;;  %v1510_v16 = vmul.f32 %v7814_v49, %v9058_v21  ;;  %v9063_v2 = vld [vmem:[#allocation162_spill] sm:$0xff]  ;;  %v9064_v42 = vld [vmem:[#allocation161_spill] sm:$0xff] }
 0x39e   :  { %v4164_v31 = vmax.f32 %v4162_v19, %v4163_v39  ;;  %v1684_v41 = vadd.f32 %v1556_v9, %v911_v8  ;;  %v865_v44 = vmul.f32 %v7864_v53, %v9059_v28  ;;  %v2283_v34 = vmul.f32 %v7797_v55, %v1964_v45 }
 0x39f   :  { %v2408_v17 = vadd.f32 %v2280_v59, %v1635_v38  ;;  %v1509_v58 = vmul.f32 %v7814_v49, %v9060_v20  ;;  %v864_v0 = vmul.f32 %v7864_v53, %v9061_v35  ;;  %v9062_v38 = vld [vmem:[#allocation207_spill] sm:$0xff]  ;;  %v912_v59 = vmul.f32 %v7864_v53, %v9063_v2  ;;  %v9067_v20 = vld [vmem:[#allocation164_spill] sm:$0xff] }
 0x3a0   :  { %v2144_v40 = vpop.permute.xlu1 %2143  ;;  %v4166_v14 = vmax.f32 %v4164_v31, %v4165_v33  ;;  %v1638_v25 = vadd.f32 %v1510_v16, %v865_v44  ;;  %v1557_v52 = vmul.f32 %v7814_v49, %v9062_v38  ;;  %v913_v31 = vmul.f32 %v7864_v53, %v9064_v42  ;;  %v9066_v16 = vld [vmem:[#allocation209_spill] sm:$0xff] }
 0x3a1   :  { %v2328_v5 = vmul.f32 %v7797_v55, %v2144_v40  ;;  %v2543_v47 = vadd.f32 %v7806_v46, %v2408_v17  ;;  %v1637_v11 = vadd.f32 %v1509_v58, %v864_v0  ;;  %v914_v58 = vmul.f32 %v7864_v53, %v9067_v20 }
 0x3a2   :  { %v2411_v36 = vadd.f32 %v2283_v34, %v1638_v25  ;;  %v1685_v9 = vadd.f32 %v1557_v52, %v912_v59  ;;  %v9068_v52 = vld [vmem:[#allocation166_spill] sm:$0xff] }
 0x3a3   :  { %v2456_v26 = vadd.f32 %v2328_v5, %v1683_v1  ;;  %v2671_v13 = vmax.f32 %v2543_v47, 0.0 }
 0x3a4   :  { %v2148_v22 = vpop.permute.xlu1 %2147  ;;  %v2546_v19 = vadd.f32 %v7806_v46, %v2411_v36 }
 0x3a5   :  { %v2591_v15 = vadd.f32 %v7806_v46, %v2456_v26  ;;  %v2329_v30 = vmul.f32 %v7797_v55, %v2148_v22  ;;  %4772 = vmatprep.mubr.msk.f32.mxu0 %vm2748_vm0, %v2671_v13 }
 0x3a6   :  { %v4813_v62 = vpop.f32.mrf.mxu1  ;;  %4773 = vmatmul.mubr.msk.f32.gmra.mxu0 %vm2748_vm0, %v2672_v54  ;;  %v2674_v33 = vmax.f32 %v2546_v19, 0.0 }
 0x3a7   :  { %v2719_v27 = vmax.f32 %v2591_v15, 0.0  ;;  %v2457_v57 = vadd.f32 %v2329_v30, %v1684_v41  ;;  %v3645_v7 = vadd.f32 %v8039_v48, %v4813_v62 }
 0x3a8   :  { %v3639_v4 = vpop.f32.mrf.mxu1 }
 0x3a9   :  { %v2592_v37 = vadd.f32 %v7806_v46, %v2457_v57  ;;  %v1383_v51 = vpop.permute.xlu1 %1382  ;;  %v3640_v43 = vadd.f32 %v8039_v48, %v3639_v4  ;;  %4844 = vmatprep.mubr.msk.f32.mxu1 %vm2748_vm0, %v2719_v27  ;;  %v3927_v23 = vmax.f32 %v3645_v7, 0.0  ;;  %v9065_v57 = vld [vmem:[#allocation163_spill] sm:$0xff]  ;;  %v1559_v4 = vmul.f32 %v7814_v49, %v9066_v16 }
 0x3aa   :  { %v1558_v39 = vmul.f32 %v7814_v49, %v1383_v51  ;;  %v915_v7 = vmul.f32 %v7864_v53, %v9065_v57 }
 0x3ab   :  { %v2720_v50 = vmax.f32 %v2592_v37, 0.0  ;;  %v3926_v60 = vmax.f32 %v3640_v43, 0.0  ;;  %v4169_v12 = vsel %vm3966_vm1, %v3927_v23, -inf  ;;  %v2164_v37 = vpop.permute.xlu0 %2163  ;;  %v1687_v35 = vadd.f32 %v1559_v4, %v914_v58 }
 0x3ac   :  { %v1686_v26 = vadd.f32 %v1558_v39, %v913_v31  ;;  %v2333_v44 = vmul.f32 %v7797_v55, %v2164_v37  ;;  %v9071_v37 = vld [vmem:[#allocation211_spill] sm:$0xff] }
 0x3ad   :  { %v4167_v61 = vsel %vm3966_vm1, %v3926_v60, -inf  ;;  %4845 = vmatmul.mubr.msk.f32.gmra.mxu1 %vm2748_vm0, %v2720_v50 }
 0x3ae   :  { %v4168_v6 = vmax.f32 %v4166_v14, %v4167_v61  ;;  %v1960_v10 = vpop.permute.xlu1 %1959 }
 0x3af   :  { %v2282_v24 = vmul.f32 %v7797_v55, %v1960_v10  ;;  %v2168_v2 = vpop.permute.xlu0 %2167 }
 0x3b0   :  { %v4170_v18 = vmax.f32 %v4168_v6, %v4169_v12  ;;  %v916_v12 = vmul.f32 %v7864_v53, %v9068_v52  ;;  %v2334_v59 = vmul.f32 %v7797_v55, %v2168_v2 }
 0x3b1   :  { %v2410_v1 = vadd.f32 %v2282_v24, %v1637_v11 }
 0x3b2   :  { %v2152_v40 = vpop.permute.xlu1 %2151 }
 0x3b3   :  { %v2545_v17 = vadd.f32 %v7806_v46, %v2410_v1  ;;  %v2330_v5 = vmul.f32 %v7797_v55, %v2152_v40 }
 0x3b5   :  { %v2673_v63 = vmax.f32 %v2545_v17, 0.0  ;;  %v2458_v8 = vadd.f32 %v2330_v5, %v1685_v9 }
 0x3b6   :  { %v2156_v47 = vpop.permute.xlu1 %2155 }
 0x3b7   :  { %v2593_v22 = vadd.f32 %v7806_v46, %v2458_v8  ;;  %v2331_v14 = vmul.f32 %v7797_v55, %v2156_v47  ;;  %4775 = vmatprep.mubr.msk.f32.mxu0 %vm2748_vm0, %v2673_v63  ;;  %v9069_v63 = vld [vmem:[#allocation165_spill] sm:$0xff] }
 0x3b8   :  { %4776 = vmatmul.mubr.msk.f32.gmra.mxu0 %vm2748_vm0, %v2674_v33  ;;  %v4816_v41 = vpop.f32.mrf.mxu1  ;;  %v917_v8 = vmul.f32 %v7864_v53, %v9069_v63 }
 0x3b9   :  { %v2721_v13 = vmax.f32 %v2593_v22, 0.0  ;;  %v2459_v15 = vadd.f32 %v2331_v14, %v1686_v26  ;;  %v3655_v30 = vadd.f32 %v8039_v48, %v4816_v41 }
 0x3ba   :  { %v3649_v54 = vpop.f32.mrf.mxu1 }
 0x3bb   :  { %v2594_v62 = vadd.f32 %v7806_v46, %v2459_v15  ;;  %v1391_v45 = vpop.permute.xlu1 %1390  ;;  %v3650_v27 = vadd.f32 %v8039_v48, %v3649_v54  ;;  %4847 = vmatprep.mubr.msk.f32.mxu1 %vm2748_vm0, %v2721_v13  ;;  %v3929_v43 = vmax.f32 %v3655_v30, 0.0  ;;  %v2180_v54 = vpop.permute.xlu0 %2179 }
 0x3bc   :  { %v1560_v21 = vmul.f32 %v7814_v49, %v1391_v45 }
 0x3bd   :  { %v2722_v51 = vmax.f32 %v2594_v62, 0.0  ;;  %v3928_v28 = vmax.f32 %v3650_v27, 0.0  ;;  %v4173_v0 = vsel %vm3966_vm1, %v3929_v43, -inf }
 0x3be   :  { %v1688_v34 = vadd.f32 %v1560_v21, %v915_v7  ;;  %v9070_v7 = vld [vmem:[#allocation167_spill] sm:$0xff] }
 0x3bf   :  { %v4171_v50 = vsel %vm3966_vm1, %v3928_v28, -inf  ;;  %4848 = vmatmul.mubr.msk.f32.gmra.mxu1 %vm2748_vm0, %v2722_v51  ;;  %v919_v21 = vmul.f32 %v7864_v53, %v9070_v7  ;;  %v1563_v51 = vmul.f32 %v7814_v49, %v9071_v37  ;;  %v2337_v28 = vmul.f32 %v7797_v55, %v2180_v54  ;;  %v2184_v58 = vpop.permute.xlu0 %2183 }
 0x3c0   :  { %v2461_v23 = vadd.f32 %v2333_v44, %v1688_v34  ;;  %v4172_v60 = vmax.f32 %v4170_v18, %v4171_v50  ;;  %v2160_v25 = vpop.permute.xlu1 %2159  ;;  %v9072_v34 = vld [vmem:[#allocation168_spill] sm:$0xff] }
 0x3c1   :  { %v2332_v61 = vmul.f32 %v7797_v55, %v2160_v25  ;;  %v918_v20 = vmul.f32 %v7864_v53, %v9072_v34  ;;  %v8146_v25 = vld [vmem:[%s8465_s1 + $0x2] ss:$0 sm:$0xff] }
 0x3c2   :  { %v4174_v36 = vmax.f32 %v4172_v60, %v4173_v0  ;;  %v2596_v10 = vadd.f32 %v7806_v46, %v2461_v23 }
 0x3c3   :  { %v2460_v6 = vadd.f32 %v2332_v61, %v1687_v35  ;;  %v1691_v60 = vadd.f32 %v1563_v51, %v918_v20  ;;  %v8153_v61 = vld [vmem:[%s8466_s2] ss:$0 sm:$0xff]  ;;  %v2196_v52 = vpop.permute.xlu0 %2195  ;;  %v9076_v51 = vld [vmem:[#allocation171_spill] sm:$0xff] }
 0x3c4   :  { %v2724_v1 = vmax.f32 %v2596_v10, 0.0 }
 0x3c5   :  { %v2595_v11 = vadd.f32 %v7806_v46, %v2460_v6  ;;  %v1395_v38 = vpop.permute.xlu1 %1394 }
 0x3c6   :  { %v1561_v24 = vmul.f32 %v7814_v49, %v1395_v38 }
 0x3c7   :  { %v2723_v18 = vmax.f32 %v2595_v11, 0.0  ;;  %v9073_v11 = vld [vmem:[#allocation170_spill] sm:$0xff] }
 0x3c8   :  { %v1689_v19 = vadd.f32 %v1561_v24, %v916_v12  ;;  %v920_v38 = vmul.f32 %v7864_v53, %v9073_v11  ;;  %v8162_v12 = vld [vmem:[%s8465_s1 + $0x1] ss:$0 sm:$0xff] }
 0x3c9   :  { %v1399_v40 = vpop.permute.xlu1 %1398  ;;  %4850 = vmatprep.mubr.msk.f32.mxu1 %vm2748_vm0, %v2723_v18 }
 0x3ca   :  { %v2462_v9 = vadd.f32 %v2334_v59, %v1689_v19  ;;  %4851 = vmatmul.mubr.msk.f32.gmra.mxu1 %vm2748_vm0, %v2724_v1  ;;  %v4819_v39 = vpop.f32.mrf.mxu1  ;;  %v1562_v17 = vmul.f32 %v7814_v49, %v1399_v40  ;;  %v2338_v59 = vmul.f32 %v8146_v25, %v2184_v58 }
 0x3cb   :  { %v3665_v5 = vadd.f32 %v8039_v48, %v4819_v39 }
 0x3cc   :  { %v2597_v42 = vadd.f32 %v7806_v46, %v2462_v9  ;;  %v3659_v31 = vpop.f32.mrf.mxu1  ;;  %v1690_v22 = vadd.f32 %v1562_v17, %v917_v8 }
 0x3cd   :  { %v3660_v33 = vadd.f32 %v8039_v48, %v3659_v31  ;;  %v3931_v14 = vmax.f32 %v3665_v5, 0.0  ;;  %v2200_v31 = vpop.permute.xlu0 %2199 }
 0x3ce   :  { %v2725_v47 = vmax.f32 %v2597_v42, 0.0  ;;  %v2172_v26 = vpop.permute.xlu1 %2171 }
 0x3cf   :  { %v3930_v41 = vmax.f32 %v3660_v33, 0.0  ;;  %v2335_v13 = vmul.f32 %v7797_v55, %v2172_v26  ;;  %v4177_v45 = vsel %vm3966_vm1, %v3931_v14, -inf  ;;  %v9074_v33 = vld [vmem:[#allocation169_spill] sm:$0xff] }
 0x3d0   :  { %4853 = vmatprep.mubr.msk.f32.mxu1 %vm2748_vm0, %v2725_v47  ;;  %v921_v47 = vmul.f32 %v7864_v53, %v9074_v33  ;;  %v9079_v33 = vld [vmem:[#allocation9_spill] sm:$0xff] }
 0x3d1   :  { %v4175_v15 = vsel %vm3966_vm1, %v3930_v41, -inf  ;;  %v2463_v30 = vadd.f32 %v2335_v13, %v1690_v22  ;;  %v1419_v54 = vpop.permute.xlu0 %1418 }
 0x3d2   :  { %v4176_v62 = vmax.f32 %v4174_v36, %v4175_v15 }
 0x3d3   :  { %v2598_v27 = vadd.f32 %v7806_v46, %v2463_v30  ;;  %v1407_v57 = vpop.permute.xlu1 %1406 }
 0x3d4   :  { %v1564_v16 = vmul.f32 %v7814_v49, %v1407_v57  ;;  %v4178_v4 = vmax.f32 %v4176_v62, %v4177_v45 }
 0x3d5   :  { %v2726_v43 = vmax.f32 %v2598_v27, 0.0  ;;  %v9075_v27 = vld [vmem:[#allocation5_spill] sm:$0xff] }
 0x3d6   :  { %v1692_v44 = vadd.f32 %v1564_v16, %v919_v21  ;;  %v923_v57 = vmul.f32 %v7864_v53, %v9075_v27  ;;  %v1567_v21 = vmul.f32 %v8162_v12, %v1419_v54 }
 0x3d7   :  { %4854 = vmatmul.mubr.msk.f32.gmra.mxu1 %vm2748_vm0, %v2726_v43  ;;  %v922_v43 = vmul.f32 %v7864_v53, %v9076_v51 }
 0x3d8   :  { %v2465_v50 = vadd.f32 %v2337_v28, %v1692_v44  ;;  %v2176_v23 = vpop.permute.xlu1 %2175 }
 0x3d9   :  { %v2336_v49 = vmul.f32 %v8146_v25, %v2176_v23  ;;  %v1695_v34 = vadd.f32 %v1567_v21, %v922_v43 }
 0x3da   :  { %v2600_v55 = vadd.f32 %v7806_v46, %v2465_v50 }
 0x3db   :  { %v2464_v35 = vadd.f32 %v2336_v49, %v1691_v60  ;;  %v9077_v49 = vld [vmem:[#allocation6_spill] sm:$0xff] }
 0x3dc   :  { %v4822_v0 = vpop.f32.mrf.mxu1  ;;  %v2728_v1 = vmax.f32 %v2600_v55, 0.0 }
 0x3dd   :  { %v2599_v36 = vadd.f32 %v8153_v61, %v2464_v35  ;;  %v1411_v6 = vpop.permute.xlu1 %1410  ;;  %v3675_v10 = vadd.f32 %v8039_v48, %v4822_v0  ;;  %v924_v35 = vmul.f32 %v7864_v53, %v9077_v49 }
 0x3de   :  { %v1565_v46 = vmul.f32 %v8162_v12, %v1411_v6  ;;  %v3669_v24 = vpop.f32.mrf.mxu1 }
 0x3df   :  { %v2727_v2 = vmax.f32 %v2599_v36, 0.0  ;;  %v3670_v18 = vadd.f32 %v8039_v48, %v3669_v24  ;;  %v3933_v40 = vmax.f32 %v3675_v10, 0.0  ;;  %v2342_v36 = vmul.f32 %v8146_v25, %v2200_v31  ;;  %v9078_v24 = vld [vmem:[#allocation7_spill] sm:$0xff] }
 0x3e0   :  { %v1693_v19 = vadd.f32 %v1565_v46, %v920_v38 }
 0x3e1   :  { %v3932_v9 = vmax.f32 %v3670_v18, 0.0  ;;  %v1415_v39 = vpop.permute.xlu1 %1414  ;;  %4856 = vmatprep.mubr.msk.f32.mxu1 %vm2748_vm0, %v2727_v2  ;;  %v4181_v26 = vsel %vm3966_vm1, %v3933_v40, -inf  ;;  %v925_v2 = vmul.f32 %v7864_v53, %v9078_v24  ;;  %v1435_v18 = vpop.permute.xlu0 %1434  ;;  %v4270_v53 = vld [vmem:[%s8469_s5 + $0x38] sm:$0xff] }
 0x3e2   :  { %v2466_v17 = vadd.f32 %v2338_v59, %v1693_v19  ;;  %4857 = vmatmul.mubr.msk.f32.gmra.mxu1 %vm2748_vm0, %v2728_v1  ;;  %v1566_v42 = vmul.f32 %v8162_v12, %v1415_v39  ;;  %v8201_v59 = vpop.f32.mrf.mxu0 }
 0x3e3   :  { %v4179_v5 = vsel %vm3966_vm1, %v3932_v9, -inf }
 0x3e4   :  { %v2601_v63 = vadd.f32 %v8153_v61, %v2466_v17  ;;  %v4180_v8 = vmax.f32 %v4178_v4, %v4179_v5  ;;  %v1694_v13 = vadd.f32 %v1566_v42, %v921_v47  ;;  %v2341_v4 = vmul.f32 %v8146_v25, %v2196_v52  ;;  %v3359_v42 = vpop.f32.mrf.mxu0 }
 0x3e5   :  { %v2212_v17 = vpop.permute.xlu0 %2211  ;;  %v5106_v5 = vmov 0.0  }
 0x3e6   :  { %v2729_v22 = vmax.f32 %v2601_v63, 0.0  ;;  %v8175_v14 = vmax.f32 %v4180_v8, %v4181_v26  ;;  %v2188_v41 = vpop.permute.xlu1 %2187  ;;  %4871 = vmatprep.subr.mxu1 %v5106_v5  ;;  %v5079_v8 = vld [vmem:[%s8465_s1] ss:$0 sm:$0xff] }
 0x3e7   :  { %v2339_v15 = vmul.f32 %v8146_v25, %v2188_v41  ;;  %v927_v47 = vmul.f32 %v5079_v8, %v9079_v33  ;;  %4872 = vmatpush3.msra.mxu1 %v4270_v53  ;;  %v4269_v41 = vld [vmem:[%s8469_s5 + $0x30] sm:$0xff] }
 0x3e8   :  { %4859 = vmatprep.mubr.msk.f32.mxu1 %vm2748_vm0, %v2729_v22  ;;  %v2345_v22 = vmul.f32 %v8146_v25, %v2212_v17  ;;  %4873 = vmatprep.subr.mxu1 %v5106_v5 }
 0x3e9   :  { %v2467_v30 = vadd.f32 %v2339_v15, %v1694_v13  ;;  %v1571_v13 = vmul.f32 %v8162_v12, %v1435_v18  ;;  %4874 = vmatpush3.msra.mxu1 %v4269_v41 }
 0x3ea   :  { %4875 = vmatprep.subr.mxu1 %v5106_v5 }
 0x3eb   :  { %v2602_v62 = vadd.f32 %v8153_v61, %v2467_v30  ;;  %v1423_v45 = vpop.permute.xlu1 %1422  ;;  %v4732_v30 = vpop.f32.mrf.mxu0 }
 0x3ec   :  { %v1568_v7 = vmul.f32 %v8162_v12, %v1423_v45 }
 0x3ed   :  { %v2730_v16 = vmax.f32 %v2602_v62, 0.0  ;;  %v9080_v62 = vld [vmem:[#allocation8_spill] sm:$0xff] }
 0x3ee   :  { %v1696_v37 = vadd.f32 %v1568_v7, %v923_v57  ;;  %v926_v45 = vmul.f32 %v5079_v8, %v9080_v62 }
 0x3ef   :  { %4860 = vmatmul.mubr.msk.f32.gmra.mxu1 %vm2748_vm0, %v2730_v16  ;;  %v3369_v16 = vpop.f32.mrf.mxu0 }
 0x3f0   :  { %v2469_v28 = vadd.f32 %v2341_v4, %v1696_v37  ;;  %v2192_v44 = vpop.permute.xlu1 %2191  ;;  %v1699_v7 = vadd.f32 %v1571_v13, %v926_v45 }
 0x3f1   :  { %v2340_v20 = vmul.f32 %v8146_v25, %v2192_v44  ;;  %v4735_v51 = vpop.f32.mrf.mxu0 }
 0x3f2   :  { %v2604_v50 = vadd.f32 %v8153_v61, %v2469_v28 }
 0x3f3   :  { %v2468_v58 = vadd.f32 %v2340_v20, %v1695_v34  ;;  %v3379_v44 = vpop.f32.mrf.mxu0  ;;  %v4268_v34 = vld [vmem:[%s8469_s5 + $0x28] sm:$0xff] }
 0x3f4   :  { %v2732_v6 = vmax.f32 %v2604_v50, 0.0  ;;  %4876 = vmatpush3.msra.mxu1 %v4268_v34  ;;  %v3380_v53 = vadd.f32 %v8039_v48, %v3379_v44 }
 0x3f5   :  { %v2603_v23 = vadd.f32 %v8153_v61, %v2468_v58  ;;  %v1427_v60 = vpop.permute.xlu1 %1426  ;;  %4877 = vmatprep.subr.mxu1 %v5106_v5 }
 0x3f6   :  { %v1569_v55 = vmul.f32 %v8162_v12, %v1427_v60 }
 0x3f7   :  { %v2731_v0 = vmax.f32 %v2603_v23, 0.0 }
 0x3f8   :  { %v1697_v10 = vadd.f32 %v1569_v55, %v924_v35  ;;  %v4266_v35 = vld [vmem:[%s8469_s5 + $0x18] sm:$0xff] }
 0x3f9   :  { %v1431_v11 = vpop.permute.xlu1 %1430  ;;  %4862 = vmatprep.mubr.msk.f32.mxu1 %vm2748_vm0, %v2731_v0 }
 0x3fa   :  { %v2470_v38 = vadd.f32 %v2342_v36, %v1697_v10  ;;  %4863 = vmatmul.mubr.msk.f32.gmra.mxu1 %vm2748_vm0, %v2732_v6  ;;  %v1570_v52 = vmul.f32 %v8162_v12, %v1431_v11  ;;  %v3360_v11 = vadd.f32 %v8039_v48, %v3359_v42 }
 0x3fc   :  { %v2605_v46 = vadd.f32 %v8153_v61, %v2470_v38  ;;  %v1698_v40 = vadd.f32 %v1570_v52, %v925_v2  ;;  %v3365_v52 = vadd.f32 %v8039_v48, %v8201_v59  ;;  %v3870_v24 = vmax.f32 %v3360_v11, 0.0  ;;  %v4265_v59 = vld [vmem:[%s8469_s5 + $0x10] sm:$0xff] }
 0x3fe   :  { %v2733_v1 = vmax.f32 %v2605_v46, 0.0  ;;  %v2204_v19 = vpop.permute.xlu1 %2203  ;;  %v3370_v46 = vadd.f32 %v8039_v48, %v3369_v16  ;;  %v3871_v18 = vmax.f32 %v3365_v52, 0.0 }
 0x3ff   :  { %v2343_v9 = vmul.f32 %v8146_v25, %v2204_v19 }
 0x400   :  { %4865 = vmatprep.mubr.msk.f32.mxu1 %vm2748_vm0, %v2733_v1  ;;  %v3872_v1 = vmax.f32 %v3370_v46, 0.0  ;;  %v4264_v46 = vld [vmem:[%s8469_s5 + $0x8] sm:$0xff] }
 0x401   :  { %v2471_v39 = vadd.f32 %v2343_v9, %v1698_v40  ;;  %v4041_v9 = vsel %vm3966_vm1, %v3870_v24, -inf }
 0x403   :  { %v2606_v31 = vadd.f32 %v8153_v61, %v2471_v39  ;;  %v1439_v63 = vpop.permute.xlu1 %1438  ;;  %v3375_v39 = vadd.f32 %v8039_v48, %v4732_v30  ;;  %v3874_v30 = vmax.f32 %v3380_v53, 0.0 }
 0x404   :  { %v1572_v26 = vmul.f32 %v8162_v12, %v1439_v63  ;;  %v4044_v63 = vsel %vm3966_vm1, %v3872_v1, -inf }
 0x405   :  { %v2734_v15 = vmax.f32 %v2606_v31, 0.0  ;;  %v4042_v31 = vsel %vm3966_vm1, %v3871_v18, -inf }
 0x406   :  { %v1700_v54 = vadd.f32 %v1572_v26, %v927_v47  ;;  %v4043_v33 = vmax.f32 %v4041_v9, %v4042_v31  ;;  %v3873_v26 = vmax.f32 %v3375_v39, 0.0 }
 0x407   :  { %4866 = vmatmul.mubr.msk.f32.gmra.mxu1 %vm2748_vm0, %v2734_v15 }
 0x408   :  { %v2473_v27 = vadd.f32 %v2345_v22, %v1700_v54  ;;  %v2208_v57 = vpop.permute.xlu1 %2207  ;;  %v4045_v13 = vmax.f32 %v4043_v33, %v4044_v63 }
 0x409   :  { %v2344_v21 = vmul.f32 %v8146_v25, %v2208_v57  ;;  %v8233_v25 = vpop.f32.mrf.mxu0  ;;  %v4046_v57 = vsel %vm3966_vm1, %v3873_v26, -inf }
 0x40a   :  { %v2608_v12 = vadd.f32 %v8153_v61, %v2473_v27  ;;  %v3385_v27 = vadd.f32 %v8039_v48, %v4735_v51  ;;  %v4047_v16 = vmax.f32 %v4045_v13, %v4046_v57  ;;  %v3395_v18 = vadd.f32 %v8039_v48, %v8233_v25 }
 0x40b   :  { %v2472_v4 = vadd.f32 %v2344_v21, %v1699_v7  ;;  %v3389_v20 = vpop.f32.mrf.mxu0 }
 0x40c   :  { %v2736_v28 = vmax.f32 %v2608_v12, 0.0  ;;  %v3875_v34 = vmax.f32 %v3385_v27, 0.0  ;;  %v3877_v63 = vmax.f32 %v3395_v18, 0.0 }
 0x40d   :  { %v2607_v37 = vadd.f32 %v8153_v61, %v2472_v4  ;;  %v8235_v58 = vpop.f32.mrf.mxu0  ;;  %v4267_v61 = vld [vmem:[%s8469_s5 + $0x20] sm:$0xff] }
 0x40e   :  { %4878 = vmatpush3.msra.mxu1 %v4267_v61  ;;  %v3405_v26 = vadd.f32 %v8039_v48, %v8235_v58 }
 0x40f   :  { %v2735_v43 = vmax.f32 %v2607_v37, 0.0  ;;  %v8240_v50 = vpop.f32.mrf.mxu0  ;;  %4879 = vmatprep.subr.mxu1 %v5106_v5  ;;  %v4048_v37 = vsel %vm3966_vm1, %v3874_v30, -inf }
 0x410   :  { %4880 = vmatpush3.msra.mxu1 %v4266_v35  ;;  %v3400_v1 = vadd.f32 %v8039_v48, %v8240_v50 }
 0x411   :  { %4868 = vmatprep.mubr.msk.f32.mxu1 %vm2748_vm0, %v2735_v43  ;;  %v8243_v23 = vpop.f32.mrf.mxu0  ;;  %4881 = vmatprep.subr.mxu1 %v5106_v5  ;;  %v3390_v43 = vadd.f32 %v8039_v48, %v3389_v20  ;;  %v4050_v20 = vsel %vm3966_vm1, %v3875_v34, -inf }
 0x412   :  { %4869 = vmatmul.mubr.msk.f32.gmra.mxu1 %vm2748_vm0, %v2736_v28  ;;  %v3878_v53 = vmax.f32 %v3400_v1, 0.0 }
 0x413   :  { %v8245_v60 = vpop.f32.mrf.mxu0  ;;  %4882 = vmatpush3.msra.mxu1 %v4265_v59  ;;  %v3876_v11 = vmax.f32 %v3390_v43, 0.0  ;;  %4887 = vmatprep.mubr.msk.f32.mxu1 %vm5107_vm3, %v5106_v5 }
 0x414   :  { %4883 = vmatprep.subr.mxu1 %v5106_v5 }
 0x415   :  { %v8247_v49 = vpop.f32.mrf.mxu0  ;;  %4884 = vmatpush3.msra.mxu1 %v4264_v46 }
 0x416   :  { %4885 = vmatprep.subr.mxu1 %v5106_v5 }
 0x417   :  { %v8252_v55 = vpop.f32.mrf.mxu0 }
 0x418   :  { %v3420_v43 = vadd.f32 %v8039_v48, %v8252_v55 }
 0x419   :  { %v8255_v0 = vpop.f32.mrf.mxu0 }
 0x41b   :  { %v8257_v36 = vpop.f32.mrf.mxu0 }
 0x41d   :  { %v4753_v6 = vpop.f32.mrf.mxu0 }
 0x41e   :  { %v3445_v17 = vadd.f32 %v8039_v48, %v4753_v6 }
 0x41f   :  { %v3439_v10 = vpop.f32.mrf.mxu0 }
 0x420   :  { %v3440_v19 = vadd.f32 %v8039_v48, %v3439_v10  ;;  %v3887_v22 = vmax.f32 %v3445_v17, 0.0  ;;  %v4049_v10 = vmax.f32 %v4047_v16, %v4048_v37  ;;  %v3415_v37 = vadd.f32 %v8039_v48, %v8243_v23 }
 0x421   :  { %v4756_v38 = vpop.f32.mrf.mxu0 }
 0x422   :  { %v3886_v8 = vmax.f32 %v3440_v19, 0.0  ;;  %v3455_v62 = vadd.f32 %v8039_v48, %v4756_v38  ;;  %v4079_v7 = vsel %vm3966_vm1, %v3887_v22, -inf  ;;  %v4051_v9 = vmax.f32 %v4049_v10, %v4050_v20 }
 0x423   :  { %v3449_v2 = vpop.f32.mrf.mxu0  ;;  %v3410_v22 = vadd.f32 %v8039_v48, %v8245_v60  ;;  %v3425_v20 = vadd.f32 %v8039_v48, %v8247_v49 }
 0x424   :  { %v3450_v42 = vadd.f32 %v8039_v48, %v3449_v2  ;;  %v4078_v54 = vsel %vm3966_vm1, %v3886_v8, -inf  ;;  %v3889_v28 = vmax.f32 %v3455_v62, 0.0  ;;  %v4056_v62 = vsel %vm3966_vm1, %v3878_v53, -inf }
 0x425   :  { %v4759_v40 = vpop.f32.mrf.mxu0  ;;  %v4080_v4 = vmax.f32 %v4078_v54, %v4079_v7  ;;  %v4054_v54 = vsel %vm3966_vm1, %v3877_v63, -inf  ;;  %v3879_v7 = vmax.f32 %v3405_v26, 0.0 }
 0x426   :  { %v3888_v41 = vmax.f32 %v3450_v42, 0.0  ;;  %v3465_v51 = vadd.f32 %v8039_v48, %v4759_v40  ;;  %v4083_v38 = vsel %vm3966_vm1, %v3889_v28, -inf  ;;  %v4052_v42 = vsel %vm3966_vm1, %v3876_v11, -inf }
 0x427   :  { %v3459_v47 = vpop.f32.mrf.mxu0  ;;  %v4053_v50 = vmax.f32 %v4051_v9, %v4052_v42  ;;  %v3881_v11 = vmax.f32 %v3415_v37, 0.0 }
 0x428   :  { %v3460_v45 = vadd.f32 %v8039_v48, %v3459_v47  ;;  %v4081_v21 = vsel %vm3966_vm1, %v3888_v41, -inf  ;;  %v3891_v19 = vmax.f32 %v3465_v51, 0.0 }
 0x429   :  { %v4762_v15 = vpop.f32.mrf.mxu0  ;;  %v4082_v61 = vmax.f32 %v4080_v4, %v4081_v21  ;;  %v4055_v57 = vmax.f32 %v4053_v50, %v4054_v54  ;;  %v3880_v21 = vmax.f32 %v3410_v22, 0.0 }
 0x42a   :  { %v3890_v44 = vmax.f32 %v3460_v45, 0.0  ;;  %v3475_v59 = vadd.f32 %v8039_v48, %v4762_v15  ;;  %v4087_v25 = vsel %vm3966_vm1, %v3891_v19, -inf  ;;  %v4062_v19 = vsel %vm3966_vm1, %v3881_v11, -inf }
 0x42b   :  { %v3469_v12 = vpop.f32.mrf.mxu0  ;;  %v4084_v24 = vmax.f32 %v4082_v61, %v4083_v38  ;;  %v4057_v60 = vmax.f32 %v4055_v57, %v4056_v62  ;;  %v4058_v61 = vsel %vm3966_vm1, %v3879_v7, -inf  ;;  %v3882_v38 = vmax.f32 %v3420_v43, 0.0  ;;  %v8342_v62 = vpop.f32.mrf.mxu1 }
 0x42c   :  { %v3470_v6 = vadd.f32 %v8039_v48, %v3469_v12  ;;  %v4085_v52 = vsel %vm3966_vm1, %v3890_v44, -inf  ;;  %v3893_v41 = vmax.f32 %v3475_v59, 0.0 }
 0x42d   :  { %v4086_v39 = vmax.f32 %v4084_v24, %v4085_v52  ;;  %v4059_v10 = vmax.f32 %v4057_v60, %v4058_v61  ;;  %v3430_v24 = vadd.f32 %v8039_v48, %v8257_v36  ;;  %v4263_v36 = vld [vmem:[%s8469_s5] sm:$0xff] }
 0x42e   :  { %v3892_v40 = vmax.f32 %v3470_v6, 0.0  ;;  %v4091_v58 = vsel %vm3966_vm1, %v3893_v41, -inf  ;;  %4886 = vmatpush3.msra.mxu1 %v4263_v36 }
 0x42f   :  { %v4088_v33 = vmax.f32 %v4086_v39, %v4087_v25  ;;  %v3884_v42 = vmax.f32 %v3430_v24, 0.0  ;;  %v3435_v25 = vadd.f32 %v8039_v48, %v8255_v0 }
 0x430   :  { %v4089_v8 = vsel %vm3966_vm1, %v3892_v40, -inf  ;;  %v4064_v40 = vsel %vm3966_vm1, %v3882_v38, -inf }
 0x431   :  { %v4765_v35 = vpop.f32.mrf.mxu0  ;;  %v4090_v15 = vmax.f32 %v4088_v33, %v4089_v8  ;;  %v4068_v22 = vsel %vm3966_vm1, %v3884_v42, -inf }
 0x432   :  { %v3485_v45 = vadd.f32 %v8039_v48, %v4765_v35  ;;  %v4060_v35 = vsel %vm3966_vm1, %v3880_v21, -inf }
 0x433   :  { %v3479_v2 = vpop.f32.mrf.mxu0  ;;  %v4092_v4 = vmax.f32 %v4090_v15, %v4091_v58  ;;  %v4061_v46 = vmax.f32 %v4059_v10, %v4060_v35  ;;  %v3885_v15 = vmax.f32 %v3435_v25, 0.0  ;;  %v3679_v58 = vpop.f32.mrf.mxu1 }
 0x434   :  { %v3480_v31 = vadd.f32 %v8039_v48, %v3479_v2  ;;  %v3895_v28 = vmax.f32 %v3485_v45, 0.0 }
 0x435   :  { %v4063_v39 = vmax.f32 %v4061_v46, %v4062_v19  ;;  %v4070_v7 = vsel %vm3966_vm1, %v3885_v15, -inf }
 0x436   :  { %v3894_v13 = vmax.f32 %v3480_v31, 0.0  ;;  %v4095_v52 = vsel %vm3966_vm1, %v3895_v28, -inf }
 0x437   :  { %v4065_v49 = vmax.f32 %v4063_v39, %v4064_v40 }
 0x438   :  { %v4093_v16 = vsel %vm3966_vm1, %v3894_v13, -inf }
 0x439   :  { %v4094_v34 = vmax.f32 %v4092_v4, %v4093_v16  ;;  %v8347_v4 = vpop.f32.mrf.mxu1 }
 0x43b   :  { %v4096_v55 = vmax.f32 %v4094_v34, %v4095_v52  ;;  %v3689_v43 = vpop.f32.mrf.mxu1 }
 0x43d   :  { %v8350_v61 = vpop.f32.mrf.mxu1 }
 0x442   :  { %v4768_v17 = vpop.f32.mrf.mxu0 }
 0x443   :  { %v3495_v51 = vadd.f32 %v8039_v48, %v4768_v17  ;;  %v3883_v17 = vmax.f32 %v3425_v20, 0.0 }
 0x444   :  { %v3489_v47 = vpop.f32.mrf.mxu0 }
 0x445   :  { %v3490_v27 = vadd.f32 %v8039_v48, %v3489_v47  ;;  %v3897_v2 = vmax.f32 %v3495_v51, 0.0  ;;  %v4066_v26 = vsel %vm3966_vm1, %v3883_v17, -inf  ;;  %v4183_v51 = vrot.slane %v8175_v14, 4 }
 0x446   :  { %v4067_v13 = vmax.f32 %v4065_v49, %v4066_v26 }
 0x447   :  { %v3896_v44 = vmax.f32 %v3490_v27, 0.0  ;;  %v4099_v59 = vsel %vm3966_vm1, %v3897_v2, -inf  ;;  %v4184_v46 = vmax.f32 %v8175_v14, %v4183_v51 }
 0x448   :  { %v4069_v54 = vmax.f32 %v4067_v13, %v4068_v22 }
 0x449   :  { %v4097_v23 = vsel %vm3966_vm1, %v3896_v44, -inf  ;;  %v4185_v40 = vrot.slane %v4184_v46, 2 }
 0x44a   :  { %v4098_v1 = vmax.f32 %v4096_v55, %v4097_v23  ;;  %v4071_v21 = vmax.f32 %v4069_v54, %v4070_v7  ;;  %v3699_v23 = vpop.f32.mrf.mxu1  ;;  %v3680_v54 = vadd.f32 %v8039_v48, %v3679_v58 }
 0x44c   :  { %v4100_v63 = vmax.f32 %v4098_v1, %v4099_v59  ;;  %v8357_v2 = vpop.f32.mrf.mxu1 }
 0x44e   :  { %v3709_v39 = vpop.f32.mrf.mxu1 }
 0x450   :  { %v8362_v59 = vpop.f32.mrf.mxu1 }
 0x452   :  { %v3719_v36 = vpop.f32.mrf.mxu1 }
 0x454   :  { %v4771_v30 = vpop.f32.mrf.mxu0 }
 0x455   :  { %v3505_v9 = vadd.f32 %v8039_v48, %v4771_v30 }
 0x456   :  { %v3499_v12 = vpop.f32.mrf.mxu0 }
 0x457   :  { %v3500_v6 = vadd.f32 %v8039_v48, %v3499_v12  ;;  %v3899_v8 = vmax.f32 %v3505_v9, 0.0  ;;  %v4072_v12 = vrot.slane %v4071_v21, 4 }
 0x459   :  { %v3898_v18 = vmax.f32 %v3500_v6, 0.0  ;;  %v4103_v30 = vsel %vm3966_vm1, %v3899_v8, -inf  ;;  %v4073_v34 = vmax.f32 %v4071_v21, %v4072_v12 }
 0x45b   :  { %v4101_v31 = vsel %vm3966_vm1, %v3898_v18, -inf  ;;  %v4074_v52 = vrot.slane %v4073_v34, 2 }
 0x45c   :  { %v4102_v50 = vmax.f32 %v4100_v63, %v4101_v31  ;;  %v4186_v31 = vmax.f32 %v4184_v46, %v4185_v40 }
 0x45d   :  { %v4075_v1 = vmax.f32 %v4073_v34, %v4074_v52 }
 0x45e   :  { %v4104_v5 = vmax.f32 %v4102_v50, %v4103_v30  ;;  %v4187_v8 = vrot.slane %v4186_v31, 1 }
 0x45f   :  { %v4076_v42 = vrot.slane %v4075_v1, 1 }
 0x466   :  { %v4774_v53 = vpop.f32.mrf.mxu0 }
 0x467   :  { %v3515_v33 = vadd.f32 %v8039_v48, %v4774_v53  ;;  %v4077_v53 = vmax.f32 %v4075_v1, %v4076_v42 }
 0x468   :  { %v3509_v47 = vpop.f32.mrf.mxu0 }
 0x469   :  { %v3510_v41 = vadd.f32 %v8039_v48, %v3509_v47  ;;  %v3901_v45 = vmax.f32 %v3515_v33, 0.0  ;;  %v8364_v33 = vpop.f32.mrf.mxu1  ;;  %v4289_v32 = vsel %vm4288_vm4, %v4077_v53, %v8047_v29  ;;  %v4188_v47 = vmax.f32 %v4186_v31, %v4187_v8  ;;  %v8381_v29 = vld [vmem:[%s8468_s4] ss:$0 sm:$0xff] }
 0x46a   :  { %v3695_v58 = vadd.f32 %v8381_v29, %v8347_v4  ;;  %v3705_v51 = vadd.f32 %v8381_v29, %v8350_v61  ;;  %v3715_v61 = vadd.f32 %v8381_v29, %v8357_v2 }
 0x46b   :  { %v3900_v0 = vmax.f32 %v3510_v41, 0.0  ;;  %v4107_v16 = vsel %vm3966_vm1, %v3901_v45, -inf  ;;  %v3729_v22 = vpop.f32.mrf.mxu1  ;;  %v3685_v45 = vadd.f32 %v8039_v48, %v8342_v62 }
 0x46d   :  { %v4105_v27 = vsel %vm3966_vm1, %v3900_v0, -inf  ;;  %v8369_v15 = vpop.f32.mrf.mxu1  ;;  %v3935_v21 = vmax.f32 %v3685_v45, 0.0 }
 0x46e   :  { %v4106_v57 = vmax.f32 %v4104_v5, %v4105_v27  ;;  %v3690_v5 = vadd.f32 %v8381_v29, %v3689_v43 }
 0x46f   :  { %v8371_v30 = vpop.f32.mrf.mxu1  ;;  %v4190_v12 = vsel %vm3966_vm1, %v3935_v21, -inf }
 0x470   :  { %v4108_v60 = vmax.f32 %v4106_v57, %v4107_v16  ;;  %v3934_v57 = vmax.f32 %v3680_v54, 0.0  ;;  %v3936_v16 = vmax.f32 %v3690_v5, 0.0 }
 0x471   :  { %v8373_v0 = vpop.f32.mrf.mxu1 }
 0x472   :  { %v4109_v37 = vrot.slane %v4108_v60, 4 }
 0x473   :  { %v8384_v27 = vpop.f32.mrf.mxu1 }
 0x474   :  { %v4110_v6 = vmax.f32 %v4108_v60, %v4109_v37  ;;  %v4189_v60 = vsel %vm3966_vm1, %v3934_v57, -inf  ;;  %v4192_v37 = vsel %vm3966_vm1, %v3936_v16, -inf }
 0x475   :  { %v4191_v43 = vmax.f32 %v4189_v60, %v4190_v12  ;;  %v3740_v12 = vadd.f32 %v8381_v29, %v8371_v30 }
 0x476   :  { %v4111_v55 = vrot.slane %v4110_v6, 2 }
 0x478   :  { %v4777_v28 = vpop.f32.mrf.mxu0  ;;  %v4112_v9 = vmax.f32 %v4110_v6, %v4111_v55  ;;  %v3710_v6 = vadd.f32 %v8381_v29, %v3709_v39 }
 0x479   :  { %v3525_v44 = vadd.f32 %v8039_v48, %v4777_v28 }
 0x47a   :  { %v3519_v35 = vpop.f32.mrf.mxu0  ;;  %v4113_v49 = vrot.slane %v4112_v9, 1 }
 0x47b   :  { %v3903_v10 = vmax.f32 %v3525_v44, 0.0  ;;  %v3520_v11 = vadd.f32 %v8039_v48, %v3519_v35  ;;  %v3700_v48 = vadd.f32 %v8381_v29, %v3699_v23  ;;  %v3937_v44 = vmax.f32 %v3695_v58, 0.0 }
 0x47c   :  { %v4114_v50 = vmax.f32 %v4112_v9, %v4113_v49  ;;  %v4193_v35 = vmax.f32 %v4191_v43, %v4192_v37 }
 0x47d   :  { %v3902_v38 = vmax.f32 %v3520_v11, 0.0  ;;  %v4116_v20 = vsel %vm3966_vm1, %v3903_v10, -inf  ;;  %v3938_v34 = vmax.f32 %v3700_v48, 0.0  ;;  %v4194_v11 = vsel %vm3966_vm1, %v3937_v44, -inf }
 0x47e   :  { %v4291_v26 = vsel %vm4290_vm5, %v4114_v50, %v4289_v32  ;;  %v4195_v23 = vmax.f32 %v4193_v35, %v4194_v11  ;;  %v3730_v32 = vadd.f32 %v8381_v29, %v3729_v22 }
 0x47f   :  { %v4115_v24 = vsel %vm3966_vm1, %v3902_v38, -inf  ;;  %v4849_v7 = vpop.f32.mrf.mxu1  ;;  %v4196_v38 = vsel %vm3966_vm1, %v3938_v34, -inf }
 0x480   :  { %v4117_v18 = vmax.f32 %v4115_v24, %v4116_v20  ;;  %v3765_v46 = vadd.f32 %v8381_v29, %v4849_v7  ;;  %v3939_v20 = vmax.f32 %v3705_v51, 0.0  ;;  %v3940_v24 = vmax.f32 %v3710_v6, 0.0 }
 0x481   :  { %v3759_v62 = vpop.f32.mrf.mxu1  ;;  %v3944_v58 = vmax.f32 %v3730_v32, 0.0 }
 0x482   :  { %v4145_v19 = vmax.f32 %v4143_v3, %v4117_v18  ;;  %v3760_v4 = vadd.f32 %v8381_v29, %v3759_v62  ;;  %v4197_v18 = vmax.f32 %v4195_v23, %v4196_v38  ;;  %v3951_v9 = vmax.f32 %v3765_v46, 0.0 }
 0x483   :  { %v4200_v42 = vsel %vm3966_vm1, %v3940_v24, -inf  ;;  %v3735_v62 = vadd.f32 %v8381_v29, %v8364_v33  ;;  %v4208_v35 = vsel %vm3966_vm1, %v3944_v58, -inf  ;;  %v3946_v33 = vmax.f32 %v3740_v12, 0.0 }
 0x484   :  { %v4146_v17 = vrot.slane %v4145_v19, 4  ;;  %v3950_v1 = vmax.f32 %v3760_v4, 0.0  ;;  %v3745_v46 = vadd.f32 %v8381_v29, %v8369_v15 }
 0x485   :  { %v3945_v38 = vmax.f32 %v3735_v62, 0.0 }
 0x486   :  { %v4147_v14 = vmax.f32 %v4145_v19, %v4146_v17  ;;  %v3720_v19 = vadd.f32 %v8381_v29, %v3719_v36  ;;  %v4198_v17 = vsel %vm3966_vm1, %v3939_v20, -inf  ;;  %v4226_v49 = vsel %vm3966_vm1, %v3950_v1, -inf }
 0x487   :  { %v4199_v31 = vmax.f32 %v4197_v18, %v4198_v17  ;;  %v4227_v36 = vsel %vm3966_vm1, %v3951_v9, -inf }
 0x488   :  { %v4148_v63 = vrot.slane %v4147_v14, 2  ;;  %v3942_v8 = vmax.f32 %v3720_v19, 0.0  ;;  %v4212_v19 = vsel %vm3966_vm1, %v3946_v33, -inf }
 0x489   :  { %v4201_v2 = vmax.f32 %v4199_v31, %v4200_v42  ;;  %v3947_v42 = vmax.f32 %v3745_v46, 0.0 }
 0x48a   :  { %v4149_v25 = vmax.f32 %v4147_v14, %v4148_v63  ;;  %v4852_v28 = vpop.f32.mrf.mxu1  ;;  %v4204_v45 = vsel %vm3966_vm1, %v3942_v8, -inf }
 0x48b   :  { %v3775_v63 = vadd.f32 %v8381_v29, %v4852_v28 }
 0x48c   :  { %v4150_v56 = vrot.slane %v4149_v25, 1  ;;  %v3769_v10 = vpop.f32.mrf.mxu1 }
 0x48d   :  { %v3770_v55 = vadd.f32 %v8381_v29, %v3769_v10 }
 0x48e   :  { %v4151_v3 = vmax.f32 %v4149_v25, %v4150_v56  ;;  %v3941_v25 = vmax.f32 %v3715_v61, 0.0  ;;  %v3725_v56 = vadd.f32 %v8381_v29, %v8362_v59  ;;  %v4210_v61 = vsel %vm3966_vm1, %v3945_v38, -inf }
 0x48f   :  { %v3952_v39 = vmax.f32 %v3770_v55, 0.0  ;;  %v3750_v55 = vadd.f32 %v8381_v29, %v8384_v27 }
 0x490   :  { %v4293_v41 = vsel %vm4292_vm6, %v4151_v3, %v4291_v26  ;;  %v4228_v3 = vmax.f32 %v4226_v49, %v4227_v36  ;;  %v3953_v26 = vmax.f32 %v3775_v63, 0.0  ;;  %v4202_v54 = vsel %vm3966_vm1, %v3941_v25, -inf }
 0x491   :  { %v8367_v13 = vsel %vm4294_vm7, %v4188_v47, %v4293_v41  ;;  %v4229_v50 = vsel %vm3966_vm1, %v3952_v39, -inf  ;;  %v4203_v7 = vmax.f32 %v4201_v2, %v4202_v54  ;;  %v3943_v60 = vmax.f32 %v3725_v56, 0.0 }
 0x492   :  { %v4230_v5 = vmax.f32 %v4228_v3, %v4229_v50  ;;  %v4231_v22 = vsel %vm3966_vm1, %v3953_v26, -inf  ;;  %v3755_v49 = vadd.f32 %v8381_v29, %v8373_v0  ;;  %v4214_v2 = vsel %vm3966_vm1, %v3947_v42, -inf }
 0x493   :  { %v4205_v59 = vmax.f32 %v4203_v7, %v4204_v45  ;;  %v4206_v34 = vsel %vm3966_vm1, %v3943_v60, -inf }
 0x494   :  { %v4232_v37 = vmax.f32 %v4230_v5, %v4231_v22 }
 0x495   :  { %v4207_v10 = vmax.f32 %v4205_v59, %v4206_v34 }
 0x497   :  { %v4855_v52 = vpop.f32.mrf.mxu1 }
 0x498   :  { %v3785_v21 = vadd.f32 %v8381_v29, %v4855_v52  ;;  %v4209_v52 = vmax.f32 %v4207_v10, %v4208_v35 }
 0x499   :  { %v3779_v40 = vpop.f32.mrf.mxu1 }
 0x49a   :  { %v3780_v53 = vadd.f32 %v8381_v29, %v3779_v40  ;;  %v3955_v43 = vmax.f32 %v3785_v21, 0.0  ;;  %v4211_v9 = vmax.f32 %v4209_v52, %v4210_v61 }
 0x49c   :  { %v3954_v41 = vmax.f32 %v3780_v53, 0.0  ;;  %v4235_v30 = vsel %vm3966_vm1, %v3955_v43, -inf  ;;  %v4213_v15 = vmax.f32 %v4211_v9, %v4212_v19 }
 0x49e   :  { %v4233_v48 = vsel %vm3966_vm1, %v3954_v41, -inf  ;;  %v4215_v56 = vmax.f32 %v4213_v15, %v4214_v2 }
 0x49f   :  { %v4234_v51 = vmax.f32 %v4232_v37, %v4233_v48 }
 0x4a1   :  { %v4236_v20 = vmax.f32 %v4234_v51, %v4235_v30 }
 0x4a2   :  { %v4858_v14 = vpop.f32.mrf.mxu1 }
 0x4a3   :  { %v3795_v4 = vadd.f32 %v8381_v29, %v4858_v14  ;;  %v3948_v14 = vmax.f32 %v3750_v55, 0.0 }
 0x4a4   :  { %v3789_v47 = vpop.f32.mrf.mxu1 }
 0x4a5   :  { %v3790_v16 = vadd.f32 %v8381_v29, %v3789_v47  ;;  %v3957_v18 = vmax.f32 %v3795_v4, 0.0  ;;  %v4216_v36 = vsel %vm3966_vm1, %v3948_v14, -inf  ;;  %v3949_v47 = vmax.f32 %v3755_v49, 0.0 }
 0x4a6   :  { %v4217_v41 = vmax.f32 %v4215_v56, %v4216_v36 }
 0x4a7   :  { %v3956_v44 = vmax.f32 %v3790_v16, 0.0  ;;  %v4239_v31 = vsel %vm3966_vm1, %v3957_v18, -inf  ;;  %v4218_v7 = vsel %vm3966_vm1, %v3949_v47, -inf }
 0x4a8   :  { %v4219_v16 = vmax.f32 %v4217_v41, %v4218_v7 }
 0x4a9   :  { %v4237_v23 = vsel %vm3966_vm1, %v3956_v44, -inf }
 0x4aa   :  { %v4238_v40 = vmax.f32 %v4236_v20, %v4237_v23  ;;  %v4220_v62 = vrot.slane %v4219_v16, 4 }
 0x4ac   :  { %v4240_v63 = vmax.f32 %v4238_v40, %v4239_v31  ;;  %v4221_v34 = vmax.f32 %v4219_v16, %v4220_v62  ;;  %v4528_v40 = vld [vmem:[%s8470_s6] ss:$0 sm:$0xff] }
 0x4ae   :  { %v4222_v38 = vrot.slane %v4221_v34, 2 }
 0x4af   :  { %v4861_v57 = vpop.f32.mrf.mxu1 }
 0x4b0   :  { %v3805_v39 = vadd.f32 %v8381_v29, %v4861_v57  ;;  %v4223_v23 = vmax.f32 %v4221_v34, %v4222_v38 }
 0x4b1   :  { %v3799_v28 = vpop.f32.mrf.mxu1 }
 0x4b2   :  { %v3800_v11 = vadd.f32 %v8381_v29, %v3799_v28  ;;  %v3959_v53 = vmax.f32 %v3805_v39, 0.0  ;;  %v4224_v20 = vrot.slane %v4223_v23, 1 }
 0x4b4   :  { %v3958_v1 = vmax.f32 %v3800_v11, 0.0  ;;  %v4243_v54 = vsel %vm3966_vm1, %v3959_v53, -inf  ;;  %v4225_v18 = vmax.f32 %v4223_v23, %v4224_v20 }
 0x4b6   :  { %v4241_v27 = vsel %vm3966_vm1, %v3958_v1, -inf  ;;  %v4297_v61 = vsel %vm4296_vm8, %v4225_v18, %v8367_v13 }
 0x4b7   :  { %v4242_v50 = vmax.f32 %v4240_v63, %v4241_v27 }
 0x4b9   :  { %v4244_v45 = vmax.f32 %v4242_v50, %v4243_v54 }
 0x4ba   :  { %v4864_v6 = vpop.f32.mrf.mxu1 }
 0x4bb   :  { %v3815_v32 = vadd.f32 %v8381_v29, %v4864_v6 }
 0x4bc   :  { %v3809_v24 = vpop.f32.mrf.mxu1 }
 0x4bd   :  { %v3810_v17 = vadd.f32 %v8381_v29, %v3809_v24  ;;  %v3961_v5 = vmax.f32 %v3815_v32, 0.0 }
 0x4bf   :  { %v3960_v25 = vmax.f32 %v3810_v17, 0.0  ;;  %v4247_v58 = vsel %vm3966_vm1, %v3961_v5, -inf }
 0x4c1   :  { %v4245_v0 = vsel %vm3966_vm1, %v3960_v25, -inf }
 0x4c2   :  { %v4246_v21 = vmax.f32 %v4244_v45, %v4245_v0 }
 0x4c4   :  { %v4248_v22 = vmax.f32 %v4246_v21, %v4247_v58 }
 0x4c7   :  { %v4867_v8 = vpop.f32.mrf.mxu1 }
 0x4c8   :  { %v3825_v60 = vadd.f32 %v8381_v29, %v4867_v8 }
 0x4c9   :  { %v3819_v3 = vpop.f32.mrf.mxu1 }
 0x4ca   :  { %v3820_v26 = vadd.f32 %v8381_v29, %v3819_v3  ;;  %v3963_v12 = vmax.f32 %v3825_v60, 0.0 }
 0x4cc   :  { %v3962_v57 = vmax.f32 %v3820_v26, 0.0  ;;  %v4251_v35 = vsel %vm3966_vm1, %v3963_v12, -inf }
 0x4ce   :  { %v4249_v59 = vsel %vm3966_vm1, %v3962_v57, -inf }
 0x4cf   :  { %v4250_v28 = vmax.f32 %v4248_v22, %v4249_v59 }
 0x4d1   :  { %v4252_v10 = vmax.f32 %v4250_v28, %v4251_v35 }
 0x4d2   :  { %v4870_v48 = vpop.f32.mrf.mxu1 }
 0x4d3   :  { %v3835_v37 = vadd.f32 %v8381_v29, %v4870_v48 }
 0x4d4   :  { %v3829_v43 = vpop.f32.mrf.mxu1 }
 0x4d5   :  { %v3830_v44 = vadd.f32 %v8381_v29, %v3829_v43  ;;  %v3965_v51 = vmax.f32 %v3835_v37, 0.0 }
 0x4d7   :  { %v3964_v6 = vmax.f32 %v3830_v44, 0.0  ;;  %v4255_v33 = vsel %vm3966_vm1, %v3965_v51, -inf }
 0x4d9   :  { %v4253_v4 = vsel %vm3966_vm1, %v3964_v6, -inf }
 0x4da   :  { %v4254_v11 = vmax.f32 %v4252_v10, %v4253_v4 }
 0x4dc   :  { %v4256_v52 = vmax.f32 %v4254_v11, %v4255_v33 }
 0x4de   :  { %v4257_v30 = vrot.slane %v4256_v52, 4 }
 0x4e0   :  { %v4258_v46 = vmax.f32 %v4256_v52, %v4257_v30 }
 0x4e2   :  { %v4259_v55 = vrot.slane %v4258_v46, 2 }
 0x4e4   :  { %v4260_v24 = vmax.f32 %v4258_v46, %v4259_v55 }
 0x4e6   :  { %v4261_v29 = vrot.slane %v4260_v24, 1 }
 0x4e8   :  { %v4262_v1 = vmax.f32 %v4260_v24, %v4261_v29 }
 0x4ea   :  { %v4299_v19 = vsel %vm4298_vm9, %v4262_v1, %v4297_v61 }
 0x4eb   :  { %4888 = vmatmul.mubr.msk.f32.vlgmr.msra.gmra.mxu1 %vm3966_vm1, %v4299_v19 }
 0x5ab   :  { %v4368_v9 = vpop.f32.mrf.mxu1 }
 0x5ac   :  { %v4369_v39 = vadd.f32 %v4528_v40, %v4368_v9 }
 0x5ad   :  { %v4889_v17 = vpop.f32.mrf.mxu1 }
 0x5ae   :  { %v4372_v42 = vmul.f32 %v4369_v39, %v4369_v39 }
 0x5b0   :  { %v4374_v14 = vsel %vm4373_vm10, %v4372_v42, 0.0 }
 0x5b1   :  { %4375 = vadd.xlane.f32.xlu1 %v4374_v14 }
 0x63a   :  { %v4376_v15 = vpop.xlane.xlu1 %4375 }
 0x63b   :  { %v4377_v31 = vadd.f32 1e-12, %v4376_v15 }
 0x63d   :  { %4964 = vrsqrt.f32 %v4377_v31 }
 0x64a   :  { %v4965_v13 = vpop.eup %4964 }
 0x64b   :  { %v4379_v27 = vmul.f32 %v4965_v13, %v4369_v39 }
 0x64d   :  { %4380 = vst.msk [vmem:[#allocation2] sm:$0xff] %vm4373_vm10, %v4379_v27 }
 0x64e   :  { %5092 = shalt.err (!%p5089_p4)
}
 0x64f   :  { %4390 = dma.vmem_to_hbm [thread:$0]  %s4388_s24, 128, %s8471_s7, [#allocation3]  }
 0x650   :  { %5101 = dma.done.wait [#allocation3], 128  }
 0x651   :  { %5102 = vsyncadd [#allocation3], 4294967168 }
 0x652   :  { %4394 = vsyncpa [#allocation3], 1 }

</bundles_post_ra>
